<compile_context>
chip_gen: v7x
topology: tpu7x:2x2x1
jax: 0.10.0
libtpu: 0.0.40
codegen_flags: <defaults>
</compile_context>

<pallas_src>
import functools

import jax
import jax.numpy as jnp
from jax.experimental import pallas as pl
from jax.experimental.pallas import tpu as pltpu


# ----------------------------------------------------------------------------
# Small-parameter packing layout (128-lane aligned so in-kernel slices are cheap)
# ----------------------------------------------------------------------------

def _align128(n):
    return ((n + 127) // 128) * 128


def _bias_layout(H, FF):
    names_widths = [
        ("in_proj_b", 3 * H), ("out_proj_b", H),
        ("ln1_g", H), ("ln1_b", H),
        ("lin1_b", FF), ("lin2_b", H),
        ("ln2_g", H), ("ln2_b", H),
    ]
    layout, off = {}, 0
    for name, w in names_widths:
        layout[name] = (off, w)
        off += _align128(w)
    return layout, off            # off == total packed (lane-aligned) width


# ----------------------------------------------------------------------------
# Fused Pallas kernel: one grid step == one TransformerEncoderLayer
# ----------------------------------------------------------------------------

def _encoder_layer_kernel(x_ref, pe_ref, fcw_ref, fcb_ref,
                          inw_ref, outw_ref, l1w_ref, l2w_ref, bias_ref,
                          o_ref, h_ref, attn_ref,
                          *, bias_layout, B, T, nheads, eps):
    H = fcw_ref.shape[1]
    dh = H // nheads
    scale = 1.0 / float(dh) ** 0.5
    li = pl.program_id(0)

    def bias(name):
        off, w = bias_layout[name]
        return bias_ref[0:1, off:off + w]            # (1, w) f32, lane-aligned slice

    # ---- step 0 only: input_fc + positional encoding into persistent h buffer ----
    @pl.when(li == 0)
    def _():
        h0 = jnp.dot(x_ref[...], fcw_ref[...],
                     preferred_element_type=jnp.float32) + fcb_ref[...]
        pe = pe_ref[...]                              # (T, H); broadcast over batch
        for bi in range(B):
            h_ref[bi * T:(bi + 1) * T, :] = h0[bi * T:(bi + 1) * T, :] + pe

    h = h_ref[...]                                    # (B*T, H) f32

    # ---- self-attention block -------------------------------------------------
    qkv = jnp.dot(h.astype(jnp.bfloat16), inw_ref[...],
                  preferred_element_type=jnp.float32) + bias("in_proj_b")
    q_all = qkv[:, :H] * scale                        # fold 1/sqrt(dh) once for all heads
    k_all = qkv[:, H:2 * H]
    v_all = qkv[:, 2 * H:]

    for bi in range(B):                               # static unroll (tiny B)
        r0 = bi * T
        for hi in range(nheads):                      # static unroll (tiny nheads)
            c = hi * dh
            q = q_all[r0:r0 + T, c:c + dh]
            k = k_all[r0:r0 + T, c:c + dh]
            v = v_all[r0:r0 + T, c:c + dh]
            s = jnp.dot(q, k.T, preferred_element_type=jnp.float32)
            m = jnp.max(s, axis=-1, keepdims=True)
            p = jnp.exp(s - m)
            denom = jnp.sum(p, axis=-1, keepdims=True)
            o = jnp.dot(p, v, preferred_element_type=jnp.float32)
            attn_ref[r0:r0 + T, c:c + dh] = o / denom   # exact divide (parity w/ ref)

    attn = jnp.dot(attn_ref[...].astype(jnp.bfloat16), outw_ref[...],
                   preferred_element_type=jnp.float32) + bias("out_proj_b")

    # dropout1 -> identity; h1 = LayerNorm(h + attn)
    h1 = h + attn
    mu = jnp.mean(h1, axis=-1, keepdims=True)
    var = jnp.mean((h1 - mu) ** 2, axis=-1, keepdims=True)
    h1 = (h1 - mu) * jax.lax.rsqrt(var + eps) * bias("ln1_g") + bias("ln1_b")

    # ---- feed-forward block (ReLU) ---------------------------------------------
    ff = jnp.dot(h1.astype(jnp.bfloat16), l1w_ref[...],
                 preferred_element_type=jnp.float32) + bias("lin1_b")
    ff = jnp.maximum(ff, 0.0)
    ff = jnp.dot(ff.astype(jnp.bfloat16), l2w_ref[...],
                 preferred_element_type=jnp.float32) + bias("lin2_b")

    # dropout2 -> identity; h = LayerNorm(h1 + ff)
    h2 = h1 + ff
    mu = jnp.mean(h2, axis=-1, keepdims=True)
    var = jnp.mean((h2 - mu) ** 2, axis=-1, keepdims=True)
    h_new = (h2 - mu) * jax.lax.rsqrt(var + eps) * bias("ln2_g") + bias("ln2_b")

    h_ref[...] = h_new                                # persists to next grid step

    @pl.when(li == pl.num_programs(0) - 1)
    def _():
        o_ref[...] = h_new.astype(o_ref.dtype)


def keypoint_encoder_forward(params, x):
    """x: (B, T, D_in) -> (B, T, H).  One pallas_call, grid over layers."""
    B, T, D = x.shape
    H = params["input_fc_w"].shape[1]
    nheads = params["nheads"]
    layers = params["layers"]
    L = len(layers)
    FF = layers[0]["lin1_w"].shape[1]

    layout, P = _bias_layout(H, FF)

    # stacked bf16 matmul weights (leading layer axis -> per-layer BlockSpec fetch)
    in_w = jnp.stack([p["in_proj_w"] for p in layers])        # (L, H, 3H) bf16
    out_w = jnp.stack([p["out_proj_w"] for p in layers])      # (L, H, H)  bf16
    l1_w = jnp.stack([p["lin1_w"] for p in layers])           # (L, H, FF) bf16
    l2_w = jnp.stack([p["lin2_w"] for p in layers])           # (L, FF, H) bf16

    # one lane-aligned f32 row per layer holding all small parameters
    packs = []
    for p in layers:
        row = jnp.zeros((1, P), jnp.float32)
        for name, (off, w) in layout.items():
            row = row.at[0, off:off + w].set(p[name].astype(jnp.float32))
        packs.append(row)
    bias_pack = jnp.stack(packs)                               # (L, 1, P) f32

    pe = params["pe"][:T]                                      # (T, H) f32 (no tiling)

    kernel = functools.partial(_encoder_layer_kernel, bias_layout=layout,
                               B=B, T=T, nheads=nheads, eps=1e-5)

    grid_spec = pltpu.PrefetchScalarGridSpec(
        num_scalar_prefetch=0,
        grid=(L,),
        in_specs=[
            pl.BlockSpec((B * T, D), lambda li: (0, 0)),          # x   (step-0 only)
            pl.BlockSpec((T, H), lambda li: (0, 0)),              # pe  (step-0 only)
            pl.BlockSpec((D, H), lambda li: (0, 0)),              # input_fc_w
            pl.BlockSpec((1, H), lambda li: (0, 0)),              # input_fc_b
            pl.BlockSpec((None, H, 3 * H), lambda li: (li, 0, 0)),  # in_proj_w
            pl.BlockSpec((None, H, H), lambda li: (li, 0, 0)),      # out_proj_w
            pl.BlockSpec((None, H, FF), lambda li: (li, 0, 0)),     # lin1_w
            pl.BlockSpec((None, FF, H), lambda li: (li, 0, 0)),     # lin2_w
            pl.BlockSpec((None, 1, P), lambda li: (li, 0, 0)),      # packed biases
        ],
        out_specs=pl.BlockSpec((B * T, H), lambda li: (0, 0)),
        scratch_shapes=[pltpu.VMEM((B * T, H), jnp.float32),    # persistent h state
                        pltpu.VMEM((B * T, H), jnp.float32)],   # attention head slab
    )

    out2d = pl.pallas_call(
        kernel,
        out_shape=jax.ShapeDtypeStruct((B * T, H), jnp.float32),
        grid_spec=grid_spec,
        compiler_params=pltpu.CompilerParams(
            dimension_semantics=("arbitrary",),      # layer axis is sequential
            vmem_limit_bytes=64 * 1024 * 1024),
    )(x.reshape(B * T, D), pe,
      params["input_fc_w"], params["input_fc_b"].reshape(1, H),
      in_w, out_w, l1_w, l2_w, bias_pack)
    return out2d.reshape(B, T, H)


# ----------------------------------------------------------------------------
# Deterministic parameter construction (matmul weights stored in bf16)
# ----------------------------------------------------------------------------

def make_positional_encoding(max_len, d_model):
    pos = jnp.arange(max_len, dtype=jnp.float32)[:, None]
    div = jnp.exp(jnp.arange(0, d_model, 2, dtype=jnp.float32)
                  * (-jnp.log(10000.0) / d_model))
    pe = jnp.zeros((max_len, d_model), jnp.float32)
    pe = pe.at[:, 0::2].set(jnp.sin(pos * div))
    pe = pe.at[:, 1::2].set(jnp.cos(pos * div))
    return pe


def init_params(key, input_dim, hidden_dim, nheads, n_layers, ff_dim, max_len=1000):
    def nrm(k, shape, scale=0.05):
        return scale * jax.random.normal(k, shape, jnp.float32)

    keys = jax.random.split(key, 2 + n_layers)
    params = {
        "nheads": nheads,
        "pe": make_positional_encoding(max_len, hidden_dim),
        "input_fc_w": nrm(keys[0], (input_dim, hidden_dim)),
        "input_fc_b": nrm(keys[1], (hidden_dim,)),
        "layers": [],
    }
    for li in range(n_layers):
        lk = jax.random.split(keys[2 + li], 8)
        params["layers"].append({
            "in_proj_w": nrm(lk[0], (hidden_dim, 3 * hidden_dim)).astype(jnp.bfloat16),
            "in_proj_b": nrm(lk[1], (3 * hidden_dim,)),
            "out_proj_w": nrm(lk[2], (hidden_dim, hidden_dim)).astype(jnp.bfloat16),
            "out_proj_b": nrm(lk[3], (hidden_dim,)),
            "lin1_w": nrm(lk[4], (hidden_dim, ff_dim)).astype(jnp.bfloat16),
            "lin1_b": nrm(lk[5], (ff_dim,)),
            "lin2_w": nrm(lk[6], (ff_dim, hidden_dim)).astype(jnp.bfloat16),
            "lin2_b": nrm(lk[7], (hidden_dim,)),
            "ln1_g": jnp.ones((hidden_dim,), jnp.float32),
            "ln1_b": jnp.zeros((hidden_dim,), jnp.float32),
            "ln2_g": jnp.ones((hidden_dim,), jnp.float32),
            "ln2_b": jnp.zeros((hidden_dim,), jnp.float32),
        })
    return params


# ----------------------------------------------------------------------------
# Pure-JAX reference (f32 math, same stored bf16 weight values) for sanity check
# ----------------------------------------------------------------------------

def reference_forward(params, x):
    B, T, D = x.shape
    H = params["input_fc_w"].shape[1]
    nheads = params["nheads"]
    dh = H // nheads
    eps = 1e-5

    h = x @ params["input_fc_w"] + params["input_fc_b"]
    h = h + params["pe"][:T][None]
    for p in params["layers"]:
        in_w = p["in_proj_w"].astype(jnp.float32)
        out_w = p["out_proj_w"].astype(jnp.float32)
        l1w = p["lin1_w"].astype(jnp.float32)
        l2w = p["lin2_w"].astype(jnp.float32)

        qkv = h @ in_w + p["in_proj_b"]                          # (B, T, 3H)
        q, k, v = qkv[..., :H], qkv[..., H:2 * H], qkv[..., 2 * H:]

        def split(a):
            return a.reshape(B, T, nheads, dh).transpose(0, 2, 1, 3)

        q, k, v = split(q), split(k), split(v)
        s = jnp.einsum("bhqd,bhkd->bhqk", q, k) / (dh ** 0.5)
        a = jax.nn.softmax(s, axis=-1)
        o = jnp.einsum("bhqk,bhkd->bhqd", a, v)
        o = o.transpose(0, 2, 1, 3).reshape(B, T, H)
        attn = o @ out_w + p["out_proj_b"]

        h1 = h + attn
        mu = h1.mean(-1, keepdims=True)
        var = ((h1 - mu) ** 2).mean(-1, keepdims=True)
        h1 = (h1 - mu) / jnp.sqrt(var + eps) * p["ln1_g"] + p["ln1_b"]

        ff = jnp.maximum(h1 @ l1w + p["lin1_b"], 0.0)
        ff = ff @ l2w + p["lin2_b"]

        h2 = h1 + ff
        mu = h2.mean(-1, keepdims=True)
        var = ((h2 - mu) ** 2).mean(-1, keepdims=True)
        h = (h2 - mu) / jnp.sqrt(var + eps) * p["ln2_g"] + p["ln2_b"]
    return h


# ----------------------------------------------------------------------------

if __name__ == "__main__":
    B, T, D_IN = 2, 8, 6          # small sequence of keypoint features
    HIDDEN, NHEADS, NLAYERS = 32, 8, 2
    FF_DIM = 2048                 # hard-coded dim_feedforward in the module

    key = jax.random.PRNGKey(0)
    pkey, xkey = jax.random.split(key)
    params = init_params(pkey, D_IN, HIDDEN, NHEADS, NLAYERS, FF_DIM)
    x = jax.random.normal(xkey, (B, T, D_IN), jnp.float32)

    out = keypoint_encoder_forward(params, x)
    out = jax.block_until_ready(out)

    assert out.shape == (B, T, HIDDEN)
    assert bool(jnp.all(jnp.isfinite(out)))

    ref = reference_forward(params, x)
    assert bool(jnp.allclose(out, ref, atol=5e-2, rtol=5e-2))

    # TODO(synk): dropout layers are treated as identity (inference semantics).
    print("KERNEL_OK")
</pallas_src>

<mosaic_0001>
module attributes {stable_mosaic.version = 11 : i64} {
  func.func @_encoder_layer_kernel(%arg0: i32, %arg1: memref<16x6xf32, #tpu.memory_space<vmem>>, %arg2: memref<8x32xf32, #tpu.memory_space<vmem>>, %arg3: memref<6x32xf32, #tpu.memory_space<vmem>>, %arg4: memref<1x32xf32, #tpu.memory_space<vmem>>, %arg5: memref<1x32x96xbf16, #tpu.memory_space<vmem>>, %arg6: memref<1x32x32xbf16, #tpu.memory_space<vmem>>, %arg7: memref<1x32x2048xbf16, #tpu.memory_space<vmem>>, %arg8: memref<1x2048x32xbf16, #tpu.memory_space<vmem>>, %arg9: memref<1x1x2944xf32, #tpu.memory_space<vmem>>, %arg10: memref<16x32xf32, #tpu.memory_space<vmem>>, %arg11: memref<16x32xf32, #tpu.memory_space<vmem>>, %arg12: memref<16x32xf32, #tpu.memory_space<vmem>>) attributes {dimension_semantics = [#tpu.dimension_semantics<arbitrary>], iteration_bounds = array<i64: 2>, scalar_prefetch = 0 : i64, scratch_operands = 2 : i64, tpu.core_type = #tpu.core_type<tc>, window_params = [{pipeline_mode = #tpu.pipeline_mode<synchronous>, transform_indices = @transform_0, window_bounds = array<i64: 16, 6>}, {pipeline_mode = #tpu.pipeline_mode<synchronous>, transform_indices = @transform_1, window_bounds = array<i64: 8, 32>}, {pipeline_mode = #tpu.pipeline_mode<synchronous>, transform_indices = @transform_2, window_bounds = array<i64: 6, 32>}, {pipeline_mode = #tpu.pipeline_mode<synchronous>, transform_indices = @transform_3, window_bounds = array<i64: 1, 32>}, {transform_indices = @transform_4, window_bounds = array<i64: 1, 32, 96>}, {transform_indices = @transform_5, window_bounds = array<i64: 1, 32, 32>}, {transform_indices = @transform_6, window_bounds = array<i64: 1, 32, 2048>}, {transform_indices = @transform_7, window_bounds = array<i64: 1, 2048, 32>}, {transform_indices = @transform_8, window_bounds = array<i64: 1, 1, 2944>}, {pipeline_mode = #tpu.pipeline_mode<synchronous>, transform_indices = @transform_9, window_bounds = array<i64: 16, 32>}]} {
    %c0_i32 = arith.constant 0 : i32
    %0 = arith.cmpi eq, %arg0, %c0_i32 : i32
    %1 = arith.extui %0 : i1 to i32
    %c0_i32_0 = arith.constant 0 : i32
    %2 = arith.cmpi ne, %1, %c0_i32_0 : i32
    scf.if %2 {
      %c0_140 = arith.constant 0 : index
      %c0_141 = arith.constant 0 : index
      %358 = vector.load %arg1[%c0_140, %c0_141] : memref<16x6xf32, #tpu.memory_space<vmem>>, vector<16x6xf32>
      %c0_142 = arith.constant 0 : index
      %c0_143 = arith.constant 0 : index
      %359 = vector.load %arg3[%c0_142, %c0_143] : memref<6x32xf32, #tpu.memory_space<vmem>>, vector<6x32xf32>
      %cst_144 = arith.constant dense<0.000000e+00> : vector<16x32xf32>
      %360 = tpu.matmul %358, %359, %cst_144 {dimension_numbers = #tpu.dot_dimension_numbers<[1], [0], [0], [1], [0, 0, 1, 1], [], []>} : vector<16x6xf32>, vector<6x32xf32>, vector<16x32xf32> -> vector<16x32xf32>
      %c0_145 = arith.constant 0 : index
      %c0_146 = arith.constant 0 : index
      %361 = vector.load %arg4[%c0_145, %c0_146] : memref<1x32xf32, #tpu.memory_space<vmem>>, vector<1x32xf32>
      %362 = vector.broadcast %361 : vector<1x32xf32> to vector<16x32xf32>
      %363 = arith.addf %360, %362 : vector<16x32xf32>
      %c0_147 = arith.constant 0 : index
      %c0_148 = arith.constant 0 : index
      %364 = vector.load %arg2[%c0_147, %c0_148] : memref<8x32xf32, #tpu.memory_space<vmem>>, vector<8x32xf32>
      %365 = vector.extract_strided_slice %363 {offsets = [0, 0], sizes = [8, 32], strides = [1, 1]} : vector<16x32xf32> to vector<8x32xf32>
      %366 = arith.addf %365, %364 : vector<8x32xf32>
      %c0_149 = arith.constant 0 : index
      %c0_150 = arith.constant 0 : index
      %367 = vector.load %arg11[%c0_149, %c0_150] : memref<16x32xf32, #tpu.memory_space<vmem>>, vector<8x32xf32>
      tpu.vector_store %arg11[%c0_149, %c0_150], %366 {strides = array<i32>} : memref<16x32xf32, #tpu.memory_space<vmem>>, vector<8x32xf32>,
      %368 = vector.extract_strided_slice %363 {offsets = [8, 0], sizes = [8, 32], strides = [1, 1]} : vector<16x32xf32> to vector<8x32xf32>
      %369 = arith.addf %368, %364 : vector<8x32xf32>
      %c8_151 = arith.constant 8 : index
      %c0_152 = arith.constant 0 : index
      %370 = vector.load %arg11[%c8_151, %c0_152] : memref<16x32xf32, #tpu.memory_space<vmem>>, vector<8x32xf32>
      tpu.vector_store %arg11[%c8_151, %c0_152], %369 {strides = array<i32>} : memref<16x32xf32, #tpu.memory_space<vmem>>, vector<8x32xf32>,
    } else {
    }
    %c0 = arith.constant 0 : index
    %c0_1 = arith.constant 0 : index
    %3 = vector.load %arg11[%c0, %c0_1] : memref<16x32xf32, #tpu.memory_space<vmem>>, vector<16x32xf32>
    %4 = arith.truncf %3 : vector<16x32xf32> to vector<16x32xbf16>
    %c0_2 = arith.constant 0 : index
    %c0_3 = arith.constant 0 : index
    %c0_4 = arith.constant 0 : index
    %5 = vector.load %arg5[%c0_2, %c0_3, %c0_4] : memref<1x32x96xbf16, #tpu.memory_space<vmem>>, vector<1x32x96xbf16>
    %6 = vector.shape_cast %5 : vector<1x32x96xbf16> to vector<32x96xbf16>
    %cst = arith.constant dense<0.000000e+00> : vector<16x96xf32>
    %7 = tpu.matmul %4, %6, %cst {dimension_numbers = #tpu.dot_dimension_numbers<[1], [0], [0], [1], [0, 0, 1, 1], [], []>} : vector<16x32xbf16>, vector<32x96xbf16>, vector<16x96xf32> -> vector<16x96xf32>
    %c0_5 = arith.constant 0 : index
    %c0_6 = arith.constant 0 : index
    %c0_7 = arith.constant 0 : index
    %8 = vector.load %arg9[%c0_5, %c0_6, %c0_7] : memref<1x1x2944xf32, #tpu.memory_space<vmem>>, vector<1x1x96xf32>
    %9 = vector.shape_cast %8 : vector<1x1x96xf32> to vector<1x96xf32>
    %10 = vector.broadcast %9 : vector<1x96xf32> to vector<16x96xf32>
    %11 = arith.addf %7, %10 : vector<16x96xf32>
    %12 = vector.extract_strided_slice %11 {offsets = [0, 0], sizes = [16, 32], strides = [1, 1]} : vector<16x96xf32> to vector<16x32xf32>
    %cst_8 = arith.constant 5.000000e-01 : f32
    %13 = vector.broadcast %cst_8 : f32 to vector<16x32xf32>
    %14 = arith.mulf %12, %13 : vector<16x32xf32>
    %15 = vector.extract_strided_slice %11 {offsets = [0, 32], sizes = [16, 32], strides = [1, 1]} : vector<16x96xf32> to vector<16x32xf32>
    %16 = vector.extract_strided_slice %11 {offsets = [0, 64], sizes = [16, 32], strides = [1, 1]} : vector<16x96xf32> to vector<16x32xf32>
    %17 = vector.extract_strided_slice %14 {offsets = [0, 0], sizes = [8, 4], strides = [1, 1]} : vector<16x32xf32> to vector<8x4xf32>
    %18 = vector.extract_strided_slice %15 {offsets = [0, 0], sizes = [8, 4], strides = [1, 1]} : vector<16x32xf32> to vector<8x4xf32>
    %19 = vector.extract_strided_slice %16 {offsets = [0, 0], sizes = [8, 4], strides = [1, 1]} : vector<16x32xf32> to vector<8x4xf32>
    %20 = tpu.transpose %18, [1, 0] : vector<8x4xf32> -> vector<4x8xf32>
    %cst_9 = arith.constant dense<0.000000e+00> : vector<8x8xf32>
    %21 = tpu.matmul %17, %20, %cst_9 {dimension_numbers = #tpu.dot_dimension_numbers<[1], [0], [0], [1], [0, 0, 1, 1], [], []>} : vector<8x4xf32>, vector<4x8xf32>, vector<8x8xf32> -> vector<8x8xf32>
    %cst_10 = arith.constant dense<0xFF800000> : vector<8xf32>
    %22 = vector.multi_reduction <maximumf>, %21, %cst_10 [1] : vector<8x8xf32> to vector<8xf32>
    %23 = vector.shape_cast %22 : vector<8xf32> to vector<8x1xf32>
    %24 = vector.broadcast %23 : vector<8x1xf32> to vector<8x8xf32>
    %25 = arith.subf %21, %24 : vector<8x8xf32>
    %26 = math.exp %25 : vector<8x8xf32>
    %cst_11 = arith.constant dense<0.000000e+00> : vector<8xf32>
    %27 = vector.multi_reduction <add>, %26, %cst_11 [1] : vector<8x8xf32> to vector<8xf32>
    %28 = vector.shape_cast %27 : vector<8xf32> to vector<8x1xf32>
    %cst_12 = arith.constant dense<0.000000e+00> : vector<8x4xf32>
    %29 = tpu.matmul %26, %19, %cst_12 {dimension_numbers = #tpu.dot_dimension_numbers<[1], [0], [0], [1], [0, 0, 1, 1], [], []>} : vector<8x8xf32>, vector<8x4xf32>, vector<8x4xf32> -> vector<8x4xf32>
    %30 = vector.broadcast %28 : vector<8x1xf32> to vector<8x4xf32>
    %31 = arith.divf %29, %30 : vector<8x4xf32>
    %c0_13 = arith.constant 0 : index
    %c0_14 = arith.constant 0 : index
    %32 = vector.load %arg12[%c0_13, %c0_14] : memref<16x32xf32, #tpu.memory_space<vmem>>, vector<8x4xf32>
    tpu.vector_store %arg12[%c0_13, %c0_14], %31 {strides = array<i32>} : memref<16x32xf32, #tpu.memory_space<vmem>>, vector<8x4xf32>,
    %33 = vector.extract_strided_slice %14 {offsets = [0, 4], sizes = [8, 4], strides = [1, 1]} : vector<16x32xf32> to vector<8x4xf32>
    %34 = vector.extract_strided_slice %15 {offsets = [0, 4], sizes = [8, 4], strides = [1, 1]} : vector<16x32xf32> to vector<8x4xf32>
    %35 = vector.extract_strided_slice %16 {offsets = [0, 4], sizes = [8, 4], strides = [1, 1]} : vector<16x32xf32> to vector<8x4xf32>
    %36 = tpu.transpose %34, [1, 0] : vector<8x4xf32> -> vector<4x8xf32>
    %cst_15 = arith.constant dense<0.000000e+00> : vector<8x8xf32>
    %37 = tpu.matmul %33, %36, %cst_15 {dimension_numbers = #tpu.dot_dimension_numbers<[1], [0], [0], [1], [0, 0, 1, 1], [], []>} : vector<8x4xf32>, vector<4x8xf32>, vector<8x8xf32> -> vector<8x8xf32>
    %cst_16 = arith.constant dense<0xFF800000> : vector<8xf32>
    %38 = vector.multi_reduction <maximumf>, %37, %cst_16 [1] : vector<8x8xf32> to vector<8xf32>
    %39 = vector.shape_cast %38 : vector<8xf32> to vector<8x1xf32>
    %40 = vector.broadcast %39 : vector<8x1xf32> to vector<8x8xf32>
    %41 = arith.subf %37, %40 : vector<8x8xf32>
    %42 = math.exp %41 : vector<8x8xf32>
    %cst_17 = arith.constant dense<0.000000e+00> : vector<8xf32>
    %43 = vector.multi_reduction <add>, %42, %cst_17 [1] : vector<8x8xf32> to vector<8xf32>
    %44 = vector.shape_cast %43 : vector<8xf32> to vector<8x1xf32>
    %cst_18 = arith.constant dense<0.000000e+00> : vector<8x4xf32>
    %45 = tpu.matmul %42, %35, %cst_18 {dimension_numbers = #tpu.dot_dimension_numbers<[1], [0], [0], [1], [0, 0, 1, 1], [], []>} : vector<8x8xf32>, vector<8x4xf32>, vector<8x4xf32> -> vector<8x4xf32>
    %46 = vector.broadcast %44 : vector<8x1xf32> to vector<8x4xf32>
    %47 = arith.divf %45, %46 : vector<8x4xf32>
    %c0_19 = arith.constant 0 : index
    %c4 = arith.constant 4 : index
    %48 = vector.load %arg12[%c0_19, %c4] : memref<16x32xf32, #tpu.memory_space<vmem>>, vector<8x4xf32>
    tpu.vector_store %arg12[%c0_19, %c4], %47 {strides = array<i32>} : memref<16x32xf32, #tpu.memory_space<vmem>>, vector<8x4xf32>,
    %49 = vector.extract_strided_slice %14 {offsets = [0, 8], sizes = [8, 4], strides = [1, 1]} : vector<16x32xf32> to vector<8x4xf32>
    %50 = vector.extract_strided_slice %15 {offsets = [0, 8], sizes = [8, 4], strides = [1, 1]} : vector<16x32xf32> to vector<8x4xf32>
    %51 = vector.extract_strided_slice %16 {offsets = [0, 8], sizes = [8, 4], strides = [1, 1]} : vector<16x32xf32> to vector<8x4xf32>
    %52 = tpu.transpose %50, [1, 0] : vector<8x4xf32> -> vector<4x8xf32>
    %cst_20 = arith.constant dense<0.000000e+00> : vector<8x8xf32>
    %53 = tpu.matmul %49, %52, %cst_20 {dimension_numbers = #tpu.dot_dimension_numbers<[1], [0], [0], [1], [0, 0, 1, 1], [], []>} : vector<8x4xf32>, vector<4x8xf32>, vector<8x8xf32> -> vector<8x8xf32>
    %cst_21 = arith.constant dense<0xFF800000> : vector<8xf32>
    %54 = vector.multi_reduction <maximumf>, %53, %cst_21 [1] : vector<8x8xf32> to vector<8xf32>
    %55 = vector.shape_cast %54 : vector<8xf32> to vector<8x1xf32>
    %56 = vector.broadcast %55 : vector<8x1xf32> to vector<8x8xf32>
    %57 = arith.subf %53, %56 : vector<8x8xf32>
    %58 = math.exp %57 : vector<8x8xf32>
    %cst_22 = arith.constant dense<0.000000e+00> : vector<8xf32>
    %59 = vector.multi_reduction <add>, %58, %cst_22 [1] : vector<8x8xf32> to vector<8xf32>
    %60 = vector.shape_cast %59 : vector<8xf32> to vector<8x1xf32>
    %cst_23 = arith.constant dense<0.000000e+00> : vector<8x4xf32>
    %61 = tpu.matmul %58, %51, %cst_23 {dimension_numbers = #tpu.dot_dimension_numbers<[1], [0], [0], [1], [0, 0, 1, 1], [], []>} : vector<8x8xf32>, vector<8x4xf32>, vector<8x4xf32> -> vector<8x4xf32>
    %62 = vector.broadcast %60 : vector<8x1xf32> to vector<8x4xf32>
    %63 = arith.divf %61, %62 : vector<8x4xf32>
    %c0_24 = arith.constant 0 : index
    %c8 = arith.constant 8 : index
    %64 = vector.load %arg12[%c0_24, %c8] : memref<16x32xf32, #tpu.memory_space<vmem>>, vector<8x4xf32>
    tpu.vector_store %arg12[%c0_24, %c8], %63 {strides = array<i32>} : memref<16x32xf32, #tpu.memory_space<vmem>>, vector<8x4xf32>,
    %65 = vector.extract_strided_slice %14 {offsets = [0, 12], sizes = [8, 4], strides = [1, 1]} : vector<16x32xf32> to vector<8x4xf32>
    %66 = vector.extract_strided_slice %15 {offsets = [0, 12], sizes = [8, 4], strides = [1, 1]} : vector<16x32xf32> to vector<8x4xf32>
    %67 = vector.extract_strided_slice %16 {offsets = [0, 12], sizes = [8, 4], strides = [1, 1]} : vector<16x32xf32> to vector<8x4xf32>
    %68 = tpu.transpose %66, [1, 0] : vector<8x4xf32> -> vector<4x8xf32>
    %cst_25 = arith.constant dense<0.000000e+00> : vector<8x8xf32>
    %69 = tpu.matmul %65, %68, %cst_25 {dimension_numbers = #tpu.dot_dimension_numbers<[1], [0], [0], [1], [0, 0, 1, 1], [], []>} : vector<8x4xf32>, vector<4x8xf32>, vector<8x8xf32> -> vector<8x8xf32>
    %cst_26 = arith.constant dense<0xFF800000> : vector<8xf32>
    %70 = vector.multi_reduction <maximumf>, %69, %cst_26 [1] : vector<8x8xf32> to vector<8xf32>
    %71 = vector.shape_cast %70 : vector<8xf32> to vector<8x1xf32>
    %72 = vector.broadcast %71 : vector<8x1xf32> to vector<8x8xf32>
    %73 = arith.subf %69, %72 : vector<8x8xf32>
    %74 = math.exp %73 : vector<8x8xf32>
    %cst_27 = arith.constant dense<0.000000e+00> : vector<8xf32>
    %75 = vector.multi_reduction <add>, %74, %cst_27 [1] : vector<8x8xf32> to vector<8xf32>
    %76 = vector.shape_cast %75 : vector<8xf32> to vector<8x1xf32>
    %cst_28 = arith.constant dense<0.000000e+00> : vector<8x4xf32>
    %77 = tpu.matmul %74, %67, %cst_28 {dimension_numbers = #tpu.dot_dimension_numbers<[1], [0], [0], [1], [0, 0, 1, 1], [], []>} : vector<8x8xf32>, vector<8x4xf32>, vector<8x4xf32> -> vector<8x4xf32>
    %78 = vector.broadcast %76 : vector<8x1xf32> to vector<8x4xf32>
    %79 = arith.divf %77, %78 : vector<8x4xf32>
    %c0_29 = arith.constant 0 : index
    %c12 = arith.constant 12 : index
    %80 = vector.load %arg12[%c0_29, %c12] : memref<16x32xf32, #tpu.memory_space<vmem>>, vector<8x4xf32>
    tpu.vector_store %arg12[%c0_29, %c12], %79 {strides = array<i32>} : memref<16x32xf32, #tpu.memory_space<vmem>>, vector<8x4xf32>,
    %81 = vector.extract_strided_slice %14 {offsets = [0, 16], sizes = [8, 4], strides = [1, 1]} : vector<16x32xf32> to vector<8x4xf32>
    %82 = vector.extract_strided_slice %15 {offsets = [0, 16], sizes = [8, 4], strides = [1, 1]} : vector<16x32xf32> to vector<8x4xf32>
    %83 = vector.extract_strided_slice %16 {offsets = [0, 16], sizes = [8, 4], strides = [1, 1]} : vector<16x32xf32> to vector<8x4xf32>
    %84 = tpu.transpose %82, [1, 0] : vector<8x4xf32> -> vector<4x8xf32>
    %cst_30 = arith.constant dense<0.000000e+00> : vector<8x8xf32>
    %85 = tpu.matmul %81, %84, %cst_30 {dimension_numbers = #tpu.dot_dimension_numbers<[1], [0], [0], [1], [0, 0, 1, 1], [], []>} : vector<8x4xf32>, vector<4x8xf32>, vector<8x8xf32> -> vector<8x8xf32>
    %cst_31 = arith.constant dense<0xFF800000> : vector<8xf32>
    %86 = vector.multi_reduction <maximumf>, %85, %cst_31 [1] : vector<8x8xf32> to vector<8xf32>
    %87 = vector.shape_cast %86 : vector<8xf32> to vector<8x1xf32>
    %88 = vector.broadcast %87 : vector<8x1xf32> to vector<8x8xf32>
    %89 = arith.subf %85, %88 : vector<8x8xf32>
    %90 = math.exp %89 : vector<8x8xf32>
    %cst_32 = arith.constant dense<0.000000e+00> : vector<8xf32>
    %91 = vector.multi_reduction <add>, %90, %cst_32 [1] : vector<8x8xf32> to vector<8xf32>
    %92 = vector.shape_cast %91 : vector<8xf32> to vector<8x1xf32>
    %cst_33 = arith.constant dense<0.000000e+00> : vector<8x4xf32>
    %93 = tpu.matmul %90, %83, %cst_33 {dimension_numbers = #tpu.dot_dimension_numbers<[1], [0], [0], [1], [0, 0, 1, 1], [], []>} : vector<8x8xf32>, vector<8x4xf32>, vector<8x4xf32> -> vector<8x4xf32>
    %94 = vector.broadcast %92 : vector<8x1xf32> to vector<8x4xf32>
    %95 = arith.divf %93, %94 : vector<8x4xf32>
    %c0_34 = arith.constant 0 : index
    %c16 = arith.constant 16 : index
    %96 = vector.load %arg12[%c0_34, %c16] : memref<16x32xf32, #tpu.memory_space<vmem>>, vector<8x4xf32>
    tpu.vector_store %arg12[%c0_34, %c16], %95 {strides = array<i32>} : memref<16x32xf32, #tpu.memory_space<vmem>>, vector<8x4xf32>,
    %97 = vector.extract_strided_slice %14 {offsets = [0, 20], sizes = [8, 4], strides = [1, 1]} : vector<16x32xf32> to vector<8x4xf32>
    %98 = vector.extract_strided_slice %15 {offsets = [0, 20], sizes = [8, 4], strides = [1, 1]} : vector<16x32xf32> to vector<8x4xf32>
    %99 = vector.extract_strided_slice %16 {offsets = [0, 20], sizes = [8, 4], strides = [1, 1]} : vector<16x32xf32> to vector<8x4xf32>
    %100 = tpu.transpose %98, [1, 0] : vector<8x4xf32> -> vector<4x8xf32>
    %cst_35 = arith.constant dense<0.000000e+00> : vector<8x8xf32>
    %101 = tpu.matmul %97, %100, %cst_35 {dimension_numbers = #tpu.dot_dimension_numbers<[1], [0], [0], [1], [0, 0, 1, 1], [], []>} : vector<8x4xf32>, vector<4x8xf32>, vector<8x8xf32> -> vector<8x8xf32>
    %cst_36 = arith.constant dense<0xFF800000> : vector<8xf32>
    %102 = vector.multi_reduction <maximumf>, %101, %cst_36 [1] : vector<8x8xf32> to vector<8xf32>
    %103 = vector.shape_cast %102 : vector<8xf32> to vector<8x1xf32>
    %104 = vector.broadcast %103 : vector<8x1xf32> to vector<8x8xf32>
    %105 = arith.subf %101, %104 : vector<8x8xf32>
    %106 = math.exp %105 : vector<8x8xf32>
    %cst_37 = arith.constant dense<0.000000e+00> : vector<8xf32>
    %107 = vector.multi_reduction <add>, %106, %cst_37 [1] : vector<8x8xf32> to vector<8xf32>
    %108 = vector.shape_cast %107 : vector<8xf32> to vector<8x1xf32>
    %cst_38 = arith.constant dense<0.000000e+00> : vector<8x4xf32>
    %109 = tpu.matmul %106, %99, %cst_38 {dimension_numbers = #tpu.dot_dimension_numbers<[1], [0], [0], [1], [0, 0, 1, 1], [], []>} : vector<8x8xf32>, vector<8x4xf32>, vector<8x4xf32> -> vector<8x4xf32>
    %110 = vector.broadcast %108 : vector<8x1xf32> to vector<8x4xf32>
    %111 = arith.divf %109, %110 : vector<8x4xf32>
    %c0_39 = arith.constant 0 : index
    %c20 = arith.constant 20 : index
    %112 = vector.load %arg12[%c0_39, %c20] : memref<16x32xf32, #tpu.memory_space<vmem>>, vector<8x4xf32>
    tpu.vector_store %arg12[%c0_39, %c20], %111 {strides = array<i32>} : memref<16x32xf32, #tpu.memory_space<vmem>>, vector<8x4xf32>,
    %113 = vector.extract_strided_slice %14 {offsets = [0, 24], sizes = [8, 4], strides = [1, 1]} : vector<16x32xf32> to vector<8x4xf32>
    %114 = vector.extract_strided_slice %15 {offsets = [0, 24], sizes = [8, 4], strides = [1, 1]} : vector<16x32xf32> to vector<8x4xf32>
    %115 = vector.extract_strided_slice %16 {offsets = [0, 24], sizes = [8, 4], strides = [1, 1]} : vector<16x32xf32> to vector<8x4xf32>
    %116 = tpu.transpose %114, [1, 0] : vector<8x4xf32> -> vector<4x8xf32>
    %cst_40 = arith.constant dense<0.000000e+00> : vector<8x8xf32>
    %117 = tpu.matmul %113, %116, %cst_40 {dimension_numbers = #tpu.dot_dimension_numbers<[1], [0], [0], [1], [0, 0, 1, 1], [], []>} : vector<8x4xf32>, vector<4x8xf32>, vector<8x8xf32> -> vector<8x8xf32>
    %cst_41 = arith.constant dense<0xFF800000> : vector<8xf32>
    %118 = vector.multi_reduction <maximumf>, %117, %cst_41 [1] : vector<8x8xf32> to vector<8xf32>
    %119 = vector.shape_cast %118 : vector<8xf32> to vector<8x1xf32>
    %120 = vector.broadcast %119 : vector<8x1xf32> to vector<8x8xf32>
    %121 = arith.subf %117, %120 : vector<8x8xf32>
    %122 = math.exp %121 : vector<8x8xf32>
    %cst_42 = arith.constant dense<0.000000e+00> : vector<8xf32>
    %123 = vector.multi_reduction <add>, %122, %cst_42 [1] : vector<8x8xf32> to vector<8xf32>
    %124 = vector.shape_cast %123 : vector<8xf32> to vector<8x1xf32>
    %cst_43 = arith.constant dense<0.000000e+00> : vector<8x4xf32>
    %125 = tpu.matmul %122, %115, %cst_43 {dimension_numbers = #tpu.dot_dimension_numbers<[1], [0], [0], [1], [0, 0, 1, 1], [], []>} : vector<8x8xf32>, vector<8x4xf32>, vector<8x4xf32> -> vector<8x4xf32>
    %126 = vector.broadcast %124 : vector<8x1xf32> to vector<8x4xf32>
    %127 = arith.divf %125, %126 : vector<8x4xf32>
    %c0_44 = arith.constant 0 : index
    %c24 = arith.constant 24 : index
    %128 = vector.load %arg12[%c0_44, %c24] : memref<16x32xf32, #tpu.memory_space<vmem>>, vector<8x4xf32>
    tpu.vector_store %arg12[%c0_44, %c24], %127 {strides = array<i32>} : memref<16x32xf32, #tpu.memory_space<vmem>>, vector<8x4xf32>,
    %129 = vector.extract_strided_slice %14 {offsets = [0, 28], sizes = [8, 4], strides = [1, 1]} : vector<16x32xf32> to vector<8x4xf32>
    %130 = vector.extract_strided_slice %15 {offsets = [0, 28], sizes = [8, 4], strides = [1, 1]} : vector<16x32xf32> to vector<8x4xf32>
    %131 = vector.extract_strided_slice %16 {offsets = [0, 28], sizes = [8, 4], strides = [1, 1]} : vector<16x32xf32> to vector<8x4xf32>
    %132 = tpu.transpose %130, [1, 0] : vector<8x4xf32> -> vector<4x8xf32>
    %cst_45 = arith.constant dense<0.000000e+00> : vector<8x8xf32>
    %133 = tpu.matmul %129, %132, %cst_45 {dimension_numbers = #tpu.dot_dimension_numbers<[1], [0], [0], [1], [0, 0, 1, 1], [], []>} : vector<8x4xf32>, vector<4x8xf32>, vector<8x8xf32> -> vector<8x8xf32>
    %cst_46 = arith.constant dense<0xFF800000> : vector<8xf32>
    %134 = vector.multi_reduction <maximumf>, %133, %cst_46 [1] : vector<8x8xf32> to vector<8xf32>
    %135 = vector.shape_cast %134 : vector<8xf32> to vector<8x1xf32>
    %136 = vector.broadcast %135 : vector<8x1xf32> to vector<8x8xf32>
    %137 = arith.subf %133, %136 : vector<8x8xf32>
    %138 = math.exp %137 : vector<8x8xf32>
    %cst_47 = arith.constant dense<0.000000e+00> : vector<8xf32>
    %139 = vector.multi_reduction <add>, %138, %cst_47 [1] : vector<8x8xf32> to vector<8xf32>
    %140 = vector.shape_cast %139 : vector<8xf32> to vector<8x1xf32>
    %cst_48 = arith.constant dense<0.000000e+00> : vector<8x4xf32>
    %141 = tpu.matmul %138, %131, %cst_48 {dimension_numbers = #tpu.dot_dimension_numbers<[1], [0], [0], [1], [0, 0, 1, 1], [], []>} : vector<8x8xf32>, vector<8x4xf32>, vector<8x4xf32> -> vector<8x4xf32>
    %142 = vector.broadcast %140 : vector<8x1xf32> to vector<8x4xf32>
    %143 = arith.divf %141, %142 : vector<8x4xf32>
    %c0_49 = arith.constant 0 : index
    %c28 = arith.constant 28 : index
    %144 = vector.load %arg12[%c0_49, %c28] : memref<16x32xf32, #tpu.memory_space<vmem>>, vector<8x4xf32>
    tpu.vector_store %arg12[%c0_49, %c28], %143 {strides = array<i32>} : memref<16x32xf32, #tpu.memory_space<vmem>>, vector<8x4xf32>,
    %145 = vector.extract_strided_slice %14 {offsets = [8, 0], sizes = [8, 4], strides = [1, 1]} : vector<16x32xf32> to vector<8x4xf32>
    %146 = vector.extract_strided_slice %15 {offsets = [8, 0], sizes = [8, 4], strides = [1, 1]} : vector<16x32xf32> to vector<8x4xf32>
    %147 = vector.extract_strided_slice %16 {offsets = [8, 0], sizes = [8, 4], strides = [1, 1]} : vector<16x32xf32> to vector<8x4xf32>
    %148 = tpu.transpose %146, [1, 0] : vector<8x4xf32> -> vector<4x8xf32>
    %cst_50 = arith.constant dense<0.000000e+00> : vector<8x8xf32>
    %149 = tpu.matmul %145, %148, %cst_50 {dimension_numbers = #tpu.dot_dimension_numbers<[1], [0], [0], [1], [0, 0, 1, 1], [], []>} : vector<8x4xf32>, vector<4x8xf32>, vector<8x8xf32> -> vector<8x8xf32>
    %cst_51 = arith.constant dense<0xFF800000> : vector<8xf32>
    %150 = vector.multi_reduction <maximumf>, %149, %cst_51 [1] : vector<8x8xf32> to vector<8xf32>
    %151 = vector.shape_cast %150 : vector<8xf32> to vector<8x1xf32>
    %152 = vector.broadcast %151 : vector<8x1xf32> to vector<8x8xf32>
    %153 = arith.subf %149, %152 : vector<8x8xf32>
    %154 = math.exp %153 : vector<8x8xf32>
    %cst_52 = arith.constant dense<0.000000e+00> : vector<8xf32>
    %155 = vector.multi_reduction <add>, %154, %cst_52 [1] : vector<8x8xf32> to vector<8xf32>
    %156 = vector.shape_cast %155 : vector<8xf32> to vector<8x1xf32>
    %cst_53 = arith.constant dense<0.000000e+00> : vector<8x4xf32>
    %157 = tpu.matmul %154, %147, %cst_53 {dimension_numbers = #tpu.dot_dimension_numbers<[1], [0], [0], [1], [0, 0, 1, 1], [], []>} : vector<8x8xf32>, vector<8x4xf32>, vector<8x4xf32> -> vector<8x4xf32>
    %158 = vector.broadcast %156 : vector<8x1xf32> to vector<8x4xf32>
    %159 = arith.divf %157, %158 : vector<8x4xf32>
    %c8_54 = arith.constant 8 : index
    %c0_55 = arith.constant 0 : index
    %160 = vector.load %arg12[%c8_54, %c0_55] : memref<16x32xf32, #tpu.memory_space<vmem>>, vector<8x4xf32>
    tpu.vector_store %arg12[%c8_54, %c0_55], %159 {strides = array<i32>} : memref<16x32xf32, #tpu.memory_space<vmem>>, vector<8x4xf32>,
    %161 = vector.extract_strided_slice %14 {offsets = [8, 4], sizes = [8, 4], strides = [1, 1]} : vector<16x32xf32> to vector<8x4xf32>
    %162 = vector.extract_strided_slice %15 {offsets = [8, 4], sizes = [8, 4], strides = [1, 1]} : vector<16x32xf32> to vector<8x4xf32>
    %163 = vector.extract_strided_slice %16 {offsets = [8, 4], sizes = [8, 4], strides = [1, 1]} : vector<16x32xf32> to vector<8x4xf32>
    %164 = tpu.transpose %162, [1, 0] : vector<8x4xf32> -> vector<4x8xf32>
    %cst_56 = arith.constant dense<0.000000e+00> : vector<8x8xf32>
    %165 = tpu.matmul %161, %164, %cst_56 {dimension_numbers = #tpu.dot_dimension_numbers<[1], [0], [0], [1], [0, 0, 1, 1], [], []>} : vector<8x4xf32>, vector<4x8xf32>, vector<8x8xf32> -> vector<8x8xf32>
    %cst_57 = arith.constant dense<0xFF800000> : vector<8xf32>
    %166 = vector.multi_reduction <maximumf>, %165, %cst_57 [1] : vector<8x8xf32> to vector<8xf32>
    %167 = vector.shape_cast %166 : vector<8xf32> to vector<8x1xf32>
    %168 = vector.broadcast %167 : vector<8x1xf32> to vector<8x8xf32>
    %169 = arith.subf %165, %168 : vector<8x8xf32>
    %170 = math.exp %169 : vector<8x8xf32>
    %cst_58 = arith.constant dense<0.000000e+00> : vector<8xf32>
    %171 = vector.multi_reduction <add>, %170, %cst_58 [1] : vector<8x8xf32> to vector<8xf32>
    %172 = vector.shape_cast %171 : vector<8xf32> to vector<8x1xf32>
    %cst_59 = arith.constant dense<0.000000e+00> : vector<8x4xf32>
    %173 = tpu.matmul %170, %163, %cst_59 {dimension_numbers = #tpu.dot_dimension_numbers<[1], [0], [0], [1], [0, 0, 1, 1], [], []>} : vector<8x8xf32>, vector<8x4xf32>, vector<8x4xf32> -> vector<8x4xf32>
    %174 = vector.broadcast %172 : vector<8x1xf32> to vector<8x4xf32>
    %175 = arith.divf %173, %174 : vector<8x4xf32>
    %c8_60 = arith.constant 8 : index
    %c4_61 = arith.constant 4 : index
    %176 = vector.load %arg12[%c8_60, %c4_61] : memref<16x32xf32, #tpu.memory_space<vmem>>, vector<8x4xf32>
    tpu.vector_store %arg12[%c8_60, %c4_61], %175 {strides = array<i32>} : memref<16x32xf32, #tpu.memory_space<vmem>>, vector<8x4xf32>,
    %177 = vector.extract_strided_slice %14 {offsets = [8, 8], sizes = [8, 4], strides = [1, 1]} : vector<16x32xf32> to vector<8x4xf32>
    %178 = vector.extract_strided_slice %15 {offsets = [8, 8], sizes = [8, 4], strides = [1, 1]} : vector<16x32xf32> to vector<8x4xf32>
    %179 = vector.extract_strided_slice %16 {offsets = [8, 8], sizes = [8, 4], strides = [1, 1]} : vector<16x32xf32> to vector<8x4xf32>
    %180 = tpu.transpose %178, [1, 0] : vector<8x4xf32> -> vector<4x8xf32>
    %cst_62 = arith.constant dense<0.000000e+00> : vector<8x8xf32>
    %181 = tpu.matmul %177, %180, %cst_62 {dimension_numbers = #tpu.dot_dimension_numbers<[1], [0], [0], [1], [0, 0, 1, 1], [], []>} : vector<8x4xf32>, vector<4x8xf32>, vector<8x8xf32> -> vector<8x8xf32>
    %cst_63 = arith.constant dense<0xFF800000> : vector<8xf32>
    %182 = vector.multi_reduction <maximumf>, %181, %cst_63 [1] : vector<8x8xf32> to vector<8xf32>
    %183 = vector.shape_cast %182 : vector<8xf32> to vector<8x1xf32>
    %184 = vector.broadcast %183 : vector<8x1xf32> to vector<8x8xf32>
    %185 = arith.subf %181, %184 : vector<8x8xf32>
    %186 = math.exp %185 : vector<8x8xf32>
    %cst_64 = arith.constant dense<0.000000e+00> : vector<8xf32>
    %187 = vector.multi_reduction <add>, %186, %cst_64 [1] : vector<8x8xf32> to vector<8xf32>
    %188 = vector.shape_cast %187 : vector<8xf32> to vector<8x1xf32>
    %cst_65 = arith.constant dense<0.000000e+00> : vector<8x4xf32>
    %189 = tpu.matmul %186, %179, %cst_65 {dimension_numbers = #tpu.dot_dimension_numbers<[1], [0], [0], [1], [0, 0, 1, 1], [], []>} : vector<8x8xf32>, vector<8x4xf32>, vector<8x4xf32> -> vector<8x4xf32>
    %190 = vector.broadcast %188 : vector<8x1xf32> to vector<8x4xf32>
    %191 = arith.divf %189, %190 : vector<8x4xf32>
    %c8_66 = arith.constant 8 : index
    %c8_67 = arith.constant 8 : index
    %192 = vector.load %arg12[%c8_66, %c8_67] : memref<16x32xf32, #tpu.memory_space<vmem>>, vector<8x4xf32>
    tpu.vector_store %arg12[%c8_66, %c8_67], %191 {strides = array<i32>} : memref<16x32xf32, #tpu.memory_space<vmem>>, vector<8x4xf32>,
    %193 = vector.extract_strided_slice %14 {offsets = [8, 12], sizes = [8, 4], strides = [1, 1]} : vector<16x32xf32> to vector<8x4xf32>
    %194 = vector.extract_strided_slice %15 {offsets = [8, 12], sizes = [8, 4], strides = [1, 1]} : vector<16x32xf32> to vector<8x4xf32>
    %195 = vector.extract_strided_slice %16 {offsets = [8, 12], sizes = [8, 4], strides = [1, 1]} : vector<16x32xf32> to vector<8x4xf32>
    %196 = tpu.transpose %194, [1, 0] : vector<8x4xf32> -> vector<4x8xf32>
    %cst_68 = arith.constant dense<0.000000e+00> : vector<8x8xf32>
    %197 = tpu.matmul %193, %196, %cst_68 {dimension_numbers = #tpu.dot_dimension_numbers<[1], [0], [0], [1], [0, 0, 1, 1], [], []>} : vector<8x4xf32>, vector<4x8xf32>, vector<8x8xf32> -> vector<8x8xf32>
    %cst_69 = arith.constant dense<0xFF800000> : vector<8xf32>
    %198 = vector.multi_reduction <maximumf>, %197, %cst_69 [1] : vector<8x8xf32> to vector<8xf32>
    %199 = vector.shape_cast %198 : vector<8xf32> to vector<8x1xf32>
    %200 = vector.broadcast %199 : vector<8x1xf32> to vector<8x8xf32>
    %201 = arith.subf %197, %200 : vector<8x8xf32>
    %202 = math.exp %201 : vector<8x8xf32>
    %cst_70 = arith.constant dense<0.000000e+00> : vector<8xf32>
    %203 = vector.multi_reduction <add>, %202, %cst_70 [1] : vector<8x8xf32> to vector<8xf32>
    %204 = vector.shape_cast %203 : vector<8xf32> to vector<8x1xf32>
    %cst_71 = arith.constant dense<0.000000e+00> : vector<8x4xf32>
    %205 = tpu.matmul %202, %195, %cst_71 {dimension_numbers = #tpu.dot_dimension_numbers<[1], [0], [0], [1], [0, 0, 1, 1], [], []>} : vector<8x8xf32>, vector<8x4xf32>, vector<8x4xf32> -> vector<8x4xf32>
    %206 = vector.broadcast %204 : vector<8x1xf32> to vector<8x4xf32>
    %207 = arith.divf %205, %206 : vector<8x4xf32>
    %c8_72 = arith.constant 8 : index
    %c12_73 = arith.constant 12 : index
    %208 = vector.load %arg12[%c8_72, %c12_73] : memref<16x32xf32, #tpu.memory_space<vmem>>, vector<8x4xf32>
    tpu.vector_store %arg12[%c8_72, %c12_73], %207 {strides = array<i32>} : memref<16x32xf32, #tpu.memory_space<vmem>>, vector<8x4xf32>,
    %209 = vector.extract_strided_slice %14 {offsets = [8, 16], sizes = [8, 4], strides = [1, 1]} : vector<16x32xf32> to vector<8x4xf32>
    %210 = vector.extract_strided_slice %15 {offsets = [8, 16], sizes = [8, 4], strides = [1, 1]} : vector<16x32xf32> to vector<8x4xf32>
    %211 = vector.extract_strided_slice %16 {offsets = [8, 16], sizes = [8, 4], strides = [1, 1]} : vector<16x32xf32> to vector<8x4xf32>
    %212 = tpu.transpose %210, [1, 0] : vector<8x4xf32> -> vector<4x8xf32>
    %cst_74 = arith.constant dense<0.000000e+00> : vector<8x8xf32>
    %213 = tpu.matmul %209, %212, %cst_74 {dimension_numbers = #tpu.dot_dimension_numbers<[1], [0], [0], [1], [0, 0, 1, 1], [], []>} : vector<8x4xf32>, vector<4x8xf32>, vector<8x8xf32> -> vector<8x8xf32>
    %cst_75 = arith.constant dense<0xFF800000> : vector<8xf32>
    %214 = vector.multi_reduction <maximumf>, %213, %cst_75 [1] : vector<8x8xf32> to vector<8xf32>
    %215 = vector.shape_cast %214 : vector<8xf32> to vector<8x1xf32>
    %216 = vector.broadcast %215 : vector<8x1xf32> to vector<8x8xf32>
    %217 = arith.subf %213, %216 : vector<8x8xf32>
    %218 = math.exp %217 : vector<8x8xf32>
    %cst_76 = arith.constant dense<0.000000e+00> : vector<8xf32>
    %219 = vector.multi_reduction <add>, %218, %cst_76 [1] : vector<8x8xf32> to vector<8xf32>
    %220 = vector.shape_cast %219 : vector<8xf32> to vector<8x1xf32>
    %cst_77 = arith.constant dense<0.000000e+00> : vector<8x4xf32>
    %221 = tpu.matmul %218, %211, %cst_77 {dimension_numbers = #tpu.dot_dimension_numbers<[1], [0], [0], [1], [0, 0, 1, 1], [], []>} : vector<8x8xf32>, vector<8x4xf32>, vector<8x4xf32> -> vector<8x4xf32>
    %222 = vector.broadcast %220 : vector<8x1xf32> to vector<8x4xf32>
    %223 = arith.divf %221, %222 : vector<8x4xf32>
    %c8_78 = arith.constant 8 : index
    %c16_79 = arith.constant 16 : index
    %224 = vector.load %arg12[%c8_78, %c16_79] : memref<16x32xf32, #tpu.memory_space<vmem>>, vector<8x4xf32>
    tpu.vector_store %arg12[%c8_78, %c16_79], %223 {strides = array<i32>} : memref<16x32xf32, #tpu.memory_space<vmem>>, vector<8x4xf32>,
    %225 = vector.extract_strided_slice %14 {offsets = [8, 20], sizes = [8, 4], strides = [1, 1]} : vector<16x32xf32> to vector<8x4xf32>
    %226 = vector.extract_strided_slice %15 {offsets = [8, 20], sizes = [8, 4], strides = [1, 1]} : vector<16x32xf32> to vector<8x4xf32>
    %227 = vector.extract_strided_slice %16 {offsets = [8, 20], sizes = [8, 4], strides = [1, 1]} : vector<16x32xf32> to vector<8x4xf32>
    %228 = tpu.transpose %226, [1, 0] : vector<8x4xf32> -> vector<4x8xf32>
    %cst_80 = arith.constant dense<0.000000e+00> : vector<8x8xf32>
    %229 = tpu.matmul %225, %228, %cst_80 {dimension_numbers = #tpu.dot_dimension_numbers<[1], [0], [0], [1], [0, 0, 1, 1], [], []>} : vector<8x4xf32>, vector<4x8xf32>, vector<8x8xf32> -> vector<8x8xf32>
    %cst_81 = arith.constant dense<0xFF800000> : vector<8xf32>
    %230 = vector.multi_reduction <maximumf>, %229, %cst_81 [1] : vector<8x8xf32> to vector<8xf32>
    %231 = vector.shape_cast %230 : vector<8xf32> to vector<8x1xf32>
    %232 = vector.broadcast %231 : vector<8x1xf32> to vector<8x8xf32>
    %233 = arith.subf %229, %232 : vector<8x8xf32>
    %234 = math.exp %233 : vector<8x8xf32>
    %cst_82 = arith.constant dense<0.000000e+00> : vector<8xf32>
    %235 = vector.multi_reduction <add>, %234, %cst_82 [1] : vector<8x8xf32> to vector<8xf32>
    %236 = vector.shape_cast %235 : vector<8xf32> to vector<8x1xf32>
    %cst_83 = arith.constant dense<0.000000e+00> : vector<8x4xf32>
    %237 = tpu.matmul %234, %227, %cst_83 {dimension_numbers = #tpu.dot_dimension_numbers<[1], [0], [0], [1], [0, 0, 1, 1], [], []>} : vector<8x8xf32>, vector<8x4xf32>, vector<8x4xf32> -> vector<8x4xf32>
    %238 = vector.broadcast %236 : vector<8x1xf32> to vector<8x4xf32>
    %239 = arith.divf %237, %238 : vector<8x4xf32>
    %c8_84 = arith.constant 8 : index
    %c20_85 = arith.constant 20 : index
    %240 = vector.load %arg12[%c8_84, %c20_85] : memref<16x32xf32, #tpu.memory_space<vmem>>, vector<8x4xf32>
    tpu.vector_store %arg12[%c8_84, %c20_85], %239 {strides = array<i32>} : memref<16x32xf32, #tpu.memory_space<vmem>>, vector<8x4xf32>,
    %241 = vector.extract_strided_slice %14 {offsets = [8, 24], sizes = [8, 4], strides = [1, 1]} : vector<16x32xf32> to vector<8x4xf32>
    %242 = vector.extract_strided_slice %15 {offsets = [8, 24], sizes = [8, 4], strides = [1, 1]} : vector<16x32xf32> to vector<8x4xf32>
    %243 = vector.extract_strided_slice %16 {offsets = [8, 24], sizes = [8, 4], strides = [1, 1]} : vector<16x32xf32> to vector<8x4xf32>
    %244 = tpu.transpose %242, [1, 0] : vector<8x4xf32> -> vector<4x8xf32>
    %cst_86 = arith.constant dense<0.000000e+00> : vector<8x8xf32>
    %245 = tpu.matmul %241, %244, %cst_86 {dimension_numbers = #tpu.dot_dimension_numbers<[1], [0], [0], [1], [0, 0, 1, 1], [], []>} : vector<8x4xf32>, vector<4x8xf32>, vector<8x8xf32> -> vector<8x8xf32>
    %cst_87 = arith.constant dense<0xFF800000> : vector<8xf32>
    %246 = vector.multi_reduction <maximumf>, %245, %cst_87 [1] : vector<8x8xf32> to vector<8xf32>
    %247 = vector.shape_cast %246 : vector<8xf32> to vector<8x1xf32>
    %248 = vector.broadcast %247 : vector<8x1xf32> to vector<8x8xf32>
    %249 = arith.subf %245, %248 : vector<8x8xf32>
    %250 = math.exp %249 : vector<8x8xf32>
    %cst_88 = arith.constant dense<0.000000e+00> : vector<8xf32>
    %251 = vector.multi_reduction <add>, %250, %cst_88 [1] : vector<8x8xf32> to vector<8xf32>
    %252 = vector.shape_cast %251 : vector<8xf32> to vector<8x1xf32>
    %cst_89 = arith.constant dense<0.000000e+00> : vector<8x4xf32>
    %253 = tpu.matmul %250, %243, %cst_89 {dimension_numbers = #tpu.dot_dimension_numbers<[1], [0], [0], [1], [0, 0, 1, 1], [], []>} : vector<8x8xf32>, vector<8x4xf32>, vector<8x4xf32> -> vector<8x4xf32>
    %254 = vector.broadcast %252 : vector<8x1xf32> to vector<8x4xf32>
    %255 = arith.divf %253, %254 : vector<8x4xf32>
    %c8_90 = arith.constant 8 : index
    %c24_91 = arith.constant 24 : index
    %256 = vector.load %arg12[%c8_90, %c24_91] : memref<16x32xf32, #tpu.memory_space<vmem>>, vector<8x4xf32>
    tpu.vector_store %arg12[%c8_90, %c24_91], %255 {strides = array<i32>} : memref<16x32xf32, #tpu.memory_space<vmem>>, vector<8x4xf32>,
    %257 = vector.extract_strided_slice %14 {offsets = [8, 28], sizes = [8, 4], strides = [1, 1]} : vector<16x32xf32> to vector<8x4xf32>
    %258 = vector.extract_strided_slice %15 {offsets = [8, 28], sizes = [8, 4], strides = [1, 1]} : vector<16x32xf32> to vector<8x4xf32>
    %259 = vector.extract_strided_slice %16 {offsets = [8, 28], sizes = [8, 4], strides = [1, 1]} : vector<16x32xf32> to vector<8x4xf32>
    %260 = tpu.transpose %258, [1, 0] : vector<8x4xf32> -> vector<4x8xf32>
    %cst_92 = arith.constant dense<0.000000e+00> : vector<8x8xf32>
    %261 = tpu.matmul %257, %260, %cst_92 {dimension_numbers = #tpu.dot_dimension_numbers<[1], [0], [0], [1], [0, 0, 1, 1], [], []>} : vector<8x4xf32>, vector<4x8xf32>, vector<8x8xf32> -> vector<8x8xf32>
    %cst_93 = arith.constant dense<0xFF800000> : vector<8xf32>
    %262 = vector.multi_reduction <maximumf>, %261, %cst_93 [1] : vector<8x8xf32> to vector<8xf32>
    %263 = vector.shape_cast %262 : vector<8xf32> to vector<8x1xf32>
    %264 = vector.broadcast %263 : vector<8x1xf32> to vector<8x8xf32>
    %265 = arith.subf %261, %264 : vector<8x8xf32>
    %266 = math.exp %265 : vector<8x8xf32>
    %cst_94 = arith.constant dense<0.000000e+00> : vector<8xf32>
    %267 = vector.multi_reduction <add>, %266, %cst_94 [1] : vector<8x8xf32> to vector<8xf32>
    %268 = vector.shape_cast %267 : vector<8xf32> to vector<8x1xf32>
    %cst_95 = arith.constant dense<0.000000e+00> : vector<8x4xf32>
    %269 = tpu.matmul %266, %259, %cst_95 {dimension_numbers = #tpu.dot_dimension_numbers<[1], [0], [0], [1], [0, 0, 1, 1], [], []>} : vector<8x8xf32>, vector<8x4xf32>, vector<8x4xf32> -> vector<8x4xf32>
    %270 = vector.broadcast %268 : vector<8x1xf32> to vector<8x4xf32>
    %271 = arith.divf %269, %270 : vector<8x4xf32>
    %c8_96 = arith.constant 8 : index
    %c28_97 = arith.constant 28 : index
    %272 = vector.load %arg12[%c8_96, %c28_97] : memref<16x32xf32, #tpu.memory_space<vmem>>, vector<8x4xf32>
    tpu.vector_store %arg12[%c8_96, %c28_97], %271 {strides = array<i32>} : memref<16x32xf32, #tpu.memory_space<vmem>>, vector<8x4xf32>,
    %c0_98 = arith.constant 0 : index
    %c0_99 = arith.constant 0 : index
    %273 = vector.load %arg12[%c0_98, %c0_99] : memref<16x32xf32, #tpu.memory_space<vmem>>, vector<16x32xf32>
    %274 = arith.truncf %273 : vector<16x32xf32> to vector<16x32xbf16>
    %c0_100 = arith.constant 0 : index
    %c0_101 = arith.constant 0 : index
    %c0_102 = arith.constant 0 : index
    %275 = vector.load %arg6[%c0_100, %c0_101, %c0_102] : memref<1x32x32xbf16, #tpu.memory_space<vmem>>, vector<1x32x32xbf16>
    %276 = vector.shape_cast %275 : vector<1x32x32xbf16> to vector<32x32xbf16>
    %cst_103 = arith.constant dense<0.000000e+00> : vector<16x32xf32>
    %277 = tpu.matmul %274, %276, %cst_103 {dimension_numbers = #tpu.dot_dimension_numbers<[1], [0], [0], [1], [0, 0, 1, 1], [], []>} : vector<16x32xbf16>, vector<32x32xbf16>, vector<16x32xf32> -> vector<16x32xf32>
    %c0_104 = arith.constant 0 : index
    %c0_105 = arith.constant 0 : index
    %c128 = arith.constant 128 : index
    %278 = vector.load %arg9[%c0_104, %c0_105, %c128] : memref<1x1x2944xf32, #tpu.memory_space<vmem>>, vector<1x1x32xf32>
    %279 = vector.shape_cast %278 : vector<1x1x32xf32> to vector<1x32xf32>
    %280 = vector.broadcast %279 : vector<1x32xf32> to vector<16x32xf32>
    %281 = arith.addf %277, %280 : vector<16x32xf32>
    %282 = arith.addf %3, %281 : vector<16x32xf32>
    %cst_106 = arith.constant dense<0.000000e+00> : vector<16xf32>
    %283 = vector.multi_reduction <add>, %282, %cst_106 [1] : vector<16x32xf32> to vector<16xf32>
    %284 = vector.shape_cast %283 : vector<16xf32> to vector<16x1xf32>
    %cst_107 = arith.constant 3.200000e+01 : f32
    %285 = vector.broadcast %cst_107 : f32 to vector<16x1xf32>
    %286 = arith.divf %284, %285 : vector<16x1xf32>
    %287 = vector.broadcast %286 : vector<16x1xf32> to vector<16x32xf32>
    %288 = arith.subf %282, %287 : vector<16x32xf32>
    %289 = arith.mulf %288, %288 : vector<16x32xf32>
    %cst_108 = arith.constant dense<0.000000e+00> : vector<16xf32>
    %290 = vector.multi_reduction <add>, %289, %cst_108 [1] : vector<16x32xf32> to vector<16xf32>
    %291 = vector.shape_cast %290 : vector<16xf32> to vector<16x1xf32>
    %cst_109 = arith.constant 3.200000e+01 : f32
    %292 = vector.broadcast %cst_109 : f32 to vector<16x1xf32>
    %293 = arith.divf %291, %292 : vector<16x1xf32>
    %294 = vector.broadcast %286 : vector<16x1xf32> to vector<16x32xf32>
    %295 = arith.subf %282, %294 : vector<16x32xf32>
    %cst_110 = arith.constant 9.99999974E-6 : f32
    %296 = vector.broadcast %cst_110 : f32 to vector<16x1xf32>
    %297 = arith.addf %293, %296 : vector<16x1xf32>
    %298 = math.rsqrt %297 : vector<16x1xf32>
    %299 = vector.broadcast %298 : vector<16x1xf32> to vector<16x32xf32>
    %300 = arith.mulf %295, %299 : vector<16x32xf32>
    %c0_111 = arith.constant 0 : index
    %c0_112 = arith.constant 0 : index
    %c256 = arith.constant 256 : index
    %301 = vector.load %arg9[%c0_111, %c0_112, %c256] : memref<1x1x2944xf32, #tpu.memory_space<vmem>>, vector<1x1x32xf32>
    %302 = vector.shape_cast %301 : vector<1x1x32xf32> to vector<1x32xf32>
    %303 = vector.broadcast %302 : vector<1x32xf32> to vector<16x32xf32>
    %304 = arith.mulf %300, %303 : vector<16x32xf32>
    %c0_113 = arith.constant 0 : index
    %c0_114 = arith.constant 0 : index
    %c384 = arith.constant 384 : index
    %305 = vector.load %arg9[%c0_113, %c0_114, %c384] : memref<1x1x2944xf32, #tpu.memory_space<vmem>>, vector<1x1x32xf32>
    %306 = vector.shape_cast %305 : vector<1x1x32xf32> to vector<1x32xf32>
    %307 = vector.broadcast %306 : vector<1x32xf32> to vector<16x32xf32>
    %308 = arith.addf %304, %307 : vector<16x32xf32>
    %309 = arith.truncf %308 : vector<16x32xf32> to vector<16x32xbf16>
    %c0_115 = arith.constant 0 : index
    %c0_116 = arith.constant 0 : index
    %c0_117 = arith.constant 0 : index
    %310 = vector.load %arg7[%c0_115, %c0_116, %c0_117] : memref<1x32x2048xbf16, #tpu.memory_space<vmem>>, vector<1x32x2048xbf16>
    %311 = vector.shape_cast %310 : vector<1x32x2048xbf16> to vector<32x2048xbf16>
    %cst_118 = arith.constant dense<0.000000e+00> : vector<16x2048xf32>
    %312 = tpu.matmul %309, %311, %cst_118 {dimension_numbers = #tpu.dot_dimension_numbers<[1], [0], [0], [1], [0, 0, 1, 1], [], []>} : vector<16x32xbf16>, vector<32x2048xbf16>, vector<16x2048xf32> -> vector<16x2048xf32>
    %c0_119 = arith.constant 0 : index
    %c0_120 = arith.constant 0 : index
    %c512 = arith.constant 512 : index
    %313 = vector.load %arg9[%c0_119, %c0_120, %c512] : memref<1x1x2944xf32, #tpu.memory_space<vmem>>, vector<1x1x2048xf32>
    %314 = vector.shape_cast %313 : vector<1x1x2048xf32> to vector<1x2048xf32>
    %315 = vector.broadcast %314 : vector<1x2048xf32> to vector<16x2048xf32>
    %316 = arith.addf %312, %315 : vector<16x2048xf32>
    %cst_121 = arith.constant 0.000000e+00 : f32
    %317 = vector.broadcast %cst_121 : f32 to vector<16x2048xf32>
    %318 = arith.maximumf %316, %317 : vector<16x2048xf32>
    %319 = arith.truncf %318 : vector<16x2048xf32> to vector<16x2048xbf16>
    %c0_122 = arith.constant 0 : index
    %c0_123 = arith.constant 0 : index
    %c0_124 = arith.constant 0 : index
    %320 = vector.load %arg8[%c0_122, %c0_123, %c0_124] : memref<1x2048x32xbf16, #tpu.memory_space<vmem>>, vector<1x2048x32xbf16>
    %321 = vector.shape_cast %320 : vector<1x2048x32xbf16> to vector<2048x32xbf16>
    %cst_125 = arith.constant dense<0.000000e+00> : vector<16x32xf32>
    %322 = tpu.matmul %319, %321, %cst_125 {dimension_numbers = #tpu.dot_dimension_numbers<[1], [0], [0], [1], [0, 0, 1, 1], [], []>} : vector<16x2048xbf16>, vector<2048x32xbf16>, vector<16x32xf32> -> vector<16x32xf32>
    %c0_126 = arith.constant 0 : index
    %c0_127 = arith.constant 0 : index
    %c2560 = arith.constant 2560 : index
    %323 = vector.load %arg9[%c0_126, %c0_127, %c2560] : memref<1x1x2944xf32, #tpu.memory_space<vmem>>, vector<1x1x32xf32>
    %324 = vector.shape_cast %323 : vector<1x1x32xf32> to vector<1x32xf32>
    %325 = vector.broadcast %324 : vector<1x32xf32> to vector<16x32xf32>
    %326 = arith.addf %322, %325 : vector<16x32xf32>
    %327 = arith.addf %308, %326 : vector<16x32xf32>
    %cst_128 = arith.constant dense<0.000000e+00> : vector<16xf32>
    %328 = vector.multi_reduction <add>, %327, %cst_128 [1] : vector<16x32xf32> to vector<16xf32>
    %329 = vector.shape_cast %328 : vector<16xf32> to vector<16x1xf32>
    %cst_129 = arith.constant 3.200000e+01 : f32
    %330 = vector.broadcast %cst_129 : f32 to vector<16x1xf32>
    %331 = arith.divf %329, %330 : vector<16x1xf32>
    %332 = vector.broadcast %331 : vector<16x1xf32> to vector<16x32xf32>
    %333 = arith.subf %327, %332 : vector<16x32xf32>
    %334 = arith.mulf %333, %333 : vector<16x32xf32>
    %cst_130 = arith.constant dense<0.000000e+00> : vector<16xf32>
    %335 = vector.multi_reduction <add>, %334, %cst_130 [1] : vector<16x32xf32> to vector<16xf32>
    %336 = vector.shape_cast %335 : vector<16xf32> to vector<16x1xf32>
    %cst_131 = arith.constant 3.200000e+01 : f32
    %337 = vector.broadcast %cst_131 : f32 to vector<16x1xf32>
    %338 = arith.divf %336, %337 : vector<16x1xf32>
    %339 = vector.broadcast %331 : vector<16x1xf32> to vector<16x32xf32>
    %340 = arith.subf %327, %339 : vector<16x32xf32>
    %cst_132 = arith.constant 9.99999974E-6 : f32
    %341 = vector.broadcast %cst_132 : f32 to vector<16x1xf32>
    %342 = arith.addf %338, %341 : vector<16x1xf32>
    %343 = math.rsqrt %342 : vector<16x1xf32>
    %344 = vector.broadcast %343 : vector<16x1xf32> to vector<16x32xf32>
    %345 = arith.mulf %340, %344 : vector<16x32xf32>
    %c0_133 = arith.constant 0 : index
    %c0_134 = arith.constant 0 : index
    %c2688 = arith.constant 2688 : index
    %346 = vector.load %arg9[%c0_133, %c0_134, %c2688] : memref<1x1x2944xf32, #tpu.memory_space<vmem>>, vector<1x1x32xf32>
    %347 = vector.shape_cast %346 : vector<1x1x32xf32> to vector<1x32xf32>
    %348 = vector.broadcast %347 : vector<1x32xf32> to vector<16x32xf32>
    %349 = arith.mulf %345, %348 : vector<16x32xf32>
    %c0_135 = arith.constant 0 : index
    %c0_136 = arith.constant 0 : index
    %c2816 = arith.constant 2816 : index
    %350 = vector.load %arg9[%c0_135, %c0_136, %c2816] : memref<1x1x2944xf32, #tpu.memory_space<vmem>>, vector<1x1x32xf32>
    %351 = vector.shape_cast %350 : vector<1x1x32xf32> to vector<1x32xf32>
    %352 = vector.broadcast %351 : vector<1x32xf32> to vector<16x32xf32>
    %353 = arith.addf %349, %352 : vector<16x32xf32>
    %c0_137 = arith.constant 0 : index
    %c0_138 = arith.constant 0 : index
    %354 = vector.load %arg11[%c0_137, %c0_138] : memref<16x32xf32, #tpu.memory_space<vmem>>, vector<16x32xf32>
    tpu.vector_store %arg11[%c0_137, %c0_138], %353 {strides = array<i32>} : memref<16x32xf32, #tpu.memory_space<vmem>>, vector<16x32xf32>,
    %c1_i32 = arith.constant 1 : i32
    %355 = arith.cmpi eq, %arg0, %c1_i32 : i32
    %356 = arith.extui %355 : i1 to i32
    %c0_i32_139 = arith.constant 0 : i32
    %357 = arith.cmpi ne, %356, %c0_i32_139 : i32
    scf.if %357 {
      %c0_140 = arith.constant 0 : index
      %c0_141 = arith.constant 0 : index
      %358 = vector.load %arg10[%c0_140, %c0_141] : memref<16x32xf32, #tpu.memory_space<vmem>>, vector<16x32xf32>
      tpu.vector_store %arg10[%c0_140, %c0_141], %353 {strides = array<i32>} : memref<16x32xf32, #tpu.memory_space<vmem>>, vector<16x32xf32>,
    } else {
    }
    return
  }
  func.func @transform_0(%arg0: i32) -> (i32, i32) {
    %c0_i32 = arith.constant 0 : i32
    %c0_i32_0 = arith.constant 0 : i32
    %c0_i32_1 = arith.constant 0 : i32
    return %c0_i32, %c0_i32_0 : i32, i32
  }
  func.func @transform_1(%arg0: i32) -> (i32, i32) {
    %c0_i32 = arith.constant 0 : i32
    %c0_i32_0 = arith.constant 0 : i32
    %c0_i32_1 = arith.constant 0 : i32
    return %c0_i32, %c0_i32_0 : i32, i32
  }
  func.func @transform_2(%arg0: i32) -> (i32, i32) {
    %c0_i32 = arith.constant 0 : i32
    %c0_i32_0 = arith.constant 0 : i32
    %c0_i32_1 = arith.constant 0 : i32
    return %c0_i32, %c0_i32_0 : i32, i32
  }
  func.func @transform_3(%arg0: i32) -> (i32, i32) {
    %c0_i32 = arith.constant 0 : i32
    %c0_i32_0 = arith.constant 0 : i32
    %c0_i32_1 = arith.constant 0 : i32
    return %c0_i32, %c0_i32_0 : i32, i32
  }
  func.func @transform_4(%arg0: i32) -> (i32, i32, i32) {
    %c0_i32 = arith.constant 0 : i32
    %c0_i32_0 = arith.constant 0 : i32
    %c0_i32_1 = arith.constant 0 : i32
    return %arg0, %c0_i32, %c0_i32_0 : i32, i32, i32
  }
  func.func @transform_5(%arg0: i32) -> (i32, i32, i32) {
    %c0_i32 = arith.constant 0 : i32
    %c0_i32_0 = arith.constant 0 : i32
    %c0_i32_1 = arith.constant 0 : i32
    return %arg0, %c0_i32, %c0_i32_0 : i32, i32, i32
  }
  func.func @transform_6(%arg0: i32) -> (i32, i32, i32) {
    %c0_i32 = arith.constant 0 : i32
    %c0_i32_0 = arith.constant 0 : i32
    %c0_i32_1 = arith.constant 0 : i32
    return %arg0, %c0_i32, %c0_i32_0 : i32, i32, i32
  }
  func.func @transform_7(%arg0: i32) -> (i32, i32, i32) {
    %c0_i32 = arith.constant 0 : i32
    %c0_i32_0 = arith.constant 0 : i32
    %c0_i32_1 = arith.constant 0 : i32
    return %arg0, %c0_i32, %c0_i32_0 : i32, i32, i32
  }
  func.func @transform_8(%arg0: i32) -> (i32, i32, i32) {
    %c0_i32 = arith.constant 0 : i32
    %c0_i32_0 = arith.constant 0 : i32
    %c0_i32_1 = arith.constant 0 : i32
    return %arg0, %c0_i32, %c0_i32_0 : i32, i32, i32
  }
  func.func @transform_9(%arg0: i32) -> (i32, i32) {
    %c0_i32 = arith.constant 0 : i32
    %c0_i32_0 = arith.constant 0 : i32
    %c0_i32_1 = arith.constant 0 : i32
    return %c0_i32, %c0_i32_0 : i32, i32
  }
}

</mosaic_0001>

<bundles_post_ra>
// kernel: tpu_custom_call.1
= control target key start
LH: loop header
LB: loop body
LE: loop exit
PB: predicated region body
PF: predicated region fallthrough
CT: control target
= control target key end

     0   :  { %s8425_s0 = inlined_call_operand.hbm [shape: f32[16,6], index: 0, kind: input, shape index: {}]   ;;  %s8426_s1 = inlined_call_operand.hbm [shape: f32[8,32], index: 1, kind: input, shape index: {}]   ;;  %s8427_s2 = inlined_call_operand.hbm [shape: f32[6,32], index: 2, kind: input, shape index: {}]   ;;  %s8428_s3 = inlined_call_operand.hbm [shape: f32[1,32], index: 3, kind: input, shape index: {}]   ;;  %s8429_s4 = inlined_call_operand.hbm [shape: bf16[2,32,96], index: 4, kind: input, shape index: {}]   ;;  %s8430_s5 = inlined_call_operand.hbm [shape: bf16[2,32,32], index: 5, kind: input, shape index: {}]   ;;  %s8431_s6 = inlined_call_operand.hbm [shape: bf16[2,32,2048], index: 6, kind: input, shape index: {}]   ;;  %s8432_s7 = inlined_call_operand.hbm [shape: bf16[2,2048,32], index: 7, kind: input, shape index: {}]   ;;  %s8433_s8 = inlined_call_operand.hbm [shape: f32[2,1,2944], index: 8, kind: input, shape index: {}]   ;;  %s8434_s9 = inlined_call_operand.hbm [shape: f32[16,32], index: 9, kind: output, shape index: {}]  }
   0x1   :  { %8449 = sst [smem:[#allocation26_spill]] %s8425_s0 }
   0x2   :  { %8450 = sst [smem:[#allocation27_spill]] %s8429_s4 }
   0x3   :  { %8451 = sst [smem:[#allocation28_spill]] %s8430_s5 }
   0x4   :  { %8452 = sst [smem:[#allocation29_spill]] %s8434_s9 }
   0x5   :  { %14 = vsyncpa [#allocation5], 0 }
   0x6   :  { %15 = vsyncpa [#allocation8], 0 }
   0x7   :  { %16 = vsyncpa [#allocation11], 0 }
   0x8   :  { %17 = vsyncpa [#allocation6], 0  ;;  %s7311_s30 = smov 0   ;;  %s7313_s10 = smov 0  }
   0x9   :  { %s7315_s11 = smov 0   ;;  %s7317_s12 = smov 0  }
   0xa LB: > { %8453 = sst [smem:[#allocation23_spill]] %s7206_s11  ;;  %s7330_s13 = sadd.s32 4294967295, %s7210_s12   ;;  %s7210_s12 = sphi %s7317_s12, %s8484_s12   ;;  %s7206_s11 = sphi %s7315_s11, %s8486_s11   ;;  %s7202_s10 = sphi %s7313_s10, %s8488_s10   ;;  %s7198_s30 = sphi %s7311_s30, %s8487_s30  }
   0xb   : > { %s7333_s14 = sadd.s32 1, %s7210_s12   ;;  %s114_s16 = sadd.s32 1, %s7206_s11 }
   0xc   : > { %8454 = sst [smem:[#allocation24_spill]] %s7333_s14  ;;  %s111_s15 = ssub.s32 %s7210_s12, %s7333_s14 }
   0xd   : > { %p112_p0 = scmp.eq.s32.totalorder %s111_s15, 0  ;;  %p121_p1 = scmp.ne.s32.totalorder %s7206_s11, %s7202_s10 }
   0xe   : > { %p122_p2 = scmp.eq.s32.totalorder %s7210_s12, 0  ;;  %p127_p3 = scmp.ne.s32.totalorder %s7202_s10, %s7198_s30 }
   0xf   : > { %s7343_s17 = scalar_select %p112_p0, %s7206_s11, %s114_s16  }
  0x10   : > { %p7345_p4 = por %p122_p2, %p121_p1  ;;  %p8435_p5 = scmp.eq.s32.totalorder %s7330_s13, 0 }
  0x11   : > { %8455 = sst [smem:[#allocation25_spill]] %s7343_s17  ;;  %p5816_p6 = scmp.ge.s32.totalorder %s7210_s12, 1 }
  0x12   : > { %s8456_s18 = scalar_select %p7345_p4, 1, 0 }
  0x13   : > { %p263_p7 = scmp.lt.s32.totalorder %s7210_s12, 3  ;;  %p7354_p8 = por %p8435_p5, %p127_p3 }
  0x14   : > { %s7212_s21 = smov [#allocation4]   ;;  %s322_s24 = sand.u32 1, %s7210_s12  }
  0x15   : > { %s8457_s19 = scalar_select %p7354_p8, 1, 0 }
  0x16   : > { %p7359_p10 = pnand %p5816_p6, %p263_p7  ;;  %s275_s22 = sshll.u32 %s7212_s21, 4  ;;  %s276_s22 = int_to_ptr.vmem [resolvable:$true] %s275_s22 }
  0x17   : > { %s7374_s25 = sand.u32 1, %s7206_s11   ;;  %s8460_s0 = sld [smem:[#allocation26_spill]] }
  0x18   : > { %s8458_s20 = scalar_select %p7359_p10, 1, 0 }
  0x19   : > { %p6550_p11 = pneg %p7359_p10 }
  0x1b   : > { %p7367_p12 = pnand %p6550_p11, %p8435_p5 }
  0x1d   : > { %s8459_s23 = scalar_select %p7367_p12, 1, 0 }
  0x1e   : > { %s6872_s28 = scalar_lea.hbm %s8460_s0, 256  ;;  %p7384_p1 = pneg %p7367_p12 }
  0x1f   : > { %p6873_p0 = scmp.ne.s32.totalorder %s8460_s0, %s6872_s28  ;;  %p6879_p6 = scmp.lt.u32.totalorder %s6872_s28, %s8460_s0 }
  0x20   : > { %s8461_s15 = scalar_select %p7384_p1, 1, 0 }
  0x21   : > { %p6875_p2 = pnand %p7384_p1, %p6873_p0 }
  0x23   : > { %p6876_p3 = pneg %p6875_p2 }
  0x25   : > { %p6881_p7 = pnand %p6879_p6, %p6876_p3 }
  0x27   : > { %6884 = shalt.err (!%p6881_p7)
}
  0x28   : > { %s6885_s26 = scalar_lea.vmem %s276_s22, 256  ;;  %p6893_p13 = scmp.lt.s32.totalorder %s276_s22, %s276_s22 }
  0x29   : > { %p6886_p11 = scmp.ne.s32.totalorder %s276_s22, %s6885_s26  ;;  %p6894_p8 = scmp.lt.s32.totalorder %s6885_s26, %s6885_s26 }
  0x2b   : > { %p6888_p9 = pnand %p6886_p11, %p7384_p1  ;;  %p6895_p10 = por %p6894_p8, %p6893_p13 }
  0x2d   : > { %p6889_p5 = pneg %p6888_p9 }
  0x2f   : > { %p6896_p4 = pnand %p6895_p10, %p6889_p5 }
  0x31   : > { %6899 = shalt.err (!%p6896_p4)
}
  0x32   : > { %s7213_s27 = smov 128   ;;  %s7214_s28 = smov 8  }
  0x33   : > { %6553 = dma.hbm_to_vmem [thread:$0]  (!%p7367_p12), %s8460_s0, 256, %s276_s22, [#allocation5], %s7213_s27, %s7213_s27, %s7214_s28  }
  0x34   : > { %s5822_s16 = sshll.u32 %s7374_s25, 4  ;;  %s6083_s21 = sshll.u32 %s7210_s12, 8 }
  0x35   : > { %s8462_s4 = sld [smem:[#allocation27_spill]]  ;;  %s326_s14 = scalar_lea.vmem [#allocation12], %s5822_s16 }
  0x36   : > { %s333_s9 = sshll.u32 %s326_s14, 4  ;;  %p8463_p4 = scmp.ne.s32.totalorder %s8456_s18, 0  ;;  %s7419_s9 = int_to_ptr.vmem [resolvable:$true] %s333_s9 }
  0x37   : > { %p8464_p5 = scmp.lt.s32.totalorder %s7210_s12, 2  ;;  %s7421_s22 = scalar_lea.sflag [#allocation5], %s322_s24 }
  0x39   : > { %p7415_p8 = pnand %p8464_p5, %p8463_p4 }
  0x3b   : > { %s7407_s11 = scalar_lea.hbm %s8462_s4, %s6083_s21  ;;  %p7427_p10 = pneg %p7415_p8 }
  0x3c   : > { %s8465_s29 = scalar_select %p7415_p8, 1, 0 }
  0x3d   : > { %s6900_s17 = scalar_lea.hbm %s7407_s11, 256  ;;  %s6905_s28 = scalar_lea.hbm %s8462_s4, 512 }
  0x3e   : > { %p6901_p9 = scmp.ne.s32.totalorder %s7407_s11, %s6900_s17  ;;  %p6906_p2 = scmp.lt.u32.totalorder %s7407_s11, %s8462_s4 }
  0x3f   : > { %p6907_p3 = scmp.lt.u32.totalorder %s6905_s28, %s6900_s17  ;;  %p6909_p7 = scmp.lt.u32.totalorder %s6900_s17, %s7407_s11 }
  0x40   : > { %p6903_p13 = pnand %p7427_p10, %p6901_p9 }
  0x41   : > { %p6908_p6 = por %p6907_p3, %p6906_p2 }
  0x42   : > { %p6904_p0 = pneg %p6903_p13 }
  0x43   : > { %p6910_p11 = por %p6909_p7, %p6908_p6 }
  0x45   : > { %p6911_p4 = pnand %p6910_p11, %p6904_p0 }
  0x47   : > { %6914 = shalt.err (!%p6911_p4)
}
  0x48   : > { %s6915_s24 = scalar_lea.vmem %s7419_s9, 256  ;;  %s7215_s14 = smov [#allocation12]  }
  0x49   : > { %p6916_p5 = scmp.ne.s32.totalorder %s7419_s9, %s6915_s24  ;;  %s6920_s18 = sshll.u32 %s7215_s14, 4  ;;  %s6921_s18 = int_to_ptr.vmem [resolvable:$false] %s6920_s18 }
  0x4a   : > { %s6922_s30 = scalar_lea.vmem %s6921_s18, 512  ;;  %p6923_p12 = scmp.lt.s32.totalorder %s7419_s9, %s6921_s18 }
  0x4b   : > { %p6918_p9 = pnand %p6916_p5, %p7427_p10  ;;  %p6924_p1 = scmp.lt.s32.totalorder %s6922_s30, %s6915_s24 }
  0x4d   : > { %p6919_p13 = pneg %p6918_p9  ;;  %p6925_p2 = por %p6924_p1, %p6923_p12 }
  0x4f   : > { %p6926_p3 = pnand %p6925_p2, %p6919_p13 }
  0x51   : > { %6929 = shalt.err (!%p6926_p3)
}
  0x52   : > { %s7216_s17 = smov 64   ;;  %s8446_s28 = smov 4  }
  0x53   : > { %6566 = dma.hbm_to_vmem [thread:$0]  (!%p7415_p8), %s7407_s11, 256, %s7419_s9, %s7421_s22, %s7216_s17, %s7216_s17, %s8446_s28  }
  0x54   : > { %s8467_s5 = sld [smem:[#allocation28_spill]]  ;;  %s347_s18 = scalar_lea.vmem [#allocation13], %s5822_s16 }
  0x55   : > { %s354_s30 = sshll.u32 %s347_s18, 4  ;;  %s5828_s0 = sshll.u32 %s7374_s25, 8  ;;  %s7464_s30 = int_to_ptr.vmem [resolvable:$true] %s354_s30 }
  0x5a   : > { %s7459_s14 = scalar_lea.hbm %s8467_s5, %s6083_s21  ;;  %s6935_s21 = scalar_lea.hbm %s8467_s5, 512 }
  0x5b   : > { %s6930_s4 = scalar_lea.hbm %s7459_s14, 256  ;;  %p6936_p6 = scmp.lt.u32.totalorder %s7459_s14, %s8467_s5 }
  0x5c   : > { %p6931_p12 = scmp.ne.s32.totalorder %s7459_s14, %s6930_s4  ;;  %p6937_p7 = scmp.lt.u32.totalorder %s6935_s21, %s6930_s4 }
  0x5d   : > { %p6939_p4 = scmp.lt.u32.totalorder %s6930_s4, %s7459_s14 }
  0x5e   : > { %p6933_p1 = pnand %p6931_p12, %p7427_p10  ;;  %p6938_p11 = por %p6937_p7, %p6936_p6 }
  0x60   : > { %p6934_p0 = pneg %p6933_p1  ;;  %p6940_p5 = por %p6939_p4, %p6938_p11 }
  0x62   : > { %p6941_p9 = pnand %p6940_p5, %p6934_p0 }
  0x64   : > { %6944 = shalt.err (!%p6941_p9)
}
  0x65   : > { %s6945_s16 = scalar_lea.vmem %s7464_s30, 256  ;;  %s7218_s18 = smov [#allocation13]  }
  0x66   : > { %p6946_p13 = scmp.ne.s32.totalorder %s7464_s30, %s6945_s16  ;;  %s6950_s9 = sshll.u32 %s7218_s18, 4  ;;  %s6951_s9 = int_to_ptr.vmem [resolvable:$false] %s6950_s9 }
  0x67   : > { %s6952_s11 = scalar_lea.vmem %s6951_s9, 512  ;;  %p6953_p12 = scmp.lt.s32.totalorder %s7464_s30, %s6951_s9 }
  0x68   : > { %p6948_p2 = pnand %p6946_p13, %p7427_p10  ;;  %p6954_p1 = scmp.lt.s32.totalorder %s6952_s11, %s6945_s16 }
  0x6a   : > { %p6949_p3 = pneg %p6948_p2  ;;  %p6955_p6 = por %p6954_p1, %p6953_p12 }
  0x6c   : > { %p6956_p7 = pnand %p6955_p6, %p6949_p3 }
  0x6e   : > { %6959 = shalt.err (!%p6956_p7)
}
  0x6f   : > { %6569 = dma.hbm_to_vmem [thread:$0]  (!%p7415_p8), %s7459_s14, 256, %s7464_s30, %s7421_s22, %s7216_s17, %s7216_s17, %s8446_s28  }
  0x70   : > { %s6085_s4 = sshll.u32 %s7210_s12, 12  ;;  %s368_s21 = scalar_lea.vmem [#allocation14], %s5828_s0 }
  0x71   : > { %s375_s26 = sshll.u32 %s368_s21, 4  ;;  %s7497_s18 = scalar_lea.hbm %s8431_s6, %s6085_s4  ;;  %s7499_s26 = int_to_ptr.vmem [resolvable:$true] %s375_s26 }
  0x72   : > { %s6960_s9 = scalar_lea.hbm %s7497_s18, 4096  ;;  %s6965_s0 = scalar_lea.hbm %s8431_s6, 8192 }
  0x73   : > { %p6961_p0 = scmp.ne.s32.totalorder %s7497_s18, %s6960_s9  ;;  %p6966_p5 = scmp.lt.u32.totalorder %s7497_s18, %s8431_s6 }
  0x74   : > { %p6967_p9 = scmp.lt.u32.totalorder %s6965_s0, %s6960_s9  ;;  %p6969_p2 = scmp.lt.u32.totalorder %s6960_s9, %s7497_s18 }
  0x75   : > { %p6963_p11 = pnand %p6961_p0, %p7427_p10 }
  0x76   : > { %p6968_p13 = por %p6967_p9, %p6966_p5 }
  0x77   : > { %p6964_p4 = pneg %p6963_p11 }
  0x78   : > { %p6970_p3 = por %p6969_p2, %p6968_p13 }
  0x7a   : > { %p6971_p12 = pnand %p6970_p3, %p6964_p4 }
  0x7c   : > { %6974 = shalt.err (!%p6971_p12)
}
  0x7d   : > { %s6975_s4 = scalar_lea.vmem %s7499_s26, 4096  ;;  %s7219_s24 = smov [#allocation14]  }
  0x7e   : > { %p6976_p1 = scmp.ne.s32.totalorder %s7499_s26, %s6975_s4  ;;  %s6980_s16 = sshll.u32 %s7219_s24, 4  ;;  %s6981_s16 = int_to_ptr.vmem [resolvable:$false] %s6980_s16 }
  0x7f   : > { %s6982_s14 = scalar_lea.vmem %s6981_s16, 8192  ;;  %p6983_p0 = scmp.lt.s32.totalorder %s7499_s26, %s6981_s16 }
  0x80   : > { %p6978_p6 = pnand %p6976_p1, %p7427_p10  ;;  %p6984_p11 = scmp.lt.s32.totalorder %s6982_s14, %s6975_s4 }
  0x82   : > { %p6979_p7 = pneg %p6978_p6  ;;  %p6985_p5 = por %p6984_p11, %p6983_p0 }
  0x84   : > { %p6986_p9 = pnand %p6985_p5, %p6979_p7 }
  0x86   : > { %6989 = shalt.err (!%p6986_p9)
}
  0x87   : > { %s7220_s9 = smov 1024   ;;  %s7221_s30 = smov [#allocation7]  }
  0x88   : > { %6572 = dma.hbm_to_vmem [thread:$0]  (!%p7415_p8), %s7497_s18, 4096, %s7499_s26, %s7421_s22, %s7220_s9, %s7220_s9, %s7216_s17  }
  0x89   : > { %s289_s0 = sshll.u32 %s7221_s30, 4  ;;  %s5831_s11 = sshll.u32 %s7374_s25, 10  ;;  %s290_s0 = int_to_ptr.vmem [resolvable:$true] %s289_s0 }
  0x8a   : > { %s6990_s4 = scalar_lea.hbm %s8426_s1, 128  ;;  %p8468_p13 = scmp.ne.s32.totalorder %s8461_s15, 0 }
  0x8b   : > { %p6991_p4 = scmp.ne.s32.totalorder %s8426_s1, %s6990_s4  ;;  %p6997_p12 = scmp.lt.u32.totalorder %s6990_s4, %s8426_s1 }
  0x8d   : > { %p6993_p2 = pnand %p6991_p4, %p8468_p13 }
  0x8f   : > { %p6994_p3 = pneg %p6993_p2 }
  0x91   : > { %p6999_p1 = pnand %p6997_p12, %p6994_p3 }
  0x93   : > { %7002 = shalt.err (!%p6999_p1)
}
  0x94   : > { %s7003_s26 = scalar_lea.vmem %s290_s0, 128  ;;  %p7011_p11 = scmp.lt.s32.totalorder %s290_s0, %s290_s0 }
  0x95   : > { %p7004_p6 = scmp.ne.s32.totalorder %s290_s0, %s7003_s26  ;;  %p7012_p5 = scmp.lt.s32.totalorder %s7003_s26, %s7003_s26 }
  0x97   : > { %p7006_p7 = pnand %p7004_p6, %p8468_p13  ;;  %p7013_p9 = por %p7012_p5, %p7011_p11 }
  0x99   : > { %p7007_p0 = pneg %p7006_p7 }
  0x9b   : > { %p7014_p8 = pnand %p7013_p9, %p7007_p0 }
  0x9d   : > { %7017 = shalt.err (!%p7014_p8)
}
  0x9e   : > { %p8469_p4 = scmp.ne.s32.totalorder %s8459_s23, 0  ;;  %s6086_s5 = sshll.u32 %s7210_s12, 14 }
  0x9f   : > { %s389_s28 = scalar_lea.vmem [#allocation15], %s5831_s11  ;;  %s7547_s4 = scalar_lea.hbm %s8432_s7, %s6086_s5 }
  0xa0   : > { %6556 = dma.hbm_to_vmem [thread:$0]  (!%p8469_p4), %s8426_s1, 128, %s290_s0, [#allocation8]  }
  0xa1   : > { %s396_s30 = sshll.u32 %s389_s28, 4  ;;  %s7018_s16 = scalar_lea.hbm %s7547_s4, 16384  ;;  %s7549_s30 = int_to_ptr.vmem [resolvable:$true] %s396_s30 }
  0xa2   : > { %p7019_p8 = scmp.ne.s32.totalorder %s7547_s4, %s7018_s16  ;;  %s7023_s11 = scalar_lea.hbm %s8432_s7, 32768 }
  0xa3   : > { %p7024_p12 = scmp.lt.u32.totalorder %s7547_s4, %s8432_s7  ;;  %p7025_p1 = scmp.lt.u32.totalorder %s7023_s11, %s7018_s16 }
  0xa4   : > { %p7021_p2 = pnand %p7019_p8, %p7427_p10  ;;  %p7027_p7 = scmp.lt.u32.totalorder %s7018_s16, %s7547_s4 }
  0xa5   : > { %p7026_p6 = por %p7025_p1, %p7024_p12 }
  0xa6   : > { %p7022_p3 = pneg %p7021_p2 }
  0xa7   : > { %p7028_p0 = por %p7027_p7, %p7026_p6 }
  0xa9   : > { %p7029_p11 = pnand %p7028_p0, %p7022_p3 }
  0xab   : > { %7032 = shalt.err (!%p7029_p11)
}
  0xac   : > { %s7033_s9 = scalar_lea.vmem %s7549_s30, 16384  ;;  %s7222_s5 = smov [#allocation15]  }
  0xad   : > { %p7034_p5 = scmp.ne.s32.totalorder %s7549_s30, %s7033_s9  ;;  %s7038_s28 = sshll.u32 %s7222_s5, 4  ;;  %s7039_s28 = int_to_ptr.vmem [resolvable:$false] %s7038_s28 }
  0xae   : > { %s7040_s21 = scalar_lea.vmem %s7039_s28, 32768  ;;  %p7041_p2 = scmp.lt.s32.totalorder %s7549_s30, %s7039_s28 }
  0xaf   : > { %p7036_p9 = pnand %p7034_p5, %p7427_p10  ;;  %p7042_p4 = scmp.lt.s32.totalorder %s7040_s21, %s7033_s9 }
  0xb1   : > { %p7037_p8 = pneg %p7036_p9  ;;  %p7043_p12 = por %p7042_p4, %p7041_p2 }
  0xb3   : > { %p7044_p1 = pnand %p7043_p12, %p7037_p8 }
  0xb5   : > { %7047 = shalt.err (!%p7044_p1)
}
  0xb6   : > { %p8470_p3 = scmp.ne.s32.totalorder %s8465_s29, 0  ;;  %s8471_s24 = smov 4  }
  0xb7   : > { %s7223_s16 = smov [#allocation9]   ;;  %s7224_s14 = smov [#allocation10]  }
  0xb8   : > { %6575 = dma.hbm_to_vmem [thread:$0]  (!%p8470_p3), %s7547_s4, 16384, %s7549_s30, %s7421_s22, %s7216_s17, %s7216_s17, %s8471_s24  }
  0xb9   : > { %s300_s0 = sshll.u32 %s7223_s16, 4  ;;  %s311_s11 = sshll.u32 %s7224_s14, 4  ;;  %s301_s0 = int_to_ptr.vmem [resolvable:$true] %s300_s0  ;;  %s7576_s11 = int_to_ptr.vmem [resolvable:$true] %s311_s11 }
  0xba   : > { %s7048_s9 = scalar_lea.hbm %s8427_s2, 128 }
  0xbb   : > { %p7049_p4 = scmp.ne.s32.totalorder %s8427_s2, %s7048_s9  ;;  %p7055_p0 = scmp.lt.u32.totalorder %s7048_s9, %s8427_s2 }
  0xbd   : > { %p7051_p6 = pnand %p7049_p4, %p8468_p13 }
  0xbf   : > { %p7052_p7 = pneg %p7051_p6 }
  0xc1   : > { %p7057_p11 = pnand %p7055_p0, %p7052_p7 }
  0xc3   : > { %7060 = shalt.err (!%p7057_p11)
}
  0xc4   : > { %s7061_s30 = scalar_lea.vmem %s301_s0, 128  ;;  %p7069_p2 = scmp.lt.s32.totalorder %s301_s0, %s301_s0 }
  0xc5   : > { %p7062_p5 = scmp.ne.s32.totalorder %s301_s0, %s7061_s30  ;;  %p7070_p12 = scmp.lt.s32.totalorder %s7061_s30, %s7061_s30 }
  0xc7   : > { %p7064_p9 = pnand %p7062_p5, %p8468_p13  ;;  %p7071_p1 = por %p7070_p12, %p7069_p2 }
  0xc9   : > { %p7065_p8 = pneg %p7064_p9 }
  0xcb   : > { %p7072_p3 = pnand %p7071_p1, %p7065_p8 }
  0xcd   : > { %7075 = shalt.err (!%p7072_p3)
}
  0xce   : > { %p8472_p4 = scmp.ne.s32.totalorder %s8459_s23, 0  ;;  %s7076_s26 = scalar_lea.hbm %s8428_s3, 16 }
  0xcf   : > { %p7077_p6 = scmp.ne.s32.totalorder %s8428_s3, %s7076_s26  ;;  %p7083_p3 = scmp.lt.u32.totalorder %s7076_s26, %s8428_s3 }
  0xd0   : > { %6559 = dma.hbm_to_vmem [thread:$0]  (!%p8472_p4), %s8427_s2, 128, %s301_s0, [#allocation8]  }
  0xd1   : > { %p7079_p7 = pnand %p7077_p6, %p8468_p13 }
  0xd3   : > { %p7080_p0 = pneg %p7079_p7 }
  0xd5   : > { %p7085_p11 = pnand %p7083_p3, %p7080_p0 }
  0xd7   : > { %7088 = shalt.err (!%p7085_p11)
}
  0xd8   : > { %s7089_s0 = scalar_lea.vmem %s7576_s11, 16  ;;  %s7096_s21 = scalar_lea.vmem %s7576_s11, 32 }
  0xd9   : > { %p7090_p5 = scmp.ne.s32.totalorder %s7576_s11, %s7089_s0  ;;  %p7097_p2 = scmp.lt.s32.totalorder %s7576_s11, %s7576_s11 }
  0xda   : > { %p7098_p12 = scmp.lt.s32.totalorder %s7096_s21, %s7089_s0 }
  0xdb   : > { %p7092_p9 = pnand %p7090_p5, %p8468_p13 }
  0xdc   : > { %p7099_p1 = por %p7098_p12, %p7097_p2 }
  0xdd   : > { %p7093_p8 = pneg %p7092_p9 }
  0xdf   : > { %p7100_p6 = pnand %p7099_p1, %p7093_p8 }
  0xe1   : > { %7103 = shalt.err (!%p7100_p6)
}
  0xe2   : > { %6562 = dma.hbm_to_vmem [thread:$0]  (!%p8472_p4), %s8428_s3, 16, %s7576_s11, [#allocation11]  }
  0xe3   : > { %s6517_s15 = smul.u32 23, %s7374_s25 }
  0xe4   : > { %s6518_s4 = smul.u32 368, %s7210_s12  ;;  %s7109_s12 = scalar_lea.hbm %s8433_s8, 736 }
  0xe5   : > { %s410_s23 = scalar_lea.vmem [#allocation16], %s6517_s15 }
  0xe6   : > { %s7625_s14 = scalar_lea.hbm %s8433_s8, %s6518_s4  ;;  %s418_s26 = sshll.u32 %s410_s23, 4  ;;  %s419_s26 = int_to_ptr.vmem [resolvable:$true] %s418_s26 }
  0xe7   : > { %s7104_s18 = scalar_lea.hbm %s7625_s14, 368  ;;  %p7110_p4 = scmp.lt.u32.totalorder %s7625_s14, %s8433_s8 }
  0xe8   : > { %p7105_p13 = scmp.ne.s32.totalorder %s7625_s14, %s7104_s18  ;;  %p7111_p3 = scmp.lt.u32.totalorder %s7109_s12, %s7104_s18 }
  0xe9   : > { %p7113_p5 = scmp.lt.u32.totalorder %s7104_s18, %s7625_s14 }
  0xea   : > { %p7107_p7 = pnand %p7105_p13, %p7427_p10  ;;  %p7112_p11 = por %p7111_p3, %p7110_p4 }
  0xec   : > { %p7108_p0 = pneg %p7107_p7  ;;  %p7114_p9 = por %p7113_p5, %p7112_p11 }
  0xee   : > { %p7115_p8 = pnand %p7114_p9, %p7108_p0 }
  0xf0   : > { %7118 = shalt.err (!%p7115_p8)
}
  0xf1   : > { %s7119_s28 = scalar_lea.vmem %s419_s26, 368  ;;  %s7225_s0 = smov [#allocation16]  }
  0xf2   : > { %p7120_p2 = scmp.ne.s32.totalorder %s419_s26, %s7119_s28  ;;  %s7124_s21 = sshll.u32 %s7225_s0, 4  ;;  %s7125_s21 = int_to_ptr.vmem [resolvable:$false] %s7124_s21 }
  0xf3   : > { %s7126_s17 = scalar_lea.vmem %s7125_s21, 736  ;;  %p7127_p6 = scmp.lt.s32.totalorder %s419_s26, %s7125_s21 }
  0xf4   : > { %p7122_p12 = pnand %p7120_p2, %p7427_p10  ;;  %p7128_p13 = scmp.lt.s32.totalorder %s7126_s17, %s7119_s28 }
  0xf6   : > { %p7123_p1 = pneg %p7122_p12  ;;  %p7129_p7 = por %p7128_p13, %p7127_p6 }
  0xf8   : > { %p7130_p3 = pnand %p7129_p7, %p7123_p1 }
  0xfa   : > { %7133 = shalt.err (!%p7130_p3)
}
  0xfb   : > { %p8473_p4 = scmp.ne.s32.totalorder %s8465_s29, 0  ;;  %p8474_p0 = scmp.ne.s32.totalorder %s8458_s20, 0 }
  0xfc   : > { %p8475_p10 = scmp.eq.s32.totalorder (!%p8474_p0), %s7330_s13, 0 }
  0xfd   : > { %6578 = dma.hbm_to_vmem [thread:$0]  (!%p8473_p4), %s7625_s14, 368, %s419_s26, %s7421_s22  }
  0xfe   : > { %427 = sbr.rel (%p8474_p0) target bundleno = 3445 (0xd75), region = 56 }
 0x105   : > { %7177 = dma.done.wait (%p8475_p10), [#allocation5], 256   ;;  %p8476_p11 = pmov %p8475_p10 }
 0x106   : > { %p8477_p5 = pmov %p8475_p10 }
 0x107   : > { %7179 = vsyncadd (%p8476_p11), [#allocation5], 4294967040 }
 0x108   : > { %7181 = dma.done.wait (%p8477_p5), [#allocation8], 256   ;;  %p8478_p9 = pmov %p8477_p5 }
 0x109   : > { %p8479_p8 = pmov %p8477_p5 }
 0x10a   : > { %7183 = vsyncadd (%p8478_p9), [#allocation8], 4294967040 }
 0x10b   : > { %7185 = dma.done.wait (%p8479_p8), [#allocation11], 16   ;;  %p8480_p2 = pmov %p8477_p5 }
 0x10c   : > { %s445_s20 = sand.u32 1, %s7330_s13   ;;  %s447_s29 = sand.u32 1, %s7202_s10  }
 0x10d   : > { %7187 = vsyncadd (%p8480_p2), [#allocation11], 4294967280  ;;  %s5840_s22 = sshll.u32 %s447_s29, 4  ;;  %s446_s27 = scalar_lea.sflag [#allocation5], %s445_s20 }
 0x10e   : > { %s7661_s30 = scalar_lea.vmem [#allocation12], %s5840_s22  ;;  %p8481_p12 = scmp.ne.s32.totalorder %s8457_s19, 0 }
 0x110   : > { %7189 = dma.done.wait (%p8481_p12), %s446_s27, 21360  }
 0x111   : > { %7191 = vsyncadd (%p8481_p12), %s446_s27, 4294945936  ;;  %s5842_s15 = sshll.u32 %s447_s29, 8  ;;  %s5843_s4 = sshll.u32 %s447_s29, 10 }
 0x112   : > { %s6519_s24 = smul.u32 23, %s447_s29  ;;  %s7667_s16 = scalar_lea.vmem [#allocation13], %s5840_s22 }
 0x113   : > { %s7669_s14 = scalar_lea.vmem [#allocation14], %s5842_s15  ;;  %s7671_s23 = scalar_lea.vmem [#allocation15], %s5843_s4 }
 0x114   : > { %s7673_s26 = scalar_lea.vmem [#allocation16], %s6519_s24  ;;  %p8482_p1 = scmp.ne.s32.totalorder %s7330_s13, 0 }
 0x115   : > { %v542_v0 = vld [vmem:[#allocation9] sm:$0x3f] (!%p8482_p1)  ;;  %vm557_vm0 = vcmask (!%p8482_p1), 1045504   ;;  %v540_v1 = vld [vmem:[#allocation4] sm:$0xff] (!%p8482_p1)  ;;  %vm550_vm1 = vcmask (!%p8482_p1), 48128   ;;  %v541_v2 = vld [vmem:[#allocation4 + $0x8] sm:$0xff] (!%p8482_p1) }
 0x116   : > { %539 = sbr.rel (%p8482_p1) target bundleno = 498 (0x1f2), region = 96  ;;  %6336 = vmatprep.subr.msk.mxu0 (!%p8482_p1), %vm557_vm0, %v542_v0  ;;  %6338 = vmatprep.mubr.msk.f32.mxu0 (!%p8482_p1), %vm550_vm1, %v540_v1  ;;  %v5845_v3 = vld [vmem:[#allocation10] ss:$0 sm:$0xff] (!%p8482_p1)  ;;  %v636_v5 = vld [vmem:[#allocation7] sm:$0xff] (!%p8482_p1)  ;;  %vm638_vm2 = vcmask (!%p8482_p1), 261120  }
 0x117   : > { %6337 = vmatpush3.msk.msra.mxu0 (!%p8482_p1), %vm557_vm0, %v542_v0 }
 0x118   : > { %6339 = vmatmul.mubr.msk.f32.vlgmr.msra.gmra.mrb[0].mxu0 (!%p8482_p1), %vm550_vm1, %v541_v2 }
 0x1eb   : > { %v6340_v4 = vpop.f32.mrb[0].mxu0 }
 0x1ec   : > { %v633_v6 = vadd.f32 %v6340_v4, %v5845_v3  ;;  %v627_v7 = vpop.f32.mrb[1].mxu0 }
 0x1ed   : > { %v628_v8 = vadd.f32 %v5845_v3, %v627_v7 }
 0x1ee   : > { %v640_v9 = vadd.f32 %v636_v5, %v633_v6 }
 0x1ef   : > { %v637_v10 = vadd.f32 %v636_v5, %v628_v8 }
 0x1f0   : > { %641 = vst.msk [vmem:[#allocation2 + $0x8] sm:$0xff] %vm638_vm2, %v640_v9 }
 0x1f1   : > { %639 = vst.msk [vmem:[#allocation2] sm:$0xff] %vm638_vm2, %v637_v10 }
 0x1f2 PF: > { %v6666_v11 = vld [vmem:[%s7661_s30] sm:$0xff]   ;;  %v7226_v12 = vmov 0.0   ;;  %v6667_v13 = vld [vmem:[%s7661_s30 + $0x8] sm:$0xff]   ;;  %vm7227_vm3 = vmmov 0   ;;  %vm668_vm4 = vcmask 261120   ;;  %s7228_s19 = smov 64  }
 0x1f3   : > { %6341 = vmatprep.subr.bf16.mxu0 %v7226_v12  ;;  %6349 = vmatprep.subr.mxu1 %v7226_v12  ;;  %v5849_v17 = vld [vmem:[%s7673_s26] ss:$0 sm:$0xff]  ;;  %s7229_s18 = smov 96   ;;  %s7230_s11 = smov 92   ;;  %vm718_vm5 = vcmask 31744   ;;  %vm794_vm6 = vcmask 64512  }
 0x1f4   : > { %6342 = vmatpush3.bf16.msra.mxu0 %v6666_v11  ;;  %6345 = vmatprep.mubr.msk.bf16.mxu0 %vm7227_vm3, %v7226_v12  ;;  %s7231_s25 = smov 124   ;;  %s7232_s12 = smov 88   ;;  %vm1052_vm7 = vcmask 64544   ;;  %vm1223_vm8 = vcmask 97344   ;;  %vm1394_vm9 = vcmask 130144   ;;  %vm1565_vm10 = vcmask 162944  }
 0x1f5   : > { %6343 = vmatprep.subr.bf16.mxu0 %v7226_v12  ;;  %6351 = vmatprep.mubr.msk.f32.mxu1 %vm7227_vm3, %v7226_v12  ;;  %s7233_s9 = smov 120   ;;  %s7234_s5 = smov 84   ;;  %vm1736_vm11 = vcmask 195744   ;;  %vm1907_vm12 = vcmask 228544   ;;  %vm2078_vm13 = vcmask 261344  }
 0x1f6   : > { %s7235_s28 = smov 116   ;;  %s7236_s0 = smov 80  }
 0x1f7   : > { %v643_v15 = vld [vmem:[#allocation2 + $0x8] sm:$0xff]  ;;  %s7237_s21 = smov 112   ;;  %s7238_s17 = smov 108  }
 0x1f8   : > { %v642_v14 = vld [vmem:[#allocation2] sm:$0xff]  ;;  %6344 = vmatpush3.bf16.msra.mxu0 %v6667_v13  ;;  %s7239_s20 = smov 72   ;;  %s7240_s29 = smov 104  }
 0x1f9   : > { %v644_v16 = vpack.c.bf16 %v643_v15, %v642_v14  ;;  %6364 = vmatprep.subr.mxu0 %v7226_v12  ;;  %s7241_s22 = smov 68   ;;  %s7242_s27 = smov 100  }
 0x1fa   : > { %s7243_s30 = smov 60   ;;  %s7244_s15 = smov 48  }
 0x1fb   : > { %6346 = vmatmul.mubr.msk.bf16.vlgmr.msra.gmra.mrb[0].mxu0 %vm668_vm4, %v644_v16  ;;  %s7245_s4 = smov 36   ;;  %s7246_s24 = smov 76  }
 0x1fc   : > { %6366 = vmatprep.mubr.msk.f32.mxu0 %vm7227_vm3, %v7226_v12  ;;  %p6078_p6 = scmp.ne.s32.totalorder %s7330_s13, 1 }
 0x2ce   : > { %v706_v18 = vpop.f32.mrb[0].mxu0 }
 0x2cf   : > { %v7691_v19 = vadd.f32 %v5849_v17, %v706_v18  ;;  %v6347_v20 = vpop.f32.mrb[1].mxu0 }
 0x2d0   : > { %v709_v21 = vpop.f32.mrb[2].mxu0 }
 0x2d1   : > { %804 = vrot.lane.b32.xlu1 %v7691_v19, %s7228_s19  ;;  %716 = vrot.lane.b32.xlu0 %v7691_v19, %s7229_s18  ;;  %v6348_v22 = vpop.f32.mrb[3].mxu0  ;;  %v713_v23 = vmul.f32 0.5, %v7691_v19  ;;  %v7710_v24 = vadd.f32 %v5849_v17, %v709_v21 }
 0x2d3   : > { %v7715_v25 = vmul.f32 0.5, %v7710_v24 }
 0x2d5   : > { %885 = vrot.lane.b32.xlu1 %v7691_v19, %s7230_s11 }
 0x2d9   : > { %883 = vrot.lane.b32.xlu1 %v713_v23, %s7231_s25 }
 0x2dd   : > { %1056 = vrot.lane.b32.xlu1 %v7691_v19, %s7232_s12 }
 0x2e1   : > { %1054 = vrot.lane.b32.xlu1 %v713_v23, %s7233_s9 }
 0x2e5   : > { %1227 = vrot.lane.b32.xlu1 %v7691_v19, %s7234_s5 }
 0x2e9   : > { %1225 = vrot.lane.b32.xlu1 %v713_v23, %s7235_s28 }
 0x2ed   : > { %1398 = vrot.lane.b32.xlu1 %v7691_v19, %s7236_s0 }
 0x2f1   : > { %1396 = vrot.lane.b32.xlu1 %v713_v23, %s7237_s21 }
 0x2f5   : > { %1567 = vrot.lane.b32.xlu1 %v713_v23, %s7238_s17 }
 0x2f9   : > { %1740 = vrot.lane.b32.xlu1 %v7691_v19, %s7239_s20 }
 0x2fd   : > { %1738 = vrot.lane.b32.xlu1 %v713_v23, %s7240_s29 }
 0x301   : > { %1911 = vrot.lane.b32.xlu1 %v7691_v19, %s7241_s22 }
 0x305   : > { %1909 = vrot.lane.b32.xlu1 %v713_v23, %s7242_s27 }
 0x309   : > { %2081 = vrot.lane.b32.xlu1 %v7710_v24, %s7229_s18  ;;  %s7247_s18 = smov 56  }
 0x30d   : > { %2246 = vrot.lane.b32.xlu1 %v7715_v25, %s7231_s25  ;;  %s7249_s25 = smov 44  }
 0x311   : > { %2416 = vrot.lane.b32.xlu1 %v7715_v25, %s7233_s9  ;;  %s7252_s9 = smov 8  }
 0x315   : > { %2586 = vrot.lane.b32.xlu1 %v7715_v25, %s7235_s28  ;;  %s7254_s28 = smov 16  }
 0x319   : > { %2756 = vrot.lane.b32.xlu1 %v7715_v25, %s7237_s21  ;;  %s7256_s21 = smov 24  }
 0x31d   : > { %2926 = vrot.lane.b32.xlu1 %v7715_v25, %s7238_s17  ;;  %s7257_s17 = smov 28  }
 0x321   : > { %3096 = vrot.lane.b32.xlu1 %v7715_v25, %s7240_s29 }
 0x325   : > { %3266 = vrot.lane.b32.xlu1 %v7715_v25, %s7242_s27 }
 0x329   : > { %970 = vrot.lane.b32.xlu1 %v7691_v19, %s7243_s30 }
 0x32d   : > { %1483 = vrot.lane.b32.xlu1 %v7691_v19, %s7244_s15 }
 0x331   : > { %1996 = vrot.lane.b32.xlu1 %v7691_v19, %s7245_s4 }
 0x335   : > { %2333 = vrot.lane.b32.xlu1 %v7710_v24, %s7243_s30 }
 0x343   : > { %v805_v26 = vpop.permute.xlu1 %804  ;;  %v717_v27 = vpop.permute.xlu0 %716 }
 0x344   : > { %6350 = vmatpush3.xpose.msk.msra.mxu1 %vm718_vm5, %v717_v27 }
 0x345   : > { %6354 = vmatprep.subr.mxu1 %v7226_v12 }
 0x347   : > { %v886_v28 = vpop.permute.xlu1 %885  ;;  %6352 = vmatmul.mubr.msk.f32.vlgmr.msra.gmra.mrb[0].mxu1 %vm718_vm5, %v713_v23 }
 0x348   : > { %6355 = vmatpush3.msra.mxu1 %v805_v26  ;;  %6356 = vmatprep.mubr.msk.f32.mxu1 %vm7227_vm3, %v7226_v12 }
 0x349   : > { %6359 = vmatprep.subr.mxu1 %v7226_v12 }
 0x34b   : > { %v884_v29 = vpop.permute.xlu1 %883 }
 0x34f   : > { %v1057_v30 = vpop.permute.xlu1 %1056 }
 0x353   : > { %v1055_v31 = vpop.permute.xlu1 %1054 }
 0x357   : > { %v1228_v32 = vpop.permute.xlu1 %1227 }
 0x35b   : > { %v1226_v33 = vpop.permute.xlu1 %1225 }
 0x35f   : > { %v1399_v34 = vpop.permute.xlu1 %1398 }
 0x363   : > { %v1397_v35 = vpop.permute.xlu1 %1396 }
 0x367   : > { %v7736_v36 = vpop.permute.xlu1 %1567 }
 0x36b   : > { %v7738_v37 = vpop.permute.xlu1 %1740 }
 0x36f   : > { %v7740_v38 = vpop.permute.xlu1 %1738 }
 0x373   : > { %v7742_v39 = vpop.permute.xlu1 %1911 }
 0x377   : > { %v7744_v40 = vpop.permute.xlu1 %1909 }
 0x37b   : > { %v7746_v41 = vpop.permute.xlu1 %2081 }
 0x37f   : > { %v7748_v42 = vpop.permute.xlu1 %2246 }
 0x383   : > { %v7750_v43 = vpop.permute.xlu1 %2416 }
 0x387   : > { %v7752_v44 = vpop.permute.xlu1 %2586 }
 0x38b   : > { %v7754_v45 = vpop.permute.xlu1 %2756 }
 0x38f   : > { %v7756_v46 = vpop.permute.xlu1 %2926 }
 0x393   : > { %v7758_v47 = vpop.permute.xlu1 %3096 }
 0x397   : > { %v7760_v48 = vpop.permute.xlu1 %3266 }
 0x39b   : > { %v971_v49 = vpop.permute.xlu1 %970 }
 0x39c   : > { %6365 = vmatpush3.msra.mxu0 %v971_v49 }
 0x39d   : > { %6374 = vmatprep.subr.mxu0 %v7226_v12 }
 0x41a   : > { %v790_v50 = vpop.f32.mrb[0].mxu1 }
 0x41b   : > { %v6353_v51 = vpop.f32.mrb[1].mxu1  ;;  %v795_v52 = vsel %vm794_vm6, %v790_v50, -inf }
 0x41c   : > { %796 = vmax.xlane.f32.xlu0 %v795_v52  ;;  %v1484_v52 = vpop.permute.xlu1 %1483 }
 0x432   : > { %1569 = vrot.lane.b32.xlu0 %v7691_v19, %s7246_s24 }
 0x436   : > { %2248 = vrot.lane.b32.xlu0 %v7710_v24, %s7230_s11  ;;  %s7248_s11 = smov 52  }
 0x43a   : > { %2418 = vrot.lane.b32.xlu0 %v7710_v24, %s7232_s12  ;;  %s7250_s12 = smov 40  }
 0x43e   : > { %2588 = vrot.lane.b32.xlu0 %v7710_v24, %s7234_s5  ;;  %s7253_s5 = smov 12  }
 0x442   : > { %2758 = vrot.lane.b32.xlu0 %v7710_v24, %s7236_s0  ;;  %s7255_s0 = smov 20  }
 0x446   : > { %2928 = vrot.lane.b32.xlu0 %v7710_v24, %s7246_s24 }
 0x44a   : > { %3098 = vrot.lane.b32.xlu0 %v7710_v24, %s7239_s20 }
 0x44e   : > { %3268 = vrot.lane.b32.xlu0 %v7710_v24, %s7241_s22 }
 0x452   : > { %1141 = vrot.lane.b32.xlu0 %v7691_v19, %s7247_s18 }
 0x456   : > { %1312 = vrot.lane.b32.xlu0 %v7691_v19, %s7248_s11 }
 0x45a   : > { %1654 = vrot.lane.b32.xlu0 %v7691_v19, %s7249_s25 }
 0x45e   : > { %1825 = vrot.lane.b32.xlu0 %v7691_v19, %s7250_s12 }
 0x4a9   : > { %v797_v53 = vpop.xlane.xlu0 %796 }
 0x4aa   : > { %v798_v54 = vsub.f32 %v790_v50, %v797_v53 }
 0x4ac   : > { %v799_v55 = vmul.f32 1.442695, %v798_v54  ;;  %v7957_v54 = vpop.permute.xlu1 %1996 }
 0x4ad   : > { %v1570_v57 = vpop.permute.xlu0 %1569 }
 0x4ae   : > { %6798 = vpow2.f32 %v799_v55 }
 0x4b1   : > { %v2249_v58 = vpop.permute.xlu0 %2248 }
 0x4b5   : > { %v2419_v59 = vpop.permute.xlu0 %2418 }
 0x4b8   : > { %v7786_v56 = vpop.eup %6798 }
 0x4b9   : > { %6357 = vmatmul.mubr.msk.f32.vlgmr.msra.gmra.mrb[2].mxu1 %vm794_vm6, %v7786_v56  ;;  %v2589_v60 = vpop.permute.xlu0 %2588 }
 0x4ba   : > { %6360 = vmatpush3.xpose.msk.msra.mxu1 %vm718_vm5, %v886_v28  ;;  %6361 = vmatprep.mubr.msk.f32.mxu1 %vm7227_vm3, %v7226_v12 }
 0x4bb   : > { %6369 = vmatprep.subr.mxu1 %v7226_v12 }
 0x4bd   : > { %6362 = vmatmul.mubr.msk.f32.vlgmr.msra.gmra.mrb[4].mxu1 %vm718_vm5, %v884_v29  ;;  %v2759_v61 = vpop.permute.xlu0 %2758 }
 0x4be   : > { %6370 = vmatpush3.xpose.msk.msra.mxu1 %vm718_vm5, %v1057_v30  ;;  %6371 = vmatprep.mubr.msk.f32.mxu1 %vm7227_vm3, %v7226_v12 }
 0x4bf   : > { %6379 = vmatprep.subr.mxu1 %v7226_v12 }
 0x4c1   : > { %6372 = vmatmul.mubr.msk.f32.vlgmr.msra.gmra.mrb[6].mxu1 %vm718_vm5, %v1055_v31  ;;  %v2929_v62 = vpop.permute.xlu0 %2928 }
 0x4c2   : > { %6380 = vmatpush3.xpose.msk.msra.mxu1 %vm718_vm5, %v1228_v32  ;;  %6381 = vmatprep.mubr.msk.f32.mxu1 %vm7227_vm3, %v7226_v12 }
 0x4c3   : > { %6389 = vmatprep.subr.mxu1 %v7226_v12 }
 0x4c5   : > { %6382 = vmatmul.mubr.msk.f32.vlgmr.msra.gmra.mrb[8].mxu1 %vm718_vm5, %v1226_v33  ;;  %v3099_v63 = vpop.permute.xlu0 %3098 }
 0x4c6   : > { %6390 = vmatpush3.xpose.msk.msra.mxu1 %vm718_vm5, %v1399_v34  ;;  %6391 = vmatprep.mubr.msk.f32.mxu1 %vm7227_vm3, %v7226_v12 }
 0x4c7   : > { %6399 = vmatprep.subr.mxu1 %v7226_v12 }
 0x4c9   : > { %6392 = vmatmul.mubr.msk.f32.vlgmr.msra.gmra.mrb[10].mxu1 %vm718_vm5, %v1397_v35  ;;  %v3269_v0 = vpop.permute.xlu0 %3268 }
 0x4ca   : > { %6400 = vmatpush3.xpose.msk.msra.mxu1 %vm718_vm5, %v1570_v57  ;;  %6401 = vmatprep.mubr.msk.f32.mxu1 %vm7227_vm3, %v7226_v12  ;;  %v7961_v57 = vpop.permute.xlu1 %2333 }
 0x4cb   : > { %6409 = vmatprep.subr.mxu1 %v7226_v12 }
 0x4cd   : > { %6402 = vmatmul.mubr.msk.f32.vlgmr.msra.gmra.mrb[12].mxu1 %vm718_vm5, %v7736_v36  ;;  %v1142_v50 = vpop.permute.xlu0 %1141 }
 0x4ce   : > { %6410 = vmatpush3.xpose.msk.msra.mxu1 %vm718_vm5, %v7738_v37  ;;  %6411 = vmatprep.mubr.msk.f32.mxu1 %vm7227_vm3, %v7226_v12 }
 0x4cf   : > { %6419 = vmatprep.subr.mxu1 %v7226_v12 }
 0x4d1   : > { %6412 = vmatmul.mubr.msk.f32.vlgmr.msra.gmra.mrb[14].mxu1 %vm718_vm5, %v7740_v38  ;;  %v1313_v51 = vpop.permute.xlu0 %1312 }
 0x4d2   : > { %6420 = vmatpush3.xpose.msk.msra.mxu1 %vm718_vm5, %v7742_v39  ;;  %6421 = vmatprep.mubr.msk.f32.mxu1 %vm7227_vm3, %v7226_v12 }
 0x4d3   : > { %6429 = vmatprep.subr.mxu1 %v7226_v12 }
 0x4d5   : > { %6422 = vmatmul.mubr.msk.f32.vlgmr.msra.gmra.mrb[16].mxu1 %vm718_vm5, %v7744_v40  ;;  %v1655_v53 = vpop.permute.xlu0 %1654 }
 0x4d6   : > { %6430 = vmatpush3.xpose.msk.msra.mxu1 %vm718_vm5, %v7746_v41  ;;  %6431 = vmatprep.mubr.msk.f32.mxu1 %vm7227_vm3, %v7226_v12 }
 0x4d7   : > { %6439 = vmatprep.subr.mxu1 %v7226_v12 }
 0x4d9   : > { %6432 = vmatmul.mubr.msk.f32.vlgmr.msra.gmra.mrb[18].mxu1 %vm718_vm5, %v7715_v25  ;;  %v7959_v55 = vpop.permute.xlu0 %1825 }
 0x4da   : > { %6440 = vmatpush3.xpose.msk.msra.mxu1 %vm718_vm5, %v2249_v58  ;;  %6441 = vmatprep.mubr.msk.f32.mxu1 %vm7227_vm3, %v7226_v12 }
 0x4db   : > { %6449 = vmatprep.subr.mxu1 %v7226_v12 }
 0x4dd   : > { %6442 = vmatmul.mubr.msk.f32.vlgmr.msra.gmra.mrb[20].mxu1 %vm718_vm5, %v7748_v42 }
 0x4de   : > { %6450 = vmatpush3.xpose.msk.msra.mxu1 %vm718_vm5, %v2419_v59  ;;  %6451 = vmatprep.mubr.msk.f32.mxu1 %vm7227_vm3, %v7226_v12 }
 0x4df   : > { %6459 = vmatprep.subr.mxu1 %v7226_v12 }
 0x4e1   : > { %6452 = vmatmul.mubr.msk.f32.vlgmr.msra.gmra.mrb[22].mxu1 %vm718_vm5, %v7750_v43 }
 0x4e2   : > { %6460 = vmatpush3.xpose.msk.msra.mxu1 %vm718_vm5, %v2589_v60  ;;  %6461 = vmatprep.mubr.msk.f32.mxu1 %vm7227_vm3, %v7226_v12 }
 0x4e3   : > { %6469 = vmatprep.subr.mxu1 %v7226_v12 }
 0x4e5   : > { %6462 = vmatmul.mubr.msk.f32.vlgmr.msra.gmra.mrb[24].mxu1 %vm718_vm5, %v7752_v44 }
 0x4e6   : > { %6470 = vmatpush3.xpose.msk.msra.mxu1 %vm718_vm5, %v2759_v61  ;;  %6471 = vmatprep.mubr.msk.f32.mxu1 %vm7227_vm3, %v7226_v12 }
 0x4e7   : > { %6479 = vmatprep.subr.mxu1 %v7226_v12 }
 0x4e9   : > { %6472 = vmatmul.mubr.msk.f32.vlgmr.msra.gmra.mrb[26].mxu1 %vm718_vm5, %v7754_v45 }
 0x4ea   : > { %6480 = vmatpush3.xpose.msk.msra.mxu1 %vm718_vm5, %v2929_v62  ;;  %6481 = vmatprep.mubr.msk.f32.mxu1 %vm7227_vm3, %v7226_v12 }
 0x4eb   : > { %6489 = vmatprep.subr.mxu1 %v7226_v12 }
 0x4ed   : > { %6482 = vmatmul.mubr.msk.f32.vlgmr.msra.gmra.mrb[28].mxu1 %vm718_vm5, %v7756_v46 }
 0x4ee   : > { %6490 = vmatpush3.xpose.msk.msra.mxu1 %vm718_vm5, %v3099_v63  ;;  %6491 = vmatprep.mubr.msk.f32.mxu1 %vm7227_vm3, %v7226_v12 }
 0x4ef   : > { %6499 = vmatprep.subr.mxu1 %v7226_v12 }
 0x4f1   : > { %6492 = vmatmul.mubr.msk.f32.vlgmr.msra.gmra.mrb[30].mxu1 %vm718_vm5, %v7758_v47 }
 0x4f2   : > { %6500 = vmatpush3.xpose.msk.msra.mxu1 %vm718_vm5, %v3269_v0  ;;  %6501 = vmatprep.mubr.msk.f32.mxu1 %vm7227_vm3, %v7226_v12 }
 0x4f3   : > { %6509 = vmatprep.subr.bf16.mxu1 %v7226_v12 }
 0x4f5   : > { %6502 = vmatmul.mubr.msk.f32.vlgmr.msra.gmra.mrb[32].mxu1 %vm718_vm5, %v7760_v48 }
 0x4f6   : > { %6513 = vmatprep.mubr.msk.bf16.mxu1 %vm7227_vm3, %v7226_v12 }
 0x58c   : > { %v7881_v1 = vpop.f32.mrb[2].mxu1 }
 0x58d   : > { %v6358_v2 = vpop.f32.mrb[3].mxu1 }
 0x590   : > { %v7883_v3 = vpop.f32.mrb[4].mxu1 }
 0x591   : > { %v6363_v4 = vpop.f32.mrb[5].mxu1  ;;  %v961_v5 = vsel %vm794_vm6, %v7883_v3, -inf }
 0x592   : > { %962 = vmax.xlane.f32.xlu0 %v961_v5 }
 0x594   : > { %v7887_v6 = vpop.f32.mrb[6].mxu1 }
 0x595   : > { %v6373_v7 = vpop.f32.mrb[7].mxu1  ;;  %v1132_v8 = vsel %vm794_vm6, %v7887_v6, -inf }
 0x596   : > { %1133 = vmax.xlane.f32.xlu1 %v1132_v8 }
 0x598   : > { %v7891_v9 = vpop.f32.mrb[8].mxu1 }
 0x599   : > { %v6383_v10 = vpop.f32.mrb[9].mxu1  ;;  %v1303_v36 = vsel %vm794_vm6, %v7891_v9, -inf }
 0x59c   : > { %v7893_v11 = vpop.f32.mrb[10].mxu1 }
 0x59d   : > { %v6393_v13 = vpop.f32.mrb[11].mxu1  ;;  %v1474_v39 = vsel %vm794_vm6, %v7893_v11, -inf }
 0x5a0   : > { %v7895_v14 = vpop.f32.mrb[12].mxu1 }
 0x5a1   : > { %v6403_v15 = vpop.f32.mrb[13].mxu1  ;;  %v1645_v40 = vsel %vm794_vm6, %v7895_v14, -inf }
 0x5a4   : > { %v7897_v16 = vpop.f32.mrb[14].mxu1 }
 0x5a5   : > { %v6413_v17 = vpop.f32.mrb[15].mxu1  ;;  %v1816_v18 = vsel %vm794_vm6, %v7897_v16, -inf }
 0x5a6   : > { %1817 = vmax.xlane.f32.xlu1 %v1816_v18 }
 0x5a8   : > { %v7901_v19 = vpop.f32.mrb[16].mxu1  ;;  %2167 = vrot.lane.b32.xlu0 %v7710_v24, %s7228_s19  ;;  %s7251_s19 = smov 4  }
 0x5a9   : > { %v6423_v20 = vpop.f32.mrb[17].mxu1  ;;  %v1987_v41 = vsel %vm794_vm6, %v7901_v19, -inf }
 0x5ac   : > { %v7905_v21 = vpop.f32.mrb[18].mxu1 }
 0x5ad   : > { %v6433_v22 = vpop.f32.mrb[19].mxu1  ;;  %v2158_v42 = vsel %vm794_vm6, %v7905_v21, -inf }
 0x5b0   : > { %v7907_v23 = vpop.f32.mrb[20].mxu1 }
 0x5b1   : > { %v6443_v25 = vpop.f32.mrb[21].mxu1  ;;  %v2324_v43 = vsel %vm794_vm6, %v7907_v23, -inf }
 0x5b4   : > { %v7909_v26 = vpop.f32.mrb[22].mxu1 }
 0x5b5   : > { %v6453_v27 = vpop.f32.mrb[23].mxu1  ;;  %v2494_v44 = vsel %vm794_vm6, %v7909_v26, -inf }
 0x5b7   : > { %2503 = vrot.lane.b32.xlu1 %v7710_v24, %s7247_s18 }
 0x5b8   : > { %v7913_v28 = vpop.f32.mrb[24].mxu1 }
 0x5b9   : > { %v6463_v29 = vpop.f32.mrb[25].mxu1  ;;  %v2664_v45 = vsel %vm794_vm6, %v7913_v28, -inf }
 0x5bc   : > { %v7915_v30 = vpop.f32.mrb[26].mxu1 }
 0x5bd   : > { %v6473_v31 = vpop.f32.mrb[27].mxu1  ;;  %v2834_v46 = vsel %vm794_vm6, %v7915_v30, -inf }
 0x5c0   : > { %v7917_v32 = vpop.f32.mrb[28].mxu1 }
 0x5c1   : > { %v6483_v33 = vpop.f32.mrb[29].mxu1  ;;  %v3004_v47 = vsel %vm794_vm6, %v7917_v32, -inf }
 0x5c4   : > { %v7919_v34 = vpop.f32.mrb[30].mxu1 }
 0x5c5   : > { %v6493_v35 = vpop.f32.mrb[31].mxu1  ;;  %v3174_v48 = vsel %vm794_vm6, %v7919_v34, -inf }
 0x5c7   : > { %1304 = vmax.xlane.f32.xlu0 %v1303_v36 }
 0x5c8   : > { %v7923_v37 = vpop.f32.mrb[32].mxu1 }
 0x5c9   : > { %v6503_v38 = vpop.f32.mrb[33].mxu1  ;;  %v3344_v49 = vsel %vm794_vm6, %v7923_v37, -inf }
 0x5cb   : > { %1475 = vmax.xlane.f32.xlu0 %v1474_v39 }
 0x5cf   : > { %1646 = vmax.xlane.f32.xlu0 %v1645_v40 }
 0x5d3   : > { %1988 = vmax.xlane.f32.xlu0 %v1987_v41 }
 0x5d7   : > { %2159 = vmax.xlane.f32.xlu0 %v2158_v42 }
 0x5db   : > { %2325 = vmax.xlane.f32.xlu1 %v2324_v43  ;;  %2495 = vmax.xlane.f32.xlu0 %v2494_v44 }
 0x5df   : > { %2665 = vmax.xlane.f32.xlu0 %v2664_v45  ;;  %2835 = vmax.xlane.f32.xlu1 %v2834_v46 }
 0x5e3   : > { %3005 = vmax.xlane.f32.xlu0 %v3004_v47  ;;  %3175 = vmax.xlane.f32.xlu1 %v3174_v48 }
 0x5e7   : > { %3345 = vmax.xlane.f32.xlu0 %v3344_v49 }
 0x5f4   : > { %2843 = vrot.lane.b32.xlu1 %v7710_v24, %s7244_s15 }
 0x5f8   : > { %3013 = vrot.lane.b32.xlu1 %v7710_v24, %s7249_s25 }
 0x5fc   : > { %3183 = vrot.lane.b32.xlu1 %v7710_v24, %s7250_s12 }
 0x5fd   : > { %2673 = vrot.lane.b32.xlu0 %v7710_v24, %s7248_s11 }
 0x600   : > { %3353 = vrot.lane.b32.xlu1 %v7710_v24, %s7245_s4 }
 0x61f   : > { %v963_v58 = vpop.xlane.xlu0 %962 }
 0x620   : > { %v964_v59 = vsub.f32 %v7883_v3, %v963_v58 }
 0x622   : > { %v965_v60 = vmul.f32 1.442695, %v964_v59 }
 0x623   : > { %v1134_v61 = vpop.xlane.xlu1 %1133  ;;  %v7975_v4 = vpop.permute.xlu0 %2167 }
 0x624   : > { %6800 = vpow2.f32 %v965_v60  ;;  %v1135_v62 = vsub.f32 %v7887_v6, %v1134_v61 }
 0x626   : > { %v1136_v63 = vmul.f32 1.442695, %v1135_v62 }
 0x628   : > { %6802 = vpow2.f32 %v1136_v63 }
 0x62e   : > { %v6801_v24 = vpop.eup %6800 }
 0x62f   : > { %6367 = vmatmul.mubr.msk.f32.vlgmr.msra.gmra.mrb[4].mxu0 %vm794_vm6, %v6801_v24  ;;  %v967_v0 = vsel %vm794_vm6, %v6801_v24, 0.0 }
 0x630   : > { %6375 = vmatpush3.msra.mxu0 %v1142_v50  ;;  %968 = vadd.xlane.f32.xlu1 %v967_v0 }
 0x631   : > { %6376 = vmatprep.mubr.msk.f32.mxu0 %vm7227_vm3, %v7226_v12  ;;  %6384 = vmatprep.subr.mxu0 %v7226_v12 }
 0x632   : > { %v6803_v2 = vpop.eup %6802 }
 0x633   : > { %6377 = vmatmul.mubr.msk.f32.vlgmr.msra.gmra.mrb[6].mxu0 %vm794_vm6, %v6803_v2  ;;  %v1138_v3 = vsel %vm794_vm6, %v6803_v2, 0.0  ;;  %v1818_v13 = vpop.xlane.xlu1 %1817 }
 0x634   : > { %6385 = vmatpush3.msra.mxu0 %v1313_v51  ;;  %1139 = vadd.xlane.f32.xlu0 %v1138_v3  ;;  %v1819_v18 = vsub.f32 %v7897_v16, %v1818_v13 }
 0x635   : > { %6386 = vmatprep.mubr.msk.f32.mxu0 %vm7227_vm3, %v7226_v12  ;;  %6394 = vmatprep.subr.mxu0 %v7226_v12 }
 0x636   : > { %v1820_v27 = vmul.f32 1.442695, %v1819_v18 }
 0x637   : > { %v7982_v31 = vpop.permute.xlu1 %2503 }
 0x654   : > { %v1305_v5 = vpop.xlane.xlu0 %1304 }
 0x655   : > { %v1306_v6 = vsub.f32 %v7891_v9, %v1305_v5 }
 0x657   : > { %v1307_v7 = vmul.f32 1.442695, %v1306_v6 }
 0x658   : > { %v1476_v8 = vpop.xlane.xlu0 %1475 }
 0x659   : > { %6804 = vpow2.f32 %v1307_v7  ;;  %v1477_v10 = vsub.f32 %v7893_v11, %v1476_v8  ;;  %v801_v7 = vsel %vm794_vm6, %v7786_v56, 0.0 }
 0x65b   : > { %v1478_v15 = vmul.f32 1.442695, %v1477_v10 }
 0x65c   : > { %v1647_v17 = vpop.xlane.xlu0 %1646 }
 0x65d   : > { %6806 = vpow2.f32 %v1478_v15  ;;  %v1648_v20 = vsub.f32 %v7895_v14, %v1647_v17 }
 0x65f   : > { %v1649_v22 = vmul.f32 1.442695, %v1648_v20 }
 0x660   : > { %v1989_v25 = vpop.xlane.xlu0 %1988 }
 0x661   : > { %6808 = vpow2.f32 %v1649_v22  ;;  %v1990_v29 = vsub.f32 %v7901_v19, %v1989_v25 }
 0x662   : > { %6810 = vpow2.f32 %v1820_v27 }
 0x663   : > { %v6805_v9 = vpop.eup %6804  ;;  %v1991_v35 = vmul.f32 1.442695, %v1990_v29 }
 0x664   : > { %6387 = vmatmul.mubr.msk.f32.vlgmr.msra.gmra.mrb[8].mxu0 %vm794_vm6, %v6805_v9  ;;  %v2160_v11 = vpop.xlane.xlu0 %2159  ;;  %v1309_v33 = vsel %vm794_vm6, %v6805_v9, 0.0 }
 0x665   : > { %6395 = vmatpush3.msra.mxu0 %v1484_v52  ;;  %v2161_v16 = vsub.f32 %v7905_v21, %v2160_v11  ;;  %1310 = vadd.xlane.f32.xlu0 %v1309_v33  ;;  %6812 = vpow2.f32 %v1991_v35 }
 0x666   : > { %6396 = vmatprep.mubr.msk.f32.mxu0 %vm7227_vm3, %v7226_v12  ;;  %6404 = vmatprep.subr.mxu0 %v7226_v12 }
 0x667   : > { %v6807_v14 = vpop.eup %6806  ;;  %v2162_v19 = vmul.f32 1.442695, %v2161_v16 }
 0x668   : > { %6397 = vmatmul.mubr.msk.f32.vlgmr.msra.gmra.mrb[10].mxu0 %vm794_vm6, %v6807_v14  ;;  %v2326_v36 = vpop.xlane.xlu1 %2325  ;;  %v2496_v38 = vpop.xlane.xlu0 %2495  ;;  %v1480_v39 = vsel %vm794_vm6, %v6807_v14, 0.0 }
 0x669   : > { %6405 = vmatpush3.msra.mxu0 %v1655_v53  ;;  %v2327_v40 = vsub.f32 %v7907_v23, %v2326_v36  ;;  %v2497_v21 = vsub.f32 %v7909_v26, %v2496_v38  ;;  %1481 = vadd.xlane.f32.xlu0 %v1480_v39  ;;  %6814 = vpow2.f32 %v2162_v19 }
 0x66a   : > { %6406 = vmatprep.mubr.msk.f32.mxu0 %vm7227_vm3, %v7226_v12  ;;  %6414 = vmatprep.subr.mxu0 %v7226_v12 }
 0x66b   : > { %v6809_v41 = vpop.eup %6808  ;;  %v2328_v42 = vmul.f32 1.442695, %v2327_v40  ;;  %v2498_v43 = vmul.f32 1.442695, %v2497_v21 }
 0x66c   : > { %6407 = vmatmul.mubr.msk.f32.vlgmr.msra.gmra.mrb[12].mxu0 %vm794_vm6, %v6809_v41  ;;  %v2666_v44 = vpop.xlane.xlu0 %2665  ;;  %v2836_v45 = vpop.xlane.xlu1 %2835  ;;  %v1651_v46 = vsel %vm794_vm6, %v6809_v41, 0.0 }
 0x66d   : > { %6816 = vpow2.f32 %v2328_v42  ;;  %6415 = vmatpush3.msra.mxu0 %v7959_v55  ;;  %v2667_v23 = vsub.f32 %v7913_v28, %v2666_v44  ;;  %v2837_v26 = vsub.f32 %v7915_v30, %v2836_v45  ;;  %1652 = vadd.xlane.f32.xlu0 %v1651_v46  ;;  %v6811_v47 = vpop.eup %6810 }
 0x66e   : > { %6818 = vpow2.f32 %v2498_v43  ;;  %6416 = vmatprep.mubr.msk.f32.mxu0 %vm7227_vm3, %v7226_v12  ;;  %6424 = vmatprep.subr.mxu0 %v7226_v12  ;;  %v1822_v24 = vsel %vm794_vm6, %v6811_v47, 0.0 }
 0x66f   : > { %v2668_v48 = vmul.f32 1.442695, %v2667_v23  ;;  %v2838_v49 = vmul.f32 1.442695, %v2837_v26  ;;  %v6813_v30 = vpop.eup %6812 }
 0x670   : > { %6417 = vmatmul.mubr.msk.f32.vlgmr.msra.gmra.mrb[14].mxu0 %vm794_vm6, %v6811_v47  ;;  %v3006_v50 = vpop.xlane.xlu0 %3005  ;;  %v3176_v51 = vpop.xlane.xlu1 %3175  ;;  %v1993_v3 = vsel %vm794_vm6, %v6813_v30, 0.0 }
 0x671   : > { %6820 = vpow2.f32 %v2668_v48  ;;  %6425 = vmatpush3.msra.mxu0 %v7957_v54  ;;  %v3007_v28 = vsub.f32 %v7917_v32, %v3006_v50  ;;  %6426 = vmatprep.mubr.msk.f32.mxu0 %vm7227_vm3, %v7226_v12  ;;  %v3177_v53 = vsub.f32 %v7919_v34, %v3176_v51 }
 0x672   : > { %6434 = vmatprep.subr.mxu0 %v7226_v12  ;;  %6822 = vpow2.f32 %v2838_v49 }
 0x673   : > { %v3008_v52 = vmul.f32 1.442695, %v3007_v28  ;;  %v8016_v32 = vpop.eup %6814  ;;  %v3178_v59 = vmul.f32 1.442695, %v3177_v53 }
 0x674   : > { %6427 = vmatmul.mubr.msk.f32.vlgmr.msra.gmra.mrb[16].mxu0 %vm794_vm6, %v6813_v30  ;;  %v3346_v55 = vpop.xlane.xlu0 %3345  ;;  %v2844_v0 = vpop.permute.xlu1 %2843  ;;  %v2164_v20 = vsel %vm794_vm6, %v8016_v32, 0.0 }
 0x675   : > { %6435 = vmatpush3.msra.mxu0 %v7975_v4  ;;  %6436 = vmatprep.mubr.msk.f32.mxu0 %vm7227_vm3, %v7226_v12  ;;  %6824 = vpow2.f32 %v3008_v52  ;;  %v3347_v60 = vsub.f32 %v7923_v37, %v3346_v55 }
 0x676   : > { %6444 = vmatprep.subr.mxu0 %v7226_v12  ;;  %6826 = vpow2.f32 %v3178_v59 }
 0x677   : > { %v6817_v54 = vpop.eup %6816  ;;  %v3348_v63 = vmul.f32 1.442695, %v3347_v60 }
 0x678   : > { %v6819_v58 = vpop.eup %6818  ;;  %6437 = vmatmul.mubr.msk.f32.vlgmr.msra.gmra.mrb[18].mxu0 %vm794_vm6, %v8016_v32  ;;  %v2330_v34 = vsel %vm794_vm6, %v6817_v54, 0.0  ;;  %v2674_v2 = vpop.permute.xlu0 %2673 }
 0x679   : > { %6445 = vmatpush3.msra.mxu0 %v7961_v57  ;;  %v2500_v61 = vsel %vm794_vm6, %v6819_v58, 0.0  ;;  %2331 = vadd.xlane.f32.xlu0 %v2330_v34  ;;  %6828 = vpow2.f32 %v3348_v63  ;;  %v3014_v6 = vpop.permute.xlu1 %3013 }
 0x67a   : > { %2501 = vadd.xlane.f32.xlu1 %v2500_v61  ;;  %6446 = vmatprep.mubr.msk.f32.mxu0 %vm7227_vm3, %v7226_v12 }
 0x67b   : > { %v6821_v62 = vpop.eup %6820  ;;  %6454 = vmatprep.subr.mxu0 %v7226_v12 }
 0x67c   : > { %6447 = vmatmul.mubr.msk.f32.vlgmr.msra.gmra.mrb[20].mxu0 %vm794_vm6, %v6817_v54  ;;  %v2670_v37 = vsel %vm794_vm6, %v6821_v62, 0.0  ;;  %v6823_v57 = vpop.eup %6822 }
 0x67d   : > { %6455 = vmatpush3.msra.mxu0 %v7982_v31  ;;  %1823 = vadd.xlane.f32.xlu0 %v1822_v24  ;;  %v2840_v4 = vsel %vm794_vm6, %v6823_v57, 0.0  ;;  %v3184_v15 = vpop.permute.xlu1 %3183 }
 0x67e   : > { %2671 = vadd.xlane.f32.xlu1 %v2670_v37  ;;  %6456 = vmatprep.mubr.msk.f32.mxu0 %vm7227_vm3, %v7226_v12 }
 0x67f   : > { %6464 = vmatprep.subr.mxu0 %v7226_v12  ;;  %v6825_v5 = vpop.eup %6824 }
 0x680   : > { %6457 = vmatmul.mubr.msk.f32.vlgmr.msra.gmra.mrb[22].mxu0 %vm794_vm6, %v6819_v58  ;;  %v3010_v8 = vsel %vm794_vm6, %v6825_v5, 0.0  ;;  %v6827_v10 = vpop.eup %6826 }
 0x681   : > { %6465 = vmatpush3.msra.mxu0 %v2674_v2  ;;  %1994 = vadd.xlane.f32.xlu0 %v1993_v3  ;;  %v3180_v13 = vsel %vm794_vm6, %v6827_v10, 0.0  ;;  %v3354_v18 = vpop.permute.xlu1 %3353 }
 0x682   : > { %2841 = vadd.xlane.f32.xlu1 %v2840_v4  ;;  %6466 = vmatprep.mubr.msk.f32.mxu0 %vm7227_vm3, %v7226_v12 }
 0x683   : > { %6474 = vmatprep.subr.mxu0 %v7226_v12  ;;  %v6829_v56 = vpop.eup %6828 }
 0x684   : > { %6467 = vmatmul.mubr.msk.f32.vlgmr.msra.gmra.mrb[24].mxu0 %vm794_vm6, %v6821_v62  ;;  %v3350_v17 = vsel %vm794_vm6, %v6829_v56, 0.0 }
 0x685   : > { %6475 = vmatpush3.msra.mxu0 %v2844_v0  ;;  %802 = vadd.xlane.f32.xlu0 %v801_v7 }
 0x686   : > { %3011 = vadd.xlane.f32.xlu1 %v3010_v8  ;;  %6476 = vmatprep.mubr.msk.f32.mxu0 %vm7227_vm3, %v7226_v12 }
 0x687   : > { %6484 = vmatprep.subr.mxu0 %v7226_v12 }
 0x688   : > { %6477 = vmatmul.mubr.msk.f32.vlgmr.msra.gmra.mrb[26].mxu0 %vm794_vm6, %v6823_v57 }
 0x689   : > { %6485 = vmatpush3.msra.mxu0 %v3014_v6  ;;  %6486 = vmatprep.mubr.msk.f32.mxu0 %vm7227_vm3, %v7226_v12 }
 0x68a   : > { %3181 = vadd.xlane.f32.xlu1 %v3180_v13  ;;  %6494 = vmatprep.subr.mxu0 %v7226_v12 }
 0x68c   : > { %6487 = vmatmul.mubr.msk.f32.vlgmr.msra.gmra.mrb[28].mxu0 %vm794_vm6, %v6825_v5 }
 0x68d   : > { %6495 = vmatpush3.msra.mxu0 %v3184_v15  ;;  %6496 = vmatprep.mubr.msk.f32.mxu0 %vm7227_vm3, %v7226_v12 }
 0x68e   : > { %3351 = vadd.xlane.f32.xlu1 %v3350_v17  ;;  %6504 = vmatprep.subr.mxu0 %v7226_v12 }
 0x690   : > { %6497 = vmatmul.mubr.msk.f32.vlgmr.msra.gmra.mrb[30].mxu0 %vm794_vm6, %v6827_v10 }
 0x691   : > { %6505 = vmatpush3.msra.mxu0 %v3354_v18  ;;  %6506 = vmatprep.mubr.msk.f32.mxu0 %vm7227_vm3, %v7226_v12 }
 0x692   : > { %2165 = vadd.xlane.f32.xlu1 %v2164_v20 }
 0x694   : > { %6507 = vmatmul.mubr.msk.f32.vlgmr.msra.gmra.mrb[32].mxu0 %vm794_vm6, %v6829_v56 }
 0x6bd   : > { %v969_v25 = vpop.xlane.xlu1 %968 }
 0x6be   : > { %6830 = vrcp.f32 %v969_v25 }
 0x6c1   : > { %v1140_v22 = vpop.xlane.xlu0 %1139 }
 0x6c2   : > { %6832 = vrcp.f32 %v1140_v22 }
 0x6c8   : > { %v6831_v9 = vpop.eup %6830 }
 0x6cc   : > { %v6833_v16 = vpop.eup %6832 }
 0x6f2   : > { %v1311_v27 = vpop.xlane.xlu0 %1310 }
 0x6f6   : > { %v1482_v29 = vpop.xlane.xlu0 %1481 }
 0x6fa   : > { %v1653_v31 = vpop.xlane.xlu0 %1652 }
 0x702   : > { %v1042_v11 = vpop.f32.mrb[4].mxu0 }
 0x703   : > { %v1047_v33 = vmul.f32 %v6831_v9, %v1042_v11  ;;  %v6368_v35 = vpop.f32.mrb[5].mxu0  ;;  %v6669_v11 = vld [vmem:[%s7667_s16 + $0x8] sm:$0xff]  }
 0x705   : > { %1049 = vrot.lane.b32.xlu0 %v1047_v33, %s7251_s19 }
 0x706   : > { %v2332_v14 = vpop.xlane.xlu0 %2331  ;;  %v1213_v19 = vpop.f32.mrb[6].mxu0 }
 0x707   : > { %v1218_v36 = vmul.f32 %v6833_v16, %v1213_v19  ;;  %v6378_v38 = vpop.f32.mrb[7].mxu0  ;;  %v2502_v41 = vpop.xlane.xlu1 %2501 }
 0x709   : > { %1220 = vrot.lane.b32.xlu1 %v1218_v36, %s7252_s9 }
 0x70a   : > { %v1824_v39 = vpop.xlane.xlu0 %1823 }
 0x70b   : > { %v2672_v44 = vpop.xlane.xlu1 %2671 }
 0x70e   : > { %v1995_v40 = vpop.xlane.xlu0 %1994 }
 0x70f   : > { %v2842_v45 = vpop.xlane.xlu1 %2841 }
 0x712   : > { %v803_v21 = vpop.xlane.xlu0 %802 }
 0x713   : > { %6834 = vrcp.f32 %v803_v21  ;;  %v3012_v46 = vpop.xlane.xlu1 %3011 }
 0x714   : > { %6836 = vrcp.f32 %v1311_v27 }
 0x715   : > { %6838 = vrcp.f32 %v1482_v29  ;;  %v6668_v29 = vld [vmem:[%s7667_s16] sm:$0xff]  }
 0x716   : > { %6840 = vrcp.f32 %v1653_v31  ;;  %6510 = vmatpush3.bf16.msra.mxu1 %v6668_v29  ;;  %v3571_v29 = vld [vmem:[%s7669_s14 + $0x88] sm:$0xff] }
 0x717   : > { %v3182_v23 = vpop.xlane.xlu1 %3181  ;;  %6842 = vrcp.f32 %v1824_v39  ;;  %6511 = vmatprep.subr.bf16.mxu1 %v7226_v12 }
 0x718   : > { %6844 = vrcp.f32 %v1995_v40 }
 0x71a   : > { %6512 = vmatpush3.bf16.msra.mxu1 %v6669_v11 }
 0x71b   : > { %v3352_v48 = vpop.xlane.xlu1 %3351 }
 0x71d   : > { %v6835_v42 = vpop.eup %6834 }
 0x71e   : > { %v881_v43 = vmul.f32 %v6835_v42, %v7881_v1  ;;  %v6837_v26 = vpop.eup %6836 }
 0x71f   : > { %v6839_v28 = vpop.eup %6838  ;;  %v2166_v52 = vpop.xlane.xlu1 %2165 }
 0x720   : > { %882 = vst.msk [vmem:[#allocation3] sm:$0xff] %vm718_vm5, %v881_v43  ;;  %v6841_v53 = vpop.eup %6840  ;;  %6846 = vrcp.f32 %v2166_v52  ;;  %v5901_v52 = vld [vmem:[%s7673_s26 + $0x1] ss:$0 sm:$0xff] }
 0x721   : > { %v6843_v58 = vpop.eup %6842  ;;  %6848 = vrcp.f32 %v2332_v14 }
 0x722   : > { %v6845_v61 = vpop.eup %6844  ;;  %6850 = vrcp.f32 %v2502_v41 }
 0x723   : > { %6852 = vrcp.f32 %v2672_v44 }
 0x724   : > { %6854 = vrcp.f32 %v2842_v45 }
 0x725   : > { %6856 = vrcp.f32 %v3012_v46 }
 0x726   : > { %6858 = vrcp.f32 %v3182_v23 }
 0x727   : > { %6860 = vrcp.f32 %v3352_v48 }
 0x72a   : > { %v6847_v24 = vpop.eup %6846 }
 0x72b   : > { %v6849_v3 = vpop.eup %6848 }
 0x72c   : > { %v6851_v7 = vpop.eup %6850 }
 0x72d   : > { %v6853_v56 = vpop.eup %6852 }
 0x72e   : > { %v6855_v20 = vpop.eup %6854 }
 0x72f   : > { %v6857_v9 = vpop.eup %6856 }
 0x730   : > { %v6859_v16 = vpop.eup %6858 }
 0x731   : > { %v6861_v38 = vpop.eup %6860 }
 0x737   : > { %v1384_v47 = vpop.f32.mrb[8].mxu0 }
 0x738   : > { %v1389_v49 = vmul.f32 %v6837_v26, %v1384_v47  ;;  %v6388_v50 = vpop.f32.mrb[9].mxu0 }
 0x73a   : > { %1391 = vrot.lane.b32.xlu0 %v1389_v49, %s7253_s5 }
 0x73b   : > { %v1555_v1 = vpop.f32.mrb[10].mxu0 }
 0x73c   : > { %v1560_v51 = vmul.f32 %v6839_v28, %v1555_v1  ;;  %v6398_v30 = vpop.f32.mrb[11].mxu0 }
 0x73e   : > { %1562 = vrot.lane.b32.xlu0 %v1560_v51, %s7254_s28 }
 0x73f   : > { %v1726_v55 = vpop.f32.mrb[12].mxu0 }
 0x740   : > { %v1731_v32 = vmul.f32 %v6841_v53, %v1726_v55  ;;  %v6408_v54 = vpop.f32.mrb[13].mxu0 }
 0x742   : > { %1733 = vrot.lane.b32.xlu0 %v1731_v32, %s7255_s0 }
 0x743   : > { %v1897_v59 = vpop.f32.mrb[14].mxu0 }
 0x744   : > { %v1902_v60 = vmul.f32 %v6843_v58, %v1897_v59  ;;  %v6418_v34 = vpop.f32.mrb[15].mxu0 }
 0x746   : > { %1904 = vrot.lane.b32.xlu0 %v1902_v60, %s7256_s21  ;;  %v6870_v60 = vld [vmem:[#allocation2] sm:$0xff] }
 0x747   : > { %v2068_v62 = vpop.f32.mrb[16].mxu0 }
 0x748   : > { %v2073_v63 = vmul.f32 %v6845_v61, %v2068_v62  ;;  %v6428_v37 = vpop.f32.mrb[17].mxu0  ;;  %v6871_v61 = vld [vmem:[#allocation2 + $0x8] sm:$0xff] }
 0x74a   : > { %2075 = vrot.lane.b32.xlu0 %v2073_v63, %s7257_s17 }
 0x74b   : > { %v2239_v57 = vpop.f32.mrb[18].mxu0 }
 0x74c   : > { %v2244_v0 = vmul.f32 %v6847_v24, %v2239_v57  ;;  %v6438_v2 = vpop.f32.mrb[19].mxu0 }
 0x74e   : > { %2245 = vst.msk [vmem:[#allocation3 + $0x8] sm:$0xff] %vm718_vm5, %v2244_v0 }
 0x74f   : > { %v2405_v4 = vpop.f32.mrb[20].mxu0 }
 0x750   : > { %v2410_v5 = vmul.f32 %v6849_v3, %v2405_v4  ;;  %v6448_v6 = vpop.f32.mrb[21].mxu0 }
 0x752   : > { %2412 = vrot.lane.b32.xlu1 %v2410_v5, %s7251_s19 }
 0x753   : > { %v2575_v8 = vpop.f32.mrb[22].mxu0 }
 0x754   : > { %v2580_v10 = vmul.f32 %v6851_v7, %v2575_v8  ;;  %v6458_v13 = vpop.f32.mrb[23].mxu0 }
 0x755   : > { %v3562_v13 = vld [vmem:[%s7669_s14 + $0x40] sm:$0xff] }
 0x756   : > { %2582 = vrot.lane.b32.xlu1 %v2580_v10, %s7252_s9  ;;  %v3554_v10 = vld [vmem:[%s7669_s14] sm:$0xff] }
 0x757   : > { %v2745_v15 = vpop.f32.mrb[24].mxu0 }
 0x758   : > { %v2750_v17 = vmul.f32 %v6853_v56, %v2745_v15  ;;  %v6468_v18 = vpop.f32.mrb[25].mxu0  ;;  %v3555_v56 = vld [vmem:[%s7669_s14 + $0x8] sm:$0xff]  ;;  %v5908_v15 = vcombine.high %v3554_v10, %v3562_v13 }
 0x759   : > { %v5907_v18 = vcombine.low %v3554_v10, %v3562_v13  ;;  %v3560_v10 = vld [vmem:[%s7669_s14 + $0x30] sm:$0xff] }
 0x75a   : > { %2752 = vrot.lane.b32.xlu1 %v2750_v17, %s7253_s5  ;;  %v3563_v17 = vld [vmem:[%s7669_s14 + $0x48] sm:$0xff]  ;;  %3833 = vmatprep.subr.bf16.mxu0 %v5908_v15  ;;  %v3568_v13 = vld [vmem:[%s7669_s14 + $0x70] sm:$0xff]  ;;  %v3569_v15 = vld [vmem:[%s7669_s14 + $0x78] sm:$0xff] }
 0x75b   : > { %v2915_v22 = vpop.f32.mrb[26].mxu0  ;;  %3834 = vmatpush1.bf16.msra.mxu0 %v5907_v18 }
 0x75c   : > { %v2920_v25 = vmul.f32 %v6855_v20, %v2915_v22  ;;  %v6478_v27 = vpop.f32.mrb[27].mxu0  ;;  %v5909_v20 = vcombine.low %v3555_v56, %v3563_v17  ;;  %v5910_v22 = vcombine.high %v3555_v56, %v3563_v17  ;;  %v3561_v56 = vld [vmem:[%s7669_s14 + $0x38] sm:$0xff] }
 0x75d   : > { %v3578_v27 = vld [vmem:[%s7669_s14 + $0xc0] sm:$0xff] }
 0x75e   : > { %2922 = vrot.lane.b32.xlu1 %v2920_v25, %s7254_s28  ;;  %3876 = vmatprep.subr.bf16.mxu1 %v5910_v22  ;;  %v3570_v25 = vld [vmem:[%s7669_s14 + $0x80] sm:$0xff]  ;;  %v5922_v22 = vcombine.high %v3561_v56, %v3569_v15 }
 0x75f   : > { %v3085_v31 = vpop.f32.mrb[28].mxu0  ;;  %v5923_v11 = vcombine.low %v3570_v25, %v3578_v27 }
 0x760   : > { %v3090_v33 = vmul.f32 %v6857_v9, %v3085_v31  ;;  %v6488_v35 = vpop.f32.mrb[29].mxu0  ;;  %v5924_v9 = vcombine.high %v3570_v25, %v3578_v27  ;;  %v3579_v31 = vld [vmem:[%s7669_s14 + $0xc8] sm:$0xff]  ;;  %v3576_v25 = vld [vmem:[%s7669_s14 + $0xb0] sm:$0xff] }
 0x761   : > { %v5926_v35 = vcombine.high %v3571_v29, %v3579_v31  ;;  %v3584_v27 = vld [vmem:[%s7669_s14 + $0xf0] sm:$0xff] }
 0x762   : > { %3092 = vrot.lane.b32.xlu1 %v3090_v33, %s7255_s0  ;;  %v5925_v33 = vcombine.low %v3571_v29, %v3579_v31  ;;  %3835 = vmatprep.subr.bf16.mxu0 %v5924_v9  ;;  %v3577_v29 = vld [vmem:[%s7669_s14 + $0xb8] sm:$0xff]  ;;  %v5919_v31 = vcombine.low %v3560_v10, %v3568_v13 }
 0x763   : > { %v3255_v14 = vpop.f32.mrb[30].mxu0  ;;  %3836 = vmatpush1.bf16.msra.mxu0 %v5923_v11  ;;  %v3585_v9 = vld [vmem:[%s7669_s14 + $0xf8] sm:$0xff]  ;;  %v5921_v11 = vcombine.low %v3561_v56, %v3569_v15 }
 0x764   : > { %v3260_v19 = vmul.f32 %v6859_v16, %v3255_v14  ;;  %v6498_v36 = vpop.f32.mrb[31].mxu0  ;;  %v3556_v16 = vld [vmem:[%s7669_s14 + $0x10] sm:$0xff] }
 0x765   : > { %v3564_v14 = vld [vmem:[%s7669_s14 + $0x50] sm:$0xff]  ;;  %v7258_v36 = vmov 0  }
 0x766   : > { %3262 = vrot.lane.b32.xlu1 %v3260_v19, %s7256_s21  ;;  %v3557_v19 = vld [vmem:[%s7669_s14 + $0x18] sm:$0xff]  ;;  %3865 = vmatprep.mubr.bf16.mxu0 %v7258_v36 }
 0x767   : > { %v3425_v39 = vpop.f32.mrb[32].mxu0 }
 0x768   : > { %v3430_v40 = vmul.f32 %v6861_v38, %v3425_v39  ;;  %v6508_v21 = vpop.f32.mrb[33].mxu0  ;;  %v5912_v38 = vcombine.high %v3556_v16, %v3564_v14  ;;  %v3565_v39 = vld [vmem:[%s7669_s14 + $0x58] sm:$0xff] }
 0x769   : > { %v5913_v21 = vcombine.low %v3557_v19, %v3565_v39 }
 0x76a   : > { %3432 = vrot.lane.b32.xlu1 %v3430_v40, %s7257_s17  ;;  %v5911_v40 = vcombine.low %v3556_v16, %v3564_v14  ;;  %3919 = vmatprep.subr.bf16.mxu0 %v5912_v38  ;;  %v5935_v16 = vcombine.low %v3576_v25, %v3584_v27  ;;  %v5937_v14 = vcombine.low %v3577_v29, %v3585_v9  ;;  %v6671_v38 = vld [vmem:[%s7671_s23 + $0xc0] sm:$0xff]  }
 0x777   : > { %v1050_v41 = vpop.permute.xlu0 %1049 }
 0x778   : > { %1053 = vst.msk [vmem:[#allocation3] sm:$0xff] %vm1052_vm7, %v1050_v41  ;;  %v5914_v41 = vcombine.high %v3557_v19, %v3565_v39  ;;  %v6670_v19 = vld [vmem:[%s7671_s23 + $0x40] sm:$0xff]  }
 0x779   : > { %v6672_v39 = vld [vmem:[%s7671_s23] sm:$0xff]  }
 0x77b   : > { %v1221_v12 = vpop.permute.xlu1 %1220 }
 0x77c   : > { %1224 = vst.msk [vmem:[#allocation3] sm:$0xff] %vm1223_vm8, %v1221_v12 }
 0x7ac   : > { %v1392_v42 = vpop.permute.xlu0 %1391 }
 0x7ad   : > { %1395 = vst.msk [vmem:[#allocation3] sm:$0xff] %vm1394_vm9, %v1392_v42 }
 0x7b0   : > { %v1563_v43 = vpop.permute.xlu0 %1562 }
 0x7b1   : > { %1566 = vst.msk [vmem:[#allocation3] sm:$0xff] %vm1565_vm10, %v1563_v43 }
 0x7b4   : > { %v1734_v44 = vpop.permute.xlu0 %1733 }
 0x7b5   : > { %1737 = vst.msk [vmem:[#allocation3] sm:$0xff] %vm1736_vm11, %v1734_v44 }
 0x7b8   : > { %v1905_v45 = vpop.permute.xlu0 %1904 }
 0x7b9   : > { %1908 = vst.msk [vmem:[#allocation3] sm:$0xff] %vm1907_vm12, %v1905_v45 }
 0x7bc   : > { %v2076_v46 = vpop.permute.xlu0 %2075 }
 0x7bd   : > { %2079 = vst.msk [vmem:[#allocation3] sm:$0xff] %vm2078_vm13, %v2076_v46 }
 0x7c4   : > { %v2413_v23 = vpop.permute.xlu1 %2412  ;;  %v3436_v1 = vld [vmem:[#allocation3] sm:$0xff] }
 0x7c5   : > { %2415 = vst.msk [vmem:[#allocation3 + $0x8] sm:$0xff] %vm1052_vm7, %v2413_v23 }
 0x7c8   : > { %v2583_v26 = vpop.permute.xlu1 %2582 }
 0x7c9   : > { %2585 = vst.msk [vmem:[#allocation3 + $0x8] sm:$0xff] %vm1223_vm8, %v2583_v26 }
 0x7cc   : > { %v2753_v47 = vpop.permute.xlu1 %2752 }
 0x7cd   : > { %2755 = vst.msk [vmem:[#allocation3 + $0x8] sm:$0xff] %vm1394_vm9, %v2753_v47  ;;  %v5905_v47 = vld [vmem:[%s7673_s26 + $0x2] ss:$0 sm:$0xff] }
 0x7d0   : > { %v2923_v48 = vpop.permute.xlu1 %2922 }
 0x7d1   : > { %2925 = vst.msk [vmem:[#allocation3 + $0x8] sm:$0xff] %vm1565_vm10, %v2923_v48 }
 0x7d4   : > { %v3093_v49 = vpop.permute.xlu1 %3092 }
 0x7d5   : > { %3095 = vst.msk [vmem:[#allocation3 + $0x8] sm:$0xff] %vm1736_vm11, %v3093_v49 }
 0x7d8   : > { %v3263_v50 = vpop.permute.xlu1 %3262 }
 0x7d9   : > { %3265 = vst.msk [vmem:[#allocation3 + $0x8] sm:$0xff] %vm1907_vm12, %v3263_v50 }
 0x7dc   : > { %v3433_v28 = vpop.permute.xlu1 %3432 }
 0x7dd   : > { %3435 = vst.msk [vmem:[#allocation3 + $0x8] sm:$0xff] %vm2078_vm13, %v3433_v28  ;;  %v5906_v28 = vld [vmem:[%s7673_s26 + $0x3] ss:$0 sm:$0xff] }
 0x7e4   : > { %v3437_v51 = vld [vmem:[#allocation3 + $0x8] sm:$0xff] }
 0x7e5   : > { %v3438_v30 = vpack.c.bf16 %v3437_v51, %v3436_v1  ;;  %v3572_v51 = vld [vmem:[%s7669_s14 + $0x90] sm:$0xff] }
 0x7e7   : > { %6514 = vmatmul.mubr.msk.bf16.vlgmr.msra.gmra.mrb[36].mxu1 %vm668_vm4, %v3438_v30  ;;  %v3580_v30 = vld [vmem:[%s7669_s14 + $0xd0] sm:$0xff] }
 0x7e8   : > { %3877 = vmatpush1.bf16.msra.mxu1 %v5909_v20  ;;  %3908 = vmatprep.mubr.bf16.mxu1 %v7258_v36  ;;  %v5920_v20 = vcombine.high %v3560_v10, %v3568_v13 }
 0x7e9   : > { %3878 = vmatprep.subr.bf16.mxu1 %v5926_v35  ;;  %v5938_v35 = vcombine.high %v3577_v29, %v3585_v9 }
 0x7ec   : > { %3879 = vmatpush1.bf16.msra.mxu1 %v5925_v33  ;;  %v5936_v33 = vcombine.high %v3576_v25, %v3584_v27 }
 0x7ed   : > { %3962 = vmatprep.subr.bf16.mxu1 %v5914_v41  ;;  %v6675_v41 = vld [vmem:[%s7671_s23 + $0xc8] sm:$0xff]  }
 0x8ba   : > { %v3499_v53 = vpop.f32.mrb[36].mxu1 }
 0x8bb   : > { %v3500_v55 = vadd.f32 %v5901_v52, %v3499_v53  ;;  %v6515_v32 = vpop.f32.mrb[37].mxu1  ;;  %v3581_v53 = vld [vmem:[%s7669_s14 + $0xd8] sm:$0xff] }
 0x8bc   : > { %v3502_v54 = vpop.f32.mrb[38].mxu1 }
 0x8bd   : > { %v3503_v58 = vadd.f32 %v5901_v52, %v3502_v54  ;;  %v6516_v59 = vpop.f32.mrb[39].mxu1  ;;  %v3506_v34 = vadd.f32 %v6870_v60, %v3500_v55  ;;  %v3573_v52 = vld [vmem:[%s7669_s14 + $0x98] sm:$0xff]  ;;  %v3558_v60 = vld [vmem:[%s7669_s14 + $0x20] sm:$0xff] }
 0x8be   : > { %v5930_v59 = vcombine.high %v3573_v52, %v3581_v53 }
 0x8bf   : > { %v3507_v62 = vadd.f32 %v6871_v61, %v3503_v58  ;;  %v3508_v63 = vsel %vm668_vm4, %v3506_v34, 0.0  ;;  %v5928_v58 = vcombine.high %v3572_v51, %v3580_v30  ;;  %v3559_v61 = vld [vmem:[%s7669_s14 + $0x28] sm:$0xff] }
 0x8c0   : > { %3509 = vadd.xlane.f32.xlu0 %v3508_v63  ;;  %v5927_v63 = vcombine.low %v3572_v51, %v3580_v30  ;;  %v6691_v51 = vld [vmem:[%s7671_s23 + $0xe8] sm:$0xff]  }
 0x8c1   : > { %v3511_v37 = vsel %vm668_vm4, %v3507_v62, 0.0  ;;  %v6692_v30 = vld [vmem:[%s7671_s23 + $0x28] sm:$0xff]  }
 0x8c2   : > { %3512 = vadd.xlane.f32.xlu1 %v3511_v37  ;;  %v5929_v37 = vcombine.low %v3573_v52, %v3581_v53  ;;  %v6693_v52 = vld [vmem:[%s7671_s23 + $0xa8] sm:$0xff]   ;;  %v6694_v53 = vld [vmem:[%s7671_s23 + $0x70] sm:$0xff]  }
 0x94d   : > { %v3510_v24 = vpop.xlane.xlu0 %3509 }
 0x94e   : > { %v3515_v57 = vmul.f32 0.03125, %v3510_v24 }
 0x94f   : > { %v3513_v0 = vpop.xlane.xlu1 %3512 }
 0x950   : > { %v3517_v2 = vsub.f32 %v3506_v34, %v3515_v57  ;;  %v3516_v3 = vmul.f32 0.03125, %v3513_v0  ;;  %v3566_v34 = vld [vmem:[%s7669_s14 + $0x60] sm:$0xff] }
 0x951   : > { %v5916_v24 = vcombine.high %v3558_v60, %v3566_v34  ;;  %v3574_v0 = vld [vmem:[%s7669_s14 + $0xa0] sm:$0xff] }
 0x952   : > { %v3518_v4 = vsub.f32 %v3507_v62, %v3516_v3  ;;  %v3519_v5 = vmul.f32 %v3517_v2, %v3517_v2  ;;  %v3567_v62 = vld [vmem:[%s7669_s14 + $0x68] sm:$0xff] }
 0x953   : > { %v5918_v57 = vcombine.high %v3559_v61, %v3567_v62  ;;  %v3575_v3 = vld [vmem:[%s7669_s14 + $0xa8] sm:$0xff] }
 0x954   : > { %v3521_v6 = vsel %vm668_vm4, %v3519_v5, 0.0  ;;  %v3520_v7 = vmul.f32 %v3518_v4, %v3518_v4  ;;  %v5915_v5 = vcombine.low %v3558_v60, %v3566_v34  ;;  %v6698_v60 = vld [vmem:[%s7671_s23 + $0x78] sm:$0xff]  }
 0x955   : > { %3522 = vadd.xlane.f32.xlu0 %v3521_v6  ;;  %v5917_v6 = vcombine.low %v3559_v61, %v3567_v62  ;;  %v6699_v34 = vld [vmem:[%s7671_s23 + $0xf8] sm:$0xff]  }
 0x956   : > { %v3524_v8 = vsel %vm668_vm4, %v3520_v7, 0.0  ;;  %v6700_v61 = vld [vmem:[%s7671_s23 + $0x38] sm:$0xff]  }
 0x957   : > { %v6701_v62 = vld [vmem:[%s7671_s23 + $0xb8] sm:$0xff]  }
 0x959   : > { %3525 = vadd.xlane.f32.xlu0 %v3524_v8 }
 0x9e2   : > { %v3523_v12 = vpop.xlane.xlu0 %3522 }
 0x9e3   : > { %v3527_v42 = vmul.f32 0.03125, %v3523_v12  ;;  %v6677_v12 = vld [vmem:[%s7671_s23 + $0x88] sm:$0xff]  }
 0x9e5   : > { %v3529_v43 = vadd.f32 1e-05, %v3527_v42  ;;  %v6678_v42 = vld [vmem:[%s7671_s23 + $0x50] sm:$0xff]  }
 0x9e6   : > { %v3526_v44 = vpop.xlane.xlu0 %3525 }
 0x9e7   : > { %6862 = vrsqrt.f32 %v3529_v43  ;;  %v3528_v45 = vmul.f32 0.03125, %v3526_v44  ;;  %v6679_v43 = vld [vmem:[%s7671_s23 + $0xd0] sm:$0xff]  }
 0x9e8   : > { %v6680_v44 = vld [vmem:[%s7671_s23 + $0x10] sm:$0xff]  }
 0x9e9   : > { %v3530_v46 = vadd.f32 1e-05, %v3528_v45  ;;  %v6681_v45 = vld [vmem:[%s7671_s23 + $0x90] sm:$0xff]  }
 0x9eb   : > { %6864 = vrsqrt.f32 %v3530_v46  ;;  %v6682_v46 = vld [vmem:[%s7671_s23 + $0x58] sm:$0xff]  }
 0x9f1   : > { %v6863_v23 = vpop.eup %6862 }
 0x9f2   : > { %v3533_v26 = vmul.f32 %v6863_v23, %v3517_v2  ;;  %v3582_v2 = vld [vmem:[%s7669_s14 + $0xe0] sm:$0xff]  ;;  %v6683_v23 = vld [vmem:[%s7671_s23 + $0xd8] sm:$0xff]  }
 0x9f3   : > { %v5932_v7 = vcombine.high %v3574_v0, %v3582_v2  ;;  %v5931_v17 = vcombine.low %v3574_v0, %v3582_v2  ;;  %v8208_v2 = vld [vmem:[%s7673_s26 + $0xc] sm:$0xff] }
 0x9f4   : > { %v3542_v49 = vmul.f32 %v5905_v47, %v3533_v26  ;;  %v6684_v26 = vld [vmem:[%s7671_s23 + $0x18] sm:$0xff]  }
 0x9f5   : > { %v6865_v48 = vpop.eup %6864 }
 0x9f6   : > { %v3534_v50 = vmul.f32 %v6865_v48, %v3518_v4  ;;  %v8124_v55 = vadd.f32 %v5906_v28, %v3542_v49  ;;  %v3583_v4 = vld [vmem:[%s7669_s14 + $0xe8] sm:$0xff]  ;;  %v6686_v48 = vld [vmem:[%s7671_s23 + $0x60] sm:$0xff]  }
 0x9f7   : > { %v5934_v8 = vcombine.high %v3575_v3, %v3583_v4  ;;  %v5933_v18 = vcombine.low %v3575_v3, %v3583_v4  ;;  %v6687_v49 = vld [vmem:[%s7671_s23 + $0xe0] sm:$0xff]  }
 0x9f8   : > { %v3543_v1 = vmul.f32 %v5905_v47, %v3534_v50  ;;  %v6685_v47 = vld [vmem:[%s7671_s23 + $0x98] sm:$0xff]   ;;  %v6688_v50 = vld [vmem:[%s7671_s23 + $0x20] sm:$0xff]  }
 0x9fa   : > { %v8126_v32 = vadd.f32 %v5906_v28, %v3543_v1  ;;  %v6689_v28 = vld [vmem:[%s7671_s23 + $0xa0] sm:$0xff]   ;;  %v6690_v1 = vld [vmem:[%s7671_s23 + $0x68] sm:$0xff]  }
 0x9fc   : > { %v8130_v54 = vpack.c.bf16 %v8126_v32, %v8124_v55 }
 0x9fe   : > { %5939 = vmatmul.mubr.msk.bf16.vlgmr.msra.gmra.mrb[36].mxu0 %vm668_vm4, %v8130_v54  ;;  %5940 = vmatmul.mubr.msk.bf16.vlgmr.msra.gmra.mrb[40].mxu1 %vm668_vm4, %v8130_v54 }
 0x9ff   : > { %3920 = vmatpush1.bf16.msra.mxu0 %v5911_v40  ;;  %3963 = vmatpush1.bf16.msra.mxu1 %v5913_v21  ;;  %v6673_v40 = vld [vmem:[%s7671_s23 + $0x80] sm:$0xff]   ;;  %v6674_v21 = vld [vmem:[%s7671_s23 + $0x48] sm:$0xff]  }
 0xa00   : > { %3921 = vmatprep.subr.bf16.mxu0 %v5928_v58  ;;  %3964 = vmatprep.subr.bf16.mxu1 %v5930_v59  ;;  %v6696_v58 = vld [vmem:[%s7671_s23 + $0x30] sm:$0xff]  }
 0xa01   : > { %3951 = vmatprep.mubr.bf16.mxu0 %v7258_v36  ;;  %3994 = vmatprep.mubr.bf16.mxu1 %v7258_v36  ;;  %v6697_v59 = vld [vmem:[%s7671_s23 + $0xb0] sm:$0xff]  }
 0xa03   : > { %3922 = vmatpush1.bf16.msra.mxu0 %v5927_v63  ;;  %3965 = vmatpush1.bf16.msra.mxu1 %v5929_v37  ;;  %v6702_v63 = vld [vmem:[%s7671_s23 + $0x140] sm:$0xff]  }
 0xa04   : > { %4005 = vmatprep.subr.bf16.mxu0 %v5916_v24  ;;  %4048 = vmatprep.subr.bf16.mxu1 %v5918_v57  ;;  %v6703_v37 = vld [vmem:[%s7671_s23 + $0x1c0] sm:$0xff]   ;;  %v3590_v24 = vlaneseq }
 0xa06   : > { %5941 = vmatmul.mubr.msk.bf16.vlgmr.msra.gmra.mrb[40].mxu0 %vm668_vm4, %v8130_v54  ;;  %5942 = vmatmul.mubr.msk.bf16.vlgmr.msra.gmra.mrb[44].mxu1 %vm668_vm4, %v8130_v54  ;;  %v8204_v57 = vshrl.u32 %v3590_v24, 7 }
 0xa07   : > { %4006 = vmatpush1.bf16.msra.mxu0 %v5915_v5  ;;  %4049 = vmatpush1.bf16.msra.mxu1 %v5917_v6  ;;  %v3586_v6 = vld [vmem:[%s7673_s26 + $0x4] sm:$0xff] }
 0xa08   : > { %4007 = vmatprep.subr.bf16.mxu0 %v5932_v7  ;;  %4050 = vmatprep.subr.bf16.mxu1 %v5934_v8  ;;  %v3616_v0 = vsub.s32 6, %v8204_v57  ;;  %v3592_v4 = vsub.s32 0, %v8204_v57  ;;  %v3600_v5 = vsub.s32 2, %v8204_v57  ;;  %v3596_v7 = vsub.s32 1, %v8204_v57 }
 0xa09   : > { %4037 = vmatprep.mubr.bf16.mxu0 %v7258_v36  ;;  %4080 = vmatprep.mubr.bf16.mxu1 %v7258_v36  ;;  %v3604_v8 = vsub.s32 3, %v8204_v57  ;;  %v3620_v25 = vsub.s32 7, %v8204_v57 }
 0xa0a   : > { %v8211_v3 = vrot.slane %v8208_v2, %v3616_v0  ;;  %v3593_v10 = vrot.slane %v3586_v6, %v3592_v4  ;;  %v3601_v13 = vrot.slane %v3586_v6, %v3600_v5  ;;  %v3597_v56 = vrot.slane %v3586_v6, %v3596_v7 }
 0xa0b   : > { %4008 = vmatpush1.bf16.msra.mxu0 %v5931_v17  ;;  %4051 = vmatpush1.bf16.msra.mxu1 %v5933_v18  ;;  %v3605_v15 = vrot.slane %v3586_v6, %v3604_v8  ;;  %v3608_v17 = vsub.s32 4, %v8204_v57 }
 0xa0c   : > { %4091 = vmatprep.subr.bf16.mxu0 %v5920_v20  ;;  %4134 = vmatprep.subr.bf16.mxu1 %v5922_v22  ;;  %v3612_v22 = vsub.s32 5, %v8204_v57 }
 0xa0e   : > { %5943 = vmatmul.mubr.msk.bf16.vlgmr.msra.gmra.mrb[44].mxu0 %vm668_vm4, %v8130_v54  ;;  %5944 = vmatmul.mubr.msk.bf16.vlgmr.msra.gmra.mrb[48].mxu1 %vm668_vm4, %v8130_v54 }
 0xa0f   : > { %4092 = vmatpush1.bf16.msra.mxu0 %v5919_v31  ;;  %4135 = vmatpush1.bf16.msra.mxu1 %v5921_v11 }
 0xa10   : > { %4093 = vmatprep.subr.bf16.mxu0 %v5936_v33  ;;  %4136 = vmatprep.subr.bf16.mxu1 %v5938_v35 }
 0xa11   : > { %4123 = vmatprep.mubr.bf16.mxu0 %v7258_v36  ;;  %4166 = vmatprep.mubr.bf16.mxu1 %v7258_v36  ;;  %v6676_v36 = vld [vmem:[%s7671_s23 + $0x8] sm:$0xff]  }
 0xa13   : > { %4094 = vmatpush1.bf16.msra.mxu0 %v5935_v16  ;;  %4137 = vmatpush1.bf16.msra.mxu1 %v5937_v14 }
 0xa14   : > { %6160 = vmatprep.subr.bf16.mxu0 %v6670_v19  ;;  %6182 = vmatprep.subr.bf16.mxu1 %v6671_v38 }
 0xa16   : > { %5945 = vmatmul.mubr.msk.bf16.vlgmr.msra.gmra.mrb[48].mxu0 %vm668_vm4, %v8130_v54  ;;  %5946 = vmatmul.mubr.msk.bf16.vlgmr.msra.gmra.mrb[52].mxu1 %vm668_vm4, %v8130_v54  ;;  %v6695_v54 = vld [vmem:[%s7671_s23 + $0xf0] sm:$0xff]  }
 0xa17   : > { %6161 = vmatpush3.bf16.msra.mxu0 %v6672_v39  ;;  %6183 = vmatpush3.bf16.msra.mxu1 %v6673_v40  ;;  %v3609_v40 = vrot.slane %v3586_v6, %v3608_v17 }
 0xa18   : > { %6162 = vmatprep.subr.bf16.mxu0 %v6674_v21  ;;  %6184 = vmatprep.subr.bf16.mxu1 %v6675_v41  ;;  %v3617_v21 = vrot.slane %v3586_v6, %v3616_v0 }
 0xa1b   : > { %6163 = vmatpush3.bf16.msra.mxu0 %v6676_v36  ;;  %6185 = vmatpush3.bf16.msra.mxu1 %v6677_v12  ;;  %v3613_v12 = vrot.slane %v3586_v6, %v3612_v22 }
 0xa1c   : > { %6164 = vmatprep.subr.bf16.mxu0 %v6678_v42  ;;  %6186 = vmatprep.subr.bf16.mxu1 %v6679_v43  ;;  %v3621_v42 = vrot.slane %v3586_v6, %v3620_v25  ;;  %v3633_v6 = vrot.slane %v8208_v2, %v3600_v5  ;;  %v3637_v5 = vrot.slane %v8208_v2, %v3604_v8 }
 0xa1f   : > { %6165 = vmatpush3.bf16.msra.mxu0 %v6680_v44  ;;  %6187 = vmatpush3.bf16.msra.mxu1 %v6681_v45 }
 0xa20   : > { %6166 = vmatprep.subr.bf16.mxu0 %v6682_v46  ;;  %6188 = vmatprep.subr.bf16.mxu1 %v6683_v23 }
 0xa23   : > { %6167 = vmatpush3.bf16.msra.mxu0 %v6684_v26  ;;  %6189 = vmatpush3.bf16.msra.mxu1 %v6685_v47 }
 0xa24   : > { %6168 = vmatprep.subr.bf16.mxu0 %v6686_v48  ;;  %6190 = vmatprep.subr.bf16.mxu1 %v6687_v49 }
 0xa27   : > { %6169 = vmatpush3.bf16.msra.mxu0 %v6688_v50  ;;  %6191 = vmatpush3.bf16.msra.mxu1 %v6689_v28 }
 0xa28   : > { %6170 = vmatprep.subr.bf16.mxu0 %v6690_v1  ;;  %6192 = vmatprep.subr.bf16.mxu1 %v6691_v51 }
 0xa2b   : > { %6171 = vmatpush3.bf16.msra.mxu0 %v6692_v30  ;;  %6193 = vmatpush3.bf16.msra.mxu1 %v6693_v52  ;;  %v6704_v52 = vld [vmem:[%s7671_s23 + $0x100] sm:$0xff]  }
 0xa2c   : > { %6172 = vmatprep.subr.bf16.mxu0 %v6694_v53  ;;  %6194 = vmatprep.subr.bf16.mxu1 %v6695_v54  ;;  %v6705_v53 = vld [vmem:[%s7671_s23 + $0x180] sm:$0xff]  }
 0xa2f   : > { %6173 = vmatpush3.bf16.msra.mxu0 %v6696_v58  ;;  %6195 = vmatpush3.bf16.msra.mxu1 %v6697_v59 }
 0xa30   : > { %6174 = vmatprep.subr.bf16.mxu0 %v6698_v60  ;;  %6196 = vmatprep.subr.bf16.mxu1 %v6699_v34  ;;  %v6706_v34 = vld [vmem:[%s7671_s23 + $0x148] sm:$0xff]  }
 0xa33   : > { %6175 = vmatpush3.bf16.msra.mxu0 %v6700_v61  ;;  %6197 = vmatpush3.bf16.msra.mxu1 %v6701_v62  ;;  %v6707_v61 = vld [vmem:[%s7671_s23 + $0x1c8] sm:$0xff]   ;;  %v3625_v62 = vrot.slane %v8208_v2, %v3592_v4  ;;  %v3629_v4 = vrot.slane %v8208_v2, %v3596_v7  ;;  %v6711_v7 = vld [vmem:[%s7671_s23 + $0x1d0] sm:$0xff]  }
 0xa34   : > { %6204 = vmatprep.subr.bf16.mxu0 %v6702_v63  ;;  %6226 = vmatprep.subr.bf16.mxu1 %v6703_v37 }
 0xad1   : > { %v3867_v18 = vpop.f32.mrb[36].mxu0  ;;  %v3910_v20 = vpop.f32.mrb[40].mxu1 }
 0xad2   : > { %v3868_v27 = vadd.f32 %v3867_v18, %v3593_v10  ;;  %v3911_v29 = vadd.f32 %v3910_v20, %v3601_v13  ;;  %v3869_v9 = vpop.f32.mrb[37].mxu0  ;;  %v3912_v31 = vpop.f32.mrb[41].mxu1 }
 0xad3   : > { %v3870_v11 = vadd.f32 %v3869_v9, %v3597_v56  ;;  %v3913_v33 = vadd.f32 %v3912_v31, %v3605_v15  ;;  %v3871_v35 = vpop.f32.mrb[38].mxu0  ;;  %v3914_v16 = vpop.f32.mrb[42].mxu1 }
 0xad4   : > { %v3872_v14 = vadd.f32 %v3871_v35, %v3593_v10  ;;  %v3915_v19 = vadd.f32 %v3914_v16, %v3601_v13  ;;  %v3873_v38 = vpop.f32.mrb[39].mxu0  ;;  %v3916_v39 = vpop.f32.mrb[43].mxu1  ;;  %v4177_v43 = vmax.f32 %v3868_v27, 0.0  ;;  %v4179_v44 = vmax.f32 %v3911_v29, 0.0  ;;  %v6708_v27 = vld [vmem:[%s7671_s23 + $0x108] sm:$0xff]   ;;  %v6710_v35 = vld [vmem:[%s7671_s23 + $0x150] sm:$0xff]  }
 0xad5   : > { %v3874_v41 = vadd.f32 %v3873_v38, %v3597_v56  ;;  %v3917_v36 = vadd.f32 %v3916_v39, %v3605_v15  ;;  %v4178_v23 = vmax.f32 %v3870_v11, 0.0  ;;  %v4180_v26 = vmax.f32 %v3913_v33, 0.0  ;;  %v6709_v29 = vld [vmem:[%s7671_s23 + $0x188] sm:$0xff]  }
 0xad6   : > { %v4193_v45 = vmax.f32 %v3872_v14, 0.0  ;;  %v4195_v46 = vmax.f32 %v3915_v19, 0.0 }
 0xad7   : > { %v4194_v47 = vmax.f32 %v3874_v41, 0.0  ;;  %v4196_v48 = vmax.f32 %v3917_v36, 0.0 }
 0xad8   : > { %v4209_v49 = vpack.c.bf16 %v4193_v45, %v4177_v43  ;;  %v4211_v50 = vpack.c.bf16 %v4195_v46, %v4179_v44 }
 0xad9   : > { %v4210_v28 = vpack.c.bf16 %v4194_v47, %v4178_v23  ;;  %v4212_v1 = vpack.c.bf16 %v4196_v48, %v4180_v26  ;;  %v3953_v51 = vpop.f32.mrb[40].mxu0  ;;  %v3996_v30 = vpop.f32.mrb[44].mxu1  ;;  %v6714_v23 = vld [vmem:[%s7671_s23 + $0x158] sm:$0xff]  }
 0xada   : > { %v3954_v54 = vadd.f32 %v3953_v51, %v3609_v40  ;;  %v3997_v58 = vadd.f32 %v3996_v30, %v3617_v21  ;;  %v3955_v59 = vpop.f32.mrb[41].mxu0  ;;  %v3998_v60 = vpop.f32.mrb[45].mxu1  ;;  %v6715_v26 = vld [vmem:[%s7671_s23 + $0x1d8] sm:$0xff]  }
 0xadb   : > { %v3956_v63 = vadd.f32 %v3955_v59, %v3613_v12  ;;  %v3999_v37 = vadd.f32 %v3998_v60, %v3621_v42  ;;  %v3957_v24 = vpop.f32.mrb[42].mxu0  ;;  %v4000_v0 = vpop.f32.mrb[46].mxu1  ;;  %5288 = vmatprep.mubr.bf16.mxu0 %v4210_v28  ;;  %5329 = vmatprep.mubr.bf16.mxu1 %v4212_v1  ;;  %v6716_v59 = vld [vmem:[%s7671_s23 + $0x118] sm:$0xff]  }
 0xadc   : > { %v3958_v10 = vadd.f32 %v3957_v24, %v3609_v40  ;;  %v4001_v13 = vadd.f32 %v4000_v0, %v3617_v21  ;;  %v3959_v56 = vpop.f32.mrb[43].mxu0  ;;  %v4002_v15 = vpop.f32.mrb[47].mxu1  ;;  %5289 = vmatmul.mubr.bf16.vlgmr.msra.gmra.mrb[52].mxu0 %v4209_v49  ;;  %5330 = vmatmul.mubr.bf16.vlgmr.msra.gmra.mrb[56].mxu1 %v4211_v50  ;;  %v4181_v9 = vmax.f32 %v3954_v54, 0.0  ;;  %v4183_v31 = vmax.f32 %v3997_v58, 0.0  ;;  %v6717_v60 = vld [vmem:[%s7671_s23 + $0x198] sm:$0xff]  }
 0xadd   : > { %v3960_v18 = vadd.f32 %v3959_v56, %v3613_v12  ;;  %v4003_v20 = vadd.f32 %v4002_v15, %v3621_v42  ;;  %6205 = vmatpush3.bf16.msra.mxu0 %v6704_v52  ;;  %6227 = vmatpush3.bf16.msra.mxu1 %v6705_v53  ;;  %v4182_v16 = vmax.f32 %v3956_v63, 0.0  ;;  %v4184_v14 = vmax.f32 %v3999_v37, 0.0  ;;  %v6712_v12 = vld [vmem:[%s7671_s23 + $0x110] sm:$0xff]  }
 0xade   : > { %v4197_v11 = vmax.f32 %v3958_v10, 0.0  ;;  %v4199_v33 = vmax.f32 %v4001_v13, 0.0  ;;  %6206 = vmatprep.subr.bf16.mxu0 %v6706_v34  ;;  %6228 = vmatprep.subr.bf16.mxu1 %v6707_v61  ;;  %v6713_v42 = vld [vmem:[%s7671_s23 + $0x190] sm:$0xff]   ;;  %v3641_v52 = vrot.slane %v8208_v2, %v3608_v17  ;;  %v3645_v53 = vrot.slane %v8208_v2, %v3612_v22  ;;  %v6718_v17 = vld [vmem:[%s7671_s23 + $0x160] sm:$0xff]  }
 0xadf   : > { %v4198_v19 = vmax.f32 %v3960_v18, 0.0  ;;  %v4200_v38 = vmax.f32 %v4003_v20, 0.0  ;;  %v3653_v34 = vrot.slane %v8208_v2, %v3620_v25  ;;  %v6719_v22 = vld [vmem:[%s7671_s23 + $0x1e0] sm:$0xff]  }
 0xae0   : > { %v8247_v39 = vpack.c.bf16 %v4197_v11, %v4181_v9  ;;  %v8249_v40 = vpack.c.bf16 %v4199_v33, %v4183_v31  ;;  %v6721_v18 = vld [vmem:[%s7671_s23 + $0x1a0] sm:$0xff]   ;;  %v6722_v9 = vld [vmem:[%s7671_s23 + $0x168] sm:$0xff]  }
 0xae1   : > { %v4214_v8 = vpack.c.bf16 %v4198_v19, %v4182_v16  ;;  %v4216_v21 = vpack.c.bf16 %v4200_v38, %v4184_v14  ;;  %6207 = vmatpush3.bf16.msra.mxu0 %v6708_v27  ;;  %6229 = vmatpush3.bf16.msra.mxu1 %v6709_v29  ;;  %v4039_v41 = vpop.f32.mrb[44].mxu0  ;;  %v4082_v36 = vpop.f32.mrb[48].mxu1  ;;  %v6723_v31 = vld [vmem:[%s7671_s23 + $0x1e8] sm:$0xff]  }
 0xae2   : > { %v4040_v43 = vadd.f32 %v4039_v41, %v3625_v62  ;;  %v4083_v44 = vadd.f32 %v4082_v36, %v3633_v6  ;;  %v4041_v45 = vpop.f32.mrb[45].mxu0  ;;  %v4084_v46 = vpop.f32.mrb[49].mxu1  ;;  %6208 = vmatprep.subr.bf16.mxu0 %v6710_v35  ;;  %6230 = vmatprep.subr.bf16.mxu1 %v6711_v7  ;;  %v6724_v41 = vld [vmem:[%s7671_s23 + $0x128] sm:$0xff]  }
 0xae3   : > { %v4042_v47 = vadd.f32 %v4041_v45, %v3629_v4  ;;  %v4085_v48 = vadd.f32 %v4084_v46, %v3637_v5  ;;  %v4043_v49 = vpop.f32.mrb[46].mxu0  ;;  %v4086_v50 = vpop.f32.mrb[50].mxu1  ;;  %5370 = vmatprep.mubr.bf16.mxu0 %v4214_v8  ;;  %5411 = vmatprep.mubr.bf16.mxu1 %v4216_v21  ;;  %v6725_v36 = vld [vmem:[%s7671_s23 + $0x1a8] sm:$0xff]   ;;  %v6726_v45 = vld [vmem:[%s7671_s23 + $0x170] sm:$0xff]  }
 0xae4   : > { %v4044_v28 = vadd.f32 %v4043_v49, %v3625_v62  ;;  %v4087_v1 = vadd.f32 %v4086_v50, %v3633_v6  ;;  %v4045_v51 = vpop.f32.mrb[47].mxu0  ;;  %v4088_v30 = vpop.f32.mrb[51].mxu1  ;;  %v4185_v61 = vmax.f32 %v4040_v43, 0.0  ;;  %v4187_v62 = vmax.f32 %v4083_v44, 0.0 }
 0xae5   : > { %v4046_v54 = vadd.f32 %v4045_v51, %v3629_v4  ;;  %v4089_v58 = vadd.f32 %v4088_v30, %v3637_v5  ;;  %6209 = vmatpush3.bf16.msra.mxu0 %v6712_v12  ;;  %6231 = vmatpush3.bf16.msra.mxu1 %v6713_v42  ;;  %v4186_v24 = vmax.f32 %v4042_v47, 0.0  ;;  %v4188_v0 = vmax.f32 %v4085_v48, 0.0  ;;  %v6720_v4 = vld [vmem:[%s7671_s23 + $0x120] sm:$0xff]   ;;  %v6729_v51 = vld [vmem:[%s7671_s23 + $0x1b0] sm:$0xff]   ;;  %v6730_v30 = vld [vmem:[%s7671_s23 + $0x178] sm:$0xff]  }
 0xae6   : > { %v4201_v63 = vmax.f32 %v4044_v28, 0.0  ;;  %v4203_v37 = vmax.f32 %v4087_v1, 0.0  ;;  %6210 = vmatprep.subr.bf16.mxu0 %v6714_v23  ;;  %6232 = vmatprep.subr.bf16.mxu1 %v6715_v26  ;;  %v6728_v1 = vld [vmem:[%s7671_s23 + $0x130] sm:$0xff]  }
 0xae7   : > { %v4202_v6 = vmax.f32 %v4046_v54, 0.0  ;;  %v4204_v10 = vmax.f32 %v4089_v58, 0.0  ;;  %v6733_v54 = vld [vmem:[%s7671_s23 + $0x1b8] sm:$0xff]   ;;  %v6734_v58 = vld [vmem:[%s7671_s23 + $0x240] sm:$0xff]  }
 0xae8   : > { %v8268_v13 = vpack.c.bf16 %v4201_v63, %v4185_v61  ;;  %v8270_v57 = vpack.c.bf16 %v4203_v37, %v4187_v62  ;;  %v6738_v61 = vld [vmem:[%s7671_s23 + $0x248] sm:$0xff]  }
 0xae9   : > { %v8272_v2 = vpack.c.bf16 %v4202_v6, %v4186_v24  ;;  %v8274_v25 = vpack.c.bf16 %v4204_v10, %v4188_v0  ;;  %6211 = vmatpush3.bf16.msra.mxu0 %v6716_v59  ;;  %6233 = vmatpush3.bf16.msra.mxu1 %v6717_v60  ;;  %v4125_v56 = vpop.f32.mrb[48].mxu0  ;;  %v4168_v15 = vpop.f32.mrb[52].mxu1  ;;  %v6735_v59 = vld [vmem:[%s7671_s23 + $0x2c0] sm:$0xff]   ;;  %v6739_v62 = vld [vmem:[%s7671_s23 + $0x2c8] sm:$0xff]   ;;  %v6746_v24 = vld [vmem:[%s7671_s23 + $0x258] sm:$0xff]  }
 0xaea   : > { %v4126_v20 = vadd.f32 %v4125_v56, %v3641_v52  ;;  %v4169_v27 = vadd.f32 %v4168_v15, %v8211_v3  ;;  %v4127_v29 = vpop.f32.mrb[49].mxu0  ;;  %v4170_v5 = vpop.f32.mrb[53].mxu1  ;;  %6212 = vmatprep.subr.bf16.mxu0 %v6718_v17  ;;  %6234 = vmatprep.subr.bf16.mxu1 %v6719_v22  ;;  %v6736_v60 = vld [vmem:[%s7671_s23 + $0x200] sm:$0xff]   ;;  %v6740_v63 = vld [vmem:[%s7671_s23 + $0x208] sm:$0xff]   ;;  %v6742_v17 = vld [vmem:[%s7671_s23 + $0x250] sm:$0xff]  }
 0xaeb   : > { %v4128_v11 = vadd.f32 %v4127_v29, %v3645_v53  ;;  %v4171_v33 = vadd.f32 %v4170_v5, %v3653_v34  ;;  %v4129_v35 = vpop.f32.mrb[50].mxu0  ;;  %v4172_v7 = vpop.f32.mrb[54].mxu1  ;;  %v6741_v37 = vld [vmem:[%s7671_s23 + $0x288] sm:$0xff]   ;;  %v6745_v22 = vld [vmem:[%s7671_s23 + $0x290] sm:$0xff]   ;;  %v6747_v0 = vld [vmem:[%s7671_s23 + $0x2d8] sm:$0xff]  }
 0xaec   : > { %v4130_v16 = vadd.f32 %v4129_v35, %v3641_v52  ;;  %v4173_v14 = vadd.f32 %v4172_v7, %v8211_v3  ;;  %v4131_v19 = vpop.f32.mrb[51].mxu0  ;;  %v4174_v38 = vpop.f32.mrb[55].mxu1  ;;  %v4189_v12 = vmax.f32 %v4126_v20, 0.0  ;;  %v4191_v42 = vmax.f32 %v4169_v27, 0.0  ;;  %v6727_v3 = vld [vmem:[%s7671_s23 + $0x1f0] sm:$0xff]   ;;  %v6731_v52 = vld [vmem:[%s7671_s23 + $0x1f8] sm:$0xff]  }
 0xaed   : > { %v4132_v8 = vadd.f32 %v4131_v19, %v3645_v53  ;;  %v4175_v21 = vadd.f32 %v4174_v38, %v3653_v34  ;;  %6213 = vmatpush3.bf16.msra.mxu0 %v6720_v4  ;;  %6235 = vmatpush3.bf16.msra.mxu1 %v6721_v18  ;;  %v4190_v46 = vmax.f32 %v4128_v11, 0.0  ;;  %v4192_v23 = vmax.f32 %v4171_v33, 0.0  ;;  %v6732_v53 = vld [vmem:[%s7671_s23 + $0x138] sm:$0xff]   ;;  %v6737_v34 = vld [vmem:[%s7671_s23 + $0x280] sm:$0xff]   ;;  %v6754_v4 = vld [vmem:[%s7671_s23 + $0x268] sm:$0xff]  }
 0xaee   : > { %v4205_v43 = vmax.f32 %v4130_v16, 0.0  ;;  %v4207_v44 = vmax.f32 %v4173_v14, 0.0  ;;  %6214 = vmatprep.subr.bf16.mxu0 %v6722_v9  ;;  %6236 = vmatprep.subr.bf16.mxu1 %v6723_v31  ;;  %v6748_v6 = vld [vmem:[%s7671_s23 + $0x218] sm:$0xff]   ;;  %v6752_v56 = vld [vmem:[%s7671_s23 + $0x220] sm:$0xff]   ;;  %v6755_v18 = vld [vmem:[%s7671_s23 + $0x2e8] sm:$0xff]  }
 0xaef   : > { %v4206_v26 = vmax.f32 %v4132_v8, 0.0  ;;  %v4208_v47 = vmax.f32 %v4175_v21, 0.0  ;;  %v6749_v10 = vld [vmem:[%s7671_s23 + $0x298] sm:$0xff]   ;;  %v6753_v15 = vld [vmem:[%s7671_s23 + $0x2a0] sm:$0xff]   ;;  %v6756_v20 = vld [vmem:[%s7671_s23 + $0x228] sm:$0xff]  }
 0xaf0   : > { %v8286_v48 = vpack.c.bf16 %v4205_v43, %v4189_v12  ;;  %v8288_v49 = vpack.c.bf16 %v4207_v44, %v4191_v42  ;;  %v6757_v27 = vld [vmem:[%s7671_s23 + $0x2a8] sm:$0xff]   ;;  %v6758_v29 = vld [vmem:[%s7671_s23 + $0x270] sm:$0xff]   ;;  %v6762_v11 = vld [vmem:[%s7671_s23 + $0x278] sm:$0xff]  }
 0xaf1   : > { %v8290_v50 = vpack.c.bf16 %v4206_v26, %v4190_v46  ;;  %v8292_v28 = vpack.c.bf16 %v4208_v47, %v4192_v23  ;;  %6215 = vmatpush3.bf16.msra.mxu0 %v6724_v41  ;;  %6237 = vmatpush3.bf16.msra.mxu1 %v6725_v36  ;;  %v6759_v5 = vld [vmem:[%s7671_s23 + $0x2f0] sm:$0xff]   ;;  %v6763_v33 = vld [vmem:[%s7671_s23 + $0x2f8] sm:$0xff]   ;;  %v6766_v16 = vld [vmem:[%s7671_s23 + $0x340] sm:$0xff]  }
 0xaf2   : > { %6216 = vmatprep.subr.bf16.mxu0 %v6726_v45  ;;  %6238 = vmatprep.subr.bf16.mxu1 %v6727_v3  ;;  %v6760_v9 = vld [vmem:[%s7671_s23 + $0x230] sm:$0xff]   ;;  %v6764_v35 = vld [vmem:[%s7671_s23 + $0x238] sm:$0xff]   ;;  %v6767_v14 = vld [vmem:[%s7671_s23 + $0x3c0] sm:$0xff]  }
 0xaf3   : > { %v6761_v31 = vld [vmem:[%s7671_s23 + $0x2b0] sm:$0xff]   ;;  %v6765_v7 = vld [vmem:[%s7671_s23 + $0x2b8] sm:$0xff]   ;;  %v6768_v19 = vld [vmem:[%s7671_s23 + $0x300] sm:$0xff]  }
 0xaf4   : > { %v6769_v38 = vld [vmem:[%s7671_s23 + $0x380] sm:$0xff]   ;;  %v6770_v8 = vld [vmem:[%s7671_s23 + $0x348] sm:$0xff]   ;;  %v6774_v12 = vld [vmem:[%s7671_s23 + $0x350] sm:$0xff]  }
 0xaf5   : > { %6217 = vmatpush3.bf16.msra.mxu0 %v6728_v1  ;;  %6239 = vmatpush3.bf16.msra.mxu1 %v6729_v51  ;;  %v6771_v21 = vld [vmem:[%s7671_s23 + $0x3c8] sm:$0xff]   ;;  %v6777_v42 = vld [vmem:[%s7671_s23 + $0x390] sm:$0xff]   ;;  %v6778_v43 = vld [vmem:[%s7671_s23 + $0x358] sm:$0xff]  }
 0xaf6   : > { %6218 = vmatprep.subr.bf16.mxu0 %v6730_v30  ;;  %6240 = vmatprep.subr.bf16.mxu1 %v6731_v52  ;;  %v6772_v41 = vld [vmem:[%s7671_s23 + $0x308] sm:$0xff]   ;;  %v6779_v44 = vld [vmem:[%s7671_s23 + $0x3d8] sm:$0xff]   ;;  %v6782_v46 = vld [vmem:[%s7671_s23 + $0x360] sm:$0xff]  }
 0xaf7   : > { %v6773_v36 = vld [vmem:[%s7671_s23 + $0x388] sm:$0xff]   ;;  %v6780_v45 = vld [vmem:[%s7671_s23 + $0x318] sm:$0xff]   ;;  %v6783_v23 = vld [vmem:[%s7671_s23 + $0x3e0] sm:$0xff]  }
 0xaf8   : > { %v6781_v3 = vld [vmem:[%s7671_s23 + $0x398] sm:$0xff]   ;;  %v6784_v26 = vld [vmem:[%s7671_s23 + $0x320] sm:$0xff]   ;;  %v6788_v1 = vld [vmem:[%s7671_s23 + $0x328] sm:$0xff]  }
 0xaf9   : > { %6219 = vmatpush3.bf16.msra.mxu0 %v6732_v53  ;;  %6241 = vmatpush3.bf16.msra.mxu1 %v6733_v54  ;;  %v6785_v47 = vld [vmem:[%s7671_s23 + $0x3a0] sm:$0xff]   ;;  %v6789_v51 = vld [vmem:[%s7671_s23 + $0x3a8] sm:$0xff]   ;;  %v6790_v30 = vld [vmem:[%s7671_s23 + $0x370] sm:$0xff]  }
 0xafa   : > { %6248 = vmatprep.subr.bf16.mxu0 %v6734_v58  ;;  %6270 = vmatprep.subr.bf16.mxu1 %v6735_v59  ;;  %v6791_v52 = vld [vmem:[%s7671_s23 + $0x3f0] sm:$0xff]   ;;  %v6794_v58 = vld [vmem:[%s7671_s23 + $0x378] sm:$0xff]  }
 0xafb   : > { %v6792_v53 = vld [vmem:[%s7671_s23 + $0x330] sm:$0xff]   ;;  %v6795_v59 = vld [vmem:[%s7671_s23 + $0x3f8] sm:$0xff]  }
 0xafc   : > { %5371 = vmatmul.mubr.bf16.vlgmr.msra.gmra.mrb[56].mxu0 %v8247_v39  ;;  %5412 = vmatmul.mubr.bf16.vlgmr.msra.gmra.mrb[60].mxu1 %v8249_v40  ;;  %v6743_v39 = vld [vmem:[%s7671_s23 + $0x2d0] sm:$0xff]  }
 0xafd   : > { %6249 = vmatpush3.bf16.msra.mxu0 %v6736_v60  ;;  %5452 = vmatprep.mubr.bf16.mxu0 %v8272_v2  ;;  %v6744_v40 = vld [vmem:[%s7671_s23 + $0x210] sm:$0xff]   ;;  %v6750_v2 = vld [vmem:[%s7671_s23 + $0x260] sm:$0xff]   ;;  %v6796_v60 = vld [vmem:[%s7671_s23 + $0x338] sm:$0xff]  }
 0xafe   : > { %6271 = vmatpush3.bf16.msra.mxu1 %v6737_v34  ;;  %5493 = vmatprep.mubr.bf16.mxu1 %v8274_v25  ;;  %v6751_v25 = vld [vmem:[%s7671_s23 + $0x2e0] sm:$0xff]   ;;  %v6793_v54 = vld [vmem:[%s7671_s23 + $0x3b0] sm:$0xff]   ;;  %v6797_v34 = vld [vmem:[%s7671_s23 + $0x3b8] sm:$0xff]  }
 0xaff   : > { %6250 = vmatprep.subr.bf16.mxu0 %v6738_v61  ;;  %6272 = vmatprep.subr.bf16.mxu1 %v6739_v62 }
 0xb01   : > { %6251 = vmatpush3.bf16.msra.mxu0 %v6740_v63  ;;  %v5947_v63 = vld [vmem:[%s7673_s26 + $0x14] ss:$0 sm:$0xff] }
 0xb02   : > { %6273 = vmatpush3.bf16.msra.mxu1 %v6741_v37  ;;  %6252 = vmatprep.subr.bf16.mxu0 %v6742_v17 }
 0xb03   : > { %6274 = vmatprep.subr.bf16.mxu1 %v6743_v39 }
 0xb05   : > { %6253 = vmatpush3.bf16.msra.mxu0 %v6744_v40 }
 0xb06   : > { %6275 = vmatpush3.bf16.msra.mxu1 %v6745_v22  ;;  %6254 = vmatprep.subr.bf16.mxu0 %v6746_v24 }
 0xb07   : > { %6276 = vmatprep.subr.bf16.mxu1 %v6747_v0 }
 0xb09   : > { %6255 = vmatpush3.bf16.msra.mxu0 %v6748_v6 }
 0xb0a   : > { %6277 = vmatpush3.bf16.msra.mxu1 %v6749_v10  ;;  %6256 = vmatprep.subr.bf16.mxu0 %v6750_v2 }
 0xb0b   : > { %6278 = vmatprep.subr.bf16.mxu1 %v6751_v25 }
 0xb0d   : > { %6257 = vmatpush3.bf16.msra.mxu0 %v6752_v56 }
 0xb0e   : > { %6279 = vmatpush3.bf16.msra.mxu1 %v6753_v15  ;;  %6258 = vmatprep.subr.bf16.mxu0 %v6754_v4 }
 0xb0f   : > { %6280 = vmatprep.subr.bf16.mxu1 %v6755_v18 }
 0xb11   : > { %6259 = vmatpush3.bf16.msra.mxu0 %v6756_v20 }
 0xb12   : > { %6281 = vmatpush3.bf16.msra.mxu1 %v6757_v27  ;;  %6260 = vmatprep.subr.bf16.mxu0 %v6758_v29 }
 0xb13   : > { %6282 = vmatprep.subr.bf16.mxu1 %v6759_v5 }
 0xb15   : > { %6261 = vmatpush3.bf16.msra.mxu0 %v6760_v9 }
 0xb16   : > { %6283 = vmatpush3.bf16.msra.mxu1 %v6761_v31  ;;  %6262 = vmatprep.subr.bf16.mxu0 %v6762_v11 }
 0xb17   : > { %6284 = vmatprep.subr.bf16.mxu1 %v6763_v33 }
 0xb19   : > { %6263 = vmatpush3.bf16.msra.mxu0 %v6764_v35 }
 0xb1a   : > { %6285 = vmatpush3.bf16.msra.mxu1 %v6765_v7  ;;  %6292 = vmatprep.subr.bf16.mxu0 %v6766_v16 }
 0xb1b   : > { %6314 = vmatprep.subr.bf16.mxu1 %v6767_v14 }
 0xb1c   : > { %5453 = vmatmul.mubr.bf16.vlgmr.msra.gmra.mrb[60].mxu0 %v8268_v13  ;;  %v6775_v13 = vld [vmem:[%s7671_s23 + $0x3d0] sm:$0xff]  }
 0xb1d   : > { %5494 = vmatmul.mubr.bf16.vlgmr.msra.gmra.mrb[64].mxu1 %v8270_v57  ;;  %6293 = vmatpush3.bf16.msra.mxu0 %v6768_v19  ;;  %v6776_v57 = vld [vmem:[%s7671_s23 + $0x310] sm:$0xff]  }
 0xb1e   : > { %5534 = vmatprep.mubr.bf16.mxu0 %v8290_v50  ;;  %6315 = vmatpush3.bf16.msra.mxu1 %v6769_v38  ;;  %v6786_v50 = vld [vmem:[%s7671_s23 + $0x368] sm:$0xff]  }
 0xb1f   : > { %5575 = vmatprep.mubr.bf16.mxu1 %v8292_v28  ;;  %6294 = vmatprep.subr.bf16.mxu0 %v6770_v8  ;;  %v6787_v28 = vld [vmem:[%s7671_s23 + $0x3e8] sm:$0xff]  }
 0xb20   : > { %6316 = vmatprep.subr.bf16.mxu1 %v6771_v21 }
 0xb21   : > { %6295 = vmatpush3.bf16.msra.mxu0 %v6772_v41 }
 0xb22   : > { %6317 = vmatpush3.bf16.msra.mxu1 %v6773_v36  ;;  %6296 = vmatprep.subr.bf16.mxu0 %v6774_v12 }
 0xb23   : > { %6318 = vmatprep.subr.bf16.mxu1 %v6775_v13 }
 0xb25   : > { %6297 = vmatpush3.bf16.msra.mxu0 %v6776_v57 }
 0xb26   : > { %6319 = vmatpush3.bf16.msra.mxu1 %v6777_v42  ;;  %6298 = vmatprep.subr.bf16.mxu0 %v6778_v43 }
 0xb27   : > { %6320 = vmatprep.subr.bf16.mxu1 %v6779_v44 }
 0xb29   : > { %6299 = vmatpush3.bf16.msra.mxu0 %v6780_v45 }
 0xb2a   : > { %6321 = vmatpush3.bf16.msra.mxu1 %v6781_v3  ;;  %6300 = vmatprep.subr.bf16.mxu0 %v6782_v46 }
 0xb2b   : > { %6322 = vmatprep.subr.bf16.mxu1 %v6783_v23 }
 0xb2d   : > { %6301 = vmatpush3.bf16.msra.mxu0 %v6784_v26 }
 0xb2e   : > { %6323 = vmatpush3.bf16.msra.mxu1 %v6785_v47  ;;  %6302 = vmatprep.subr.bf16.mxu0 %v6786_v50 }
 0xb2f   : > { %6324 = vmatprep.subr.bf16.mxu1 %v6787_v28 }
 0xb31   : > { %6303 = vmatpush3.bf16.msra.mxu0 %v6788_v1 }
 0xb32   : > { %6325 = vmatpush3.bf16.msra.mxu1 %v6789_v51  ;;  %6304 = vmatprep.subr.bf16.mxu0 %v6790_v30 }
 0xb33   : > { %6326 = vmatprep.subr.bf16.mxu1 %v6791_v52 }
 0xb35   : > { %6305 = vmatpush3.bf16.msra.mxu0 %v6792_v53 }
 0xb36   : > { %6327 = vmatpush3.bf16.msra.mxu1 %v6793_v54  ;;  %6306 = vmatprep.subr.bf16.mxu0 %v6794_v58 }
 0xb37   : > { %6328 = vmatprep.subr.bf16.mxu1 %v6795_v59 }
 0xb39   : > { %6307 = vmatpush3.bf16.msra.mxu0 %v6796_v60 }
 0xb3a   : > { %6329 = vmatpush3.bf16.msra.mxu1 %v6797_v34 }
 0xb3c   : > { %5535 = vmatmul.mubr.bf16.vlgmr.msra.gmra.mrb[64].mxu0 %v8286_v48 }
 0xb3d   : > { %5576 = vmatmul.mubr.bf16.vlgmr.msra.gmra.mrb[68].mxu1 %v8288_v49 }
 0xbaf   : > { %v6176_v61 = vpop.f32.mrb[52].mxu0  ;;  %v6198_v62 = vpop.f32.mrb[56].mxu1 }
 0xbb0   : > { %v6177_v37 = vpop.f32.mrb[53].mxu0  ;;  %v6199_v17 = vpop.f32.mrb[57].mxu1 }
 0xbb1   : > { %v6178_v39 = vadd.f32 %v6177_v37, %v6176_v61  ;;  %v6200_v40 = vadd.f32 %v6199_v17, %v6198_v62  ;;  %v6179_v22 = vpop.f32.mrb[54].mxu0  ;;  %v6201_v24 = vpop.f32.mrb[58].mxu1 }
 0xbb2   : > { %v6180_v0 = vpop.f32.mrb[55].mxu0  ;;  %v6202_v6 = vpop.f32.mrb[59].mxu1 }
 0xbb3   : > { %v5291_v10 = vadd.f32 %v6178_v39, %v5947_v63  ;;  %v6181_v2 = vadd.f32 %v6180_v0, %v6179_v22  ;;  %v6203_v25 = vadd.f32 %v6202_v6, %v6201_v24 }
 0xbb5   : > { %v5332_v56 = vadd.f32 %v6200_v40, %v5291_v10  ;;  %v5294_v15 = vadd.f32 %v6181_v2, %v5947_v63 }
 0xbb7   : > { %v5335_v4 = vadd.f32 %v6203_v25, %v5294_v15 }
 0xbcf   : > { %v6220_v48 = vpop.f32.mrb[56].mxu0  ;;  %v6242_v18 = vpop.f32.mrb[60].mxu1 }
 0xbd0   : > { %v6221_v49 = vpop.f32.mrb[57].mxu0  ;;  %v6243_v20 = vpop.f32.mrb[61].mxu1 }
 0xbd1   : > { %v6222_v27 = vadd.f32 %v6221_v49, %v6220_v48  ;;  %v6244_v29 = vadd.f32 %v6243_v20, %v6242_v18  ;;  %v6223_v5 = vpop.f32.mrb[58].mxu0  ;;  %v6245_v9 = vpop.f32.mrb[62].mxu1 }
 0xbd2   : > { %v6224_v31 = vpop.f32.mrb[59].mxu0  ;;  %v6246_v11 = vpop.f32.mrb[63].mxu1 }
 0xbd3   : > { %v5373_v33 = vadd.f32 %v6222_v27, %v5332_v56  ;;  %v6225_v35 = vadd.f32 %v6224_v31, %v6223_v5  ;;  %v6247_v7 = vadd.f32 %v6246_v11, %v6245_v9  ;;  %v6077_v31 = vld [vmem:[%s7673_s26 + $0x16] ss:$0 sm:$0xff] }
 0xbd5   : > { %v5414_v16 = vadd.f32 %v6244_v29, %v5373_v33  ;;  %v5376_v14 = vadd.f32 %v6225_v35, %v5335_v4  ;;  %v6076_v29 = vld [vmem:[%s7673_s26 + $0x15] ss:$0 sm:$0xff] }
 0xbd7   : > { %v5417_v19 = vadd.f32 %v6247_v7, %v5376_v14 }
 0xbef   : > { %v6264_v38 = vpop.f32.mrb[60].mxu0 }
 0xbf0   : > { %v6286_v8 = vpop.f32.mrb[64].mxu1  ;;  %v6265_v21 = vpop.f32.mrb[61].mxu0 }
 0xbf1   : > { %v6266_v41 = vadd.f32 %v6265_v21, %v6264_v38  ;;  %v6287_v36 = vpop.f32.mrb[65].mxu1  ;;  %v6267_v12 = vpop.f32.mrb[62].mxu0 }
 0xbf2   : > { %v6288_v13 = vadd.f32 %v6287_v36, %v6286_v8  ;;  %v6289_v57 = vpop.f32.mrb[66].mxu1  ;;  %v6268_v42 = vpop.f32.mrb[63].mxu0 }
 0xbf3   : > { %v5455_v43 = vadd.f32 %v6266_v41, %v5414_v16  ;;  %v6269_v44 = vadd.f32 %v6268_v42, %v6267_v12  ;;  %v6290_v45 = vpop.f32.mrb[67].mxu1 }
 0xbf4   : > { %v6291_v3 = vadd.f32 %v6290_v45, %v6289_v57 }
 0xbf5   : > { %v5496_v46 = vadd.f32 %v6288_v13, %v5455_v43  ;;  %v5458_v23 = vadd.f32 %v6269_v44, %v5417_v19 }
 0xbf7   : > { %v5499_v26 = vadd.f32 %v6291_v3, %v5458_v23 }
 0xc0f   : > { %v6308_v47 = vpop.f32.mrb[64].mxu0 }
 0xc10   : > { %v6330_v50 = vpop.f32.mrb[68].mxu1  ;;  %v6309_v28 = vpop.f32.mrb[65].mxu0 }
 0xc11   : > { %v6310_v1 = vadd.f32 %v6309_v28, %v6308_v47  ;;  %v6331_v51 = vpop.f32.mrb[69].mxu1  ;;  %v6311_v30 = vpop.f32.mrb[66].mxu0 }
 0xc12   : > { %v6332_v52 = vadd.f32 %v6331_v51, %v6330_v50  ;;  %v6333_v53 = vpop.f32.mrb[70].mxu1  ;;  %v6312_v54 = vpop.f32.mrb[67].mxu0 }
 0xc13   : > { %v5537_v58 = vadd.f32 %v6310_v1, %v5496_v46  ;;  %v6313_v59 = vadd.f32 %v6312_v54, %v6311_v30  ;;  %v6334_v60 = vpop.f32.mrb[71].mxu1 }
 0xc14   : > { %v6335_v34 = vadd.f32 %v6334_v60, %v6333_v53 }
 0xc15   : > { %v5578_v61 = vadd.f32 %v6332_v52, %v5537_v58  ;;  %v5540_v62 = vadd.f32 %v6313_v59, %v5499_v26 }
 0xc17   : > { %v5581_v63 = vadd.f32 %v6335_v34, %v5540_v62  ;;  %v5584_v37 = vadd.f32 %v5578_v61, %v8124_v55 }
 0xc19   : > { %v5586_v17 = vsel %vm668_vm4, %v5584_v37, 0.0  ;;  %v5585_v39 = vadd.f32 %v5581_v63, %v8126_v32 }
 0xc1a   : > { %5587 = vadd.xlane.f32.xlu0 %v5586_v17 }
 0xc1b   : > { %v5589_v40 = vsel %vm668_vm4, %v5585_v39, 0.0 }
 0xc1c   : > { %5590 = vadd.xlane.f32.xlu1 %v5589_v40 }
 0xca7   : > { %v5588_v22 = vpop.xlane.xlu0 %5587 }
 0xca8   : > { %v5592_v24 = vmul.f32 0.03125, %v5588_v22 }
 0xca9   : > { %v5591_v0 = vpop.xlane.xlu1 %5590 }
 0xcaa   : > { %v5594_v6 = vsub.f32 %v5584_v37, %v5592_v24  ;;  %v5593_v10 = vmul.f32 0.03125, %v5591_v0 }
 0xcac   : > { %v5595_v2 = vsub.f32 %v5585_v39, %v5593_v10  ;;  %v5596_v25 = vmul.f32 %v5594_v6, %v5594_v6 }
 0xcae   : > { %v5598_v56 = vsel %vm668_vm4, %v5596_v25, 0.0  ;;  %v5597_v15 = vmul.f32 %v5595_v2, %v5595_v2 }
 0xcaf   : > { %5599 = vadd.xlane.f32.xlu0 %v5598_v56 }
 0xcb0   : > { %v5601_v55 = vsel %vm668_vm4, %v5597_v15, 0.0 }
 0xcb1   : > { %5602 = vadd.xlane.f32.xlu1 %v5601_v55 }
 0xd3c   : > { %v5600_v32 = vpop.xlane.xlu0 %5599 }
 0xd3d   : > { %v5604_v4 = vmul.f32 0.03125, %v5600_v32 }
 0xd3e   : > { %v5603_v48 = vpop.xlane.xlu1 %5602 }
 0xd3f   : > { %v5606_v18 = vadd.f32 1e-05, %v5604_v4  ;;  %v5605_v49 = vmul.f32 0.03125, %v5603_v48 }
 0xd41   : > { %6866 = vrsqrt.f32 %v5606_v18  ;;  %v5607_v20 = vadd.f32 1e-05, %v5605_v49 }
 0xd43   : > { %6868 = vrsqrt.f32 %v5607_v20 }
 0xd4b   : > { %v6867_v27 = vpop.eup %6866 }
 0xd4c   : > { %v5610_v5 = vmul.f32 %v6867_v27, %v5594_v6 }
 0xd4d   : > { %v6869_v9 = vpop.eup %6868 }
 0xd4e   : > { %v5619_v11 = vmul.f32 %v6076_v29, %v5610_v5  ;;  %v5611_v33 = vmul.f32 %v6869_v9, %v5595_v2  ;;  %5635 = sbr.rel (%p6078_p6) target bundleno = 3413 (0xd55), region = 100 }
 0xd50   : > { %v5628_v35 = vadd.f32 %v6077_v31, %v5619_v11  ;;  %v5620_v7 = vmul.f32 %v6076_v29, %v5611_v33 }
 0xd52   : > { %5630 = vst.msk [vmem:[#allocation2] sm:$0xff] %vm668_vm4, %v5628_v35  ;;  %v5629_v16 = vadd.f32 %v6077_v31, %v5620_v7  ;;  %5636 = vst.msk [vmem:[#allocation17] sm:$0xff] (!%p6078_p6), %vm668_vm4, %v5628_v35 }
 0xd54   : > { %5631 = vst.msk [vmem:[#allocation2 + $0x8] sm:$0xff] %vm668_vm4, %v5629_v16  ;;  %5637 = vst.msk [vmem:[#allocation17 + $0x8] sm:$0xff] (!%p6078_p6), %vm668_vm4, %v5629_v16 }
 0xd55 PF: > { %p6588_p13 = scmp.eq.s32.totalorder %s7330_s13, 1  ;;  %s7259_s16 = smov [#allocation17]  }
 0xd56   : > { %s5644_s14 = sshll.u32 %s7259_s16, 4  ;;  %s5645_s14 = int_to_ptr.vmem [resolvable:$true] %s5644_s14 }
 0xd57   : > { %s7134_s23 = scalar_lea.vmem %s5645_s14, 256  ;;  %p7141_p0 = scmp.lt.s32.totalorder %s5645_s14, %s5645_s14 }
 0xd58   : > { %p7135_p7 = scmp.ne.s32.totalorder %s5645_s14, %s7134_s23  ;;  %p7142_p10 = scmp.lt.s32.totalorder %s7134_s23, %s7134_s23 }
 0xd5a   : > { %p7136_p3 = pnand %p7135_p7, %p6588_p13  ;;  %p7143_p11 = por %p7142_p10, %p7141_p0 }
 0xd5c   : > { %p7137_p4 = pneg %p7136_p3 }
 0xd5e   : > { %p7144_p5 = pnand %p7143_p11, %p7137_p4 }
 0xd60   : > { %7147 = shalt.err (!%p7144_p5)
}
 0xd61   : > { %s8483_s29 = sld [smem:[#allocation29_spill]] }
 0xd67   : > { %s7148_s22 = scalar_lea.hbm %s8483_s29, 256 }
 0xd68   : > { %p7149_p9 = scmp.ne.s32.totalorder %s8483_s29, %s7148_s22  ;;  %p7154_p12 = scmp.lt.u32.totalorder %s7148_s22, %s8483_s29 }
 0xd6a   : > { %p7150_p8 = pnand %p7149_p9, %p6588_p13 }
 0xd6c   : > { %p7151_p2 = pneg %p7150_p8 }
 0xd6e   : > { %p7156_p1 = pnand %p7154_p12, %p7151_p2 }
 0xd70   : > { %7159 = shalt.err (!%p7156_p1)
}
 0xd71   : > { %s7260_s24 = smov 128  }
 0xd72   : > { %6547 = dma.vmem_to_hbm [thread:$0]  (%p6588_p13), %s5645_s14, 256, %s8483_s29, [#allocation6], %s7260_s24, %s7260_s24, %s7252_s9  }
 0xd73   : > { %7193 = dma.done.wait (%p6588_p13), [#allocation6], 256  }
 0xd74   : > { %7195 = vsyncadd (%p6588_p13), [#allocation6], 4294967040 }
 0xd75 PF: > { %s8484_s12 = sld [smem:[#allocation24_spill]]  ;;  %s8485_s25 = sld [smem:[#allocation23_spill]] }
 0xd76   : > { %s8486_s11 = sld [smem:[#allocation25_spill]]  ;;  %s8487_s30 = smov %s7202_s10 }
 0xd7b   : > { %p20_p6 = scmp.ge.s32.totalorder %s8484_s12, 4   ;;  %s8488_s10 = smov %s8485_s25 }
 0xd7d   :  { %22 = sbr.rel (!%p20_p6) target bundleno = 10 (0xa), region = 160 }
 0xd84   :  { %5660 = vsyncpa [#allocation5], 1 }
 0xd85   :  { %5662 = vsyncpa [#allocation5 + $0x1], 1 }
 0xd86   :  { %5663 = vsyncpa [#allocation8], 1 }
 0xd87   :  { %5664 = vsyncpa [#allocation11], 1 }
 0xd88   :  { %5665 = vsyncpa [#allocation6], 1 }
 0xd89   :  { %5667 = vsyncpa [#allocation6 + $0x1], 1 }

</bundles_post_ra>
